<compile_context>
chip_gen: v5e
topology: v5e:2x2
jax: 0.10.0
libtpu: 0.0.40
codegen_flags: <defaults>
</compile_context>

<pallas_src>
import math

import numpy as np
import jax
import jax.numpy as jnp
from jax.experimental import pallas as pl
from jax.experimental.pallas import tpu as pltpu

PI = math.pi
TWO_PI = 2.0 * math.pi
INV_2PI = 1.0 / TWO_PI
LANE = 128


# ----------------------------- mask construction (reference only) -----------

def make_2d_link_active_stripes(shape, mu, off):
    """NumPy port of fthmc.utils.layers.make_2d_link_active_stripes."""
    assert len(shape) == 2 + 1
    assert shape[0] == len(shape[1:])
    assert mu in (0, 1)
    mask = np.zeros(shape, dtype=np.float32)
    if mu == 0:
        mask[0, :, 0::4] = 1
    else:
        mask[1, 0::4] = 1
    nu = 1 - mu
    return np.roll(mask, off, axis=nu + 1)


def make_single_stripes(shape2d, mu, off):
    mask = np.zeros(shape2d, dtype=np.float32)
    if mu == 0:
        mask[:, 0::4] = 1
    else:
        mask[0::4] = 1
    return np.roll(mask, off, axis=1 - mu)


# ----------------------------- helpers ---------------------------------------

def _mod_2pi(z):
    # torch_mod: remainder(z + pi, 2*pi) - pi, with the divide replaced by a
    # constant multiply (perf feedback: keep the EUP slot for cos/sin/exp).
    y = z + PI
    return y - TWO_PI * jnp.floor(y * INV_2PI) - PI


# ----------------------------- kernel ----------------------------------------

def _make_kernel(mask_mu, mask_off, S):
    off = mask_off % 4
    n_act = S // 4
    active_rows = tuple(off + 4 * k for k in range(n_act))
    sgn = 1.0 if mask_mu == 0 else -1.0

    def kernel(x_ref, w_ref, fmu_ref, logj_ref):
        # x_ref: (2, S, O, BT) lane-major links, stripe axis leading.
        BT = x_ref.shape[3]

        # hoisted scalar parameter reads (flat (6,) SMEM array)
        w00 = w_ref[0]
        w01 = w_ref[1]
        w10 = w_ref[2]
        w11 = w_ref[3]
        b0 = w_ref[4]
        b1 = w_ref[5]

        def plaq_row(p):
            # U(1) plaquette angles on stripe-row p (static index, wraps mod S)
            p = p % S
            q = (p + 1) % S
            if mask_mu == 0:
                # layout (Ly, Lx, B): plaq[ly] = x0[ly] + roll_Lx(x1[ly])
                #                                 - x0[ly+1] - x1[ly]
                return (x_ref[0, p] + jnp.roll(x_ref[1, p], -1, axis=0)
                        - x_ref[0, q] - x_ref[1, p])
            # layout (Lx, Ly, B): plaq[lx] = x0[lx] + x1[lx+1]
            #                                 - roll_Ly(x0[lx]) - x1[lx]
            return (x_ref[0, p] + x_ref[1, q]
                    - jnp.roll(x_ref[0, p], -1, axis=0) - x_ref[1, p])

        # Passive rows of the mu channel pass through unchanged; the other
        # link channel is not written at all (reassembled by the caller).
        for r in range(S):
            if r not in active_rows:
                fmu_ref[r] = x_ref[mask_mu, r]

        logj = jnp.zeros((1, BT), dtype=jnp.float32)
        for a in active_rows:
            pa = plaq_row(a)        # (O, BT) active plaquettes
            pf1 = plaq_row(a + 1)   # frozen neighbour stripes
            pf2 = plaq_row(a + 2)

            # synthetic NCP-style conditioner: 1x1 mix of the mean cos/sin of
            # the two frozen neighbour stripes (transcendentals on 2/4 rows).
            c = 0.5 * (jnp.cos(pf1) + jnp.cos(pf2))
            sn = 0.5 * (jnp.sin(pf1) + jnp.sin(pf2))
            s = w00 * c + w01 * sn + b0
            t = w10 * c + w11 * sn + b1

            # affine flow on the active plaquettes; the inner torch_mod on
            # new_plaq is folded into the single link-level mod below.
            delta = jnp.exp(s) * pa + t - pa

            # link update for the active stripe of the mu channel
            fmu_ref[a] = _mod_2pi(sgn * delta + x_ref[mask_mu, a])

            # log-Jacobian contribution: sum over the other lattice axis
            logj = logj + jnp.sum(s, axis=0, keepdims=True)

        logj_ref[...] = logj

    return kernel


# ----------------------------- wrappers ---------------------------------------

def _layout_perm(mask_mu):
    # torch (B, Nd, Lx, Ly) -> lane-major (Nd, S, O, B), stripe axis leading.
    return (1, 3, 2, 0) if mask_mu == 0 else (1, 2, 3, 0)


def _pick_batch_tile(Bp):
    if Bp <= LANE:
        return LANE
    if Bp >= 1024:
        return 512
    # two roughly equal tiles so both v7x TensorCores get work
    return max(LANE, ((Bp // 2 + LANE - 1) // LANE) * LANE)


def gauge_equiv_coupling_lanemajor(xt, params, *, mask_mu, mask_off):
    """xt: (2, S, O, Bp) lane-major padded link angles (stripe axis leading).

    Returns (fmu, logj): updated mu link channel (S, O, Bp) and logJ (1, Bp).
    The passive channel is xt[1 - mask_mu], untouched.
    """
    Nd, S, O, Bp = xt.shape
    assert Nd == 2 and S % 4 == 0 and Bp % LANE == 0

    BT = _pick_batch_tile(Bp)
    Bpp = ((Bp + BT - 1) // BT) * BT
    if Bpp != Bp:
        xt = jnp.pad(xt, ((0, 0), (0, 0), (0, 0), (0, Bpp - Bp)))

    fmu, logj = pl.pallas_call(
        _make_kernel(mask_mu, mask_off, S),
        grid=(Bpp // BT,),
        in_specs=[
            pl.BlockSpec((Nd, S, O, BT), lambda b: (0, 0, 0, b)),
            pl.BlockSpec(memory_space=pltpu.MemorySpace.SMEM),
        ],
        out_specs=(
            pl.BlockSpec((S, O, BT), lambda b: (0, 0, b)),
            pl.BlockSpec((1, BT), lambda b: (0, b)),
        ),
        out_shape=(
            jax.ShapeDtypeStruct((S, O, Bpp), xt.dtype),
            jax.ShapeDtypeStruct((1, Bpp), jnp.float32),
        ),
        compiler_params=pltpu.CompilerParams(
            dimension_semantics=("parallel",),
            vmem_limit_bytes=32 * 1024 * 1024),
    )(xt, params)
    return fmu[..., :Bp], logj[:, :Bp]


def gauge_equiv_coupling_forward(x, W, bvec, *, mask_mu, mask_off):
    """Convenience wrapper from torch layout (B, 2, Lx, Ly).

    In a flow stack, keep the padded lane-major layout across layers and call
    gauge_equiv_coupling_lanemajor directly (transpose/pad once at the model
    boundary) -- this wrapper exists only for the demo / boundary conversion.
    """
    B, Nd, Lx, Ly = x.shape
    assert Nd == 2
    Bp = ((B + LANE - 1) // LANE) * LANE

    perm = _layout_perm(mask_mu)
    xt = jnp.transpose(x, perm)                         # (Nd, S, O, B)
    if Bp != B:
        xt = jnp.pad(xt, ((0, 0), (0, 0), (0, 0), (0, Bp - B)))

    params = jnp.concatenate(
        [W.reshape(-1), bvec.reshape(-1)]).astype(jnp.float32)   # (6,) -> SMEM

    fmu, logj = gauge_equiv_coupling_lanemajor(
        xt, params, mask_mu=mask_mu, mask_off=mask_off)

    # reassemble: updated mu channel from the kernel, passive channel untouched
    if mask_mu == 0:
        fx_t = jnp.stack([fmu, xt[1]], axis=0)
    else:
        fx_t = jnp.stack([xt[0], fmu], axis=0)

    inv = tuple(int(i) for i in np.argsort(perm))
    fx = jnp.transpose(fx_t[..., :B], inv)              # back to (B, 2, Lx, Ly)
    return fx, logj[0, :B]


# ----------------------------- pure-JAX reference -----------------------------

def reference_forward(x, active_mask, active_pmask, W, bvec, *, mask_mu):
    x0, x1 = x[:, 0], x[:, 1]
    plaq = x0 + jnp.roll(x1, -1, axis=1) - jnp.roll(x0, -1, axis=2) - x1
    stripe_axis = 2 if mask_mu == 0 else 1
    p1 = jnp.roll(plaq, -1, axis=stripe_axis)            # frozen neighbour +1
    p2 = jnp.roll(plaq, -2, axis=stripe_axis)            # frozen neighbour +2
    c = 0.5 * (jnp.cos(p1) + jnp.cos(p2))
    sn = 0.5 * (jnp.sin(p1) + jnp.sin(p2))
    s = W[0, 0] * c + W[0, 1] * sn + bvec[0]
    t = W[1, 0] * c + W[1, 1] * sn + bvec[1]
    new_plaq = (active_pmask * _mod_2pi(jnp.exp(s) * plaq + t)
                + (1.0 - active_pmask) * plaq)
    logj = jnp.sum(active_pmask * s, axis=(1, 2))
    delta = new_plaq - plaq
    delta_links = jnp.stack([delta, -delta], axis=1)
    fx = (active_mask[None] * _mod_2pi(delta_links + x)
          + (1.0 - active_mask[None]) * x)
    return fx, logj


# ----------------------------- main -------------------------------------------

if __name__ == "__main__":
    B = 2
    L = 16

    # deterministic synthetic plaq_coupling parameters (1x1 channel mix)
    W = jnp.asarray(np.array([[0.10, -0.20],
                              [0.05, 0.15]], dtype=np.float32))
    bvec = jnp.asarray(np.array([0.02, -0.01], dtype=np.float32))

    # deterministic input links in (-pi, pi)
    key = jax.random.PRNGKey(0)
    x = jax.random.uniform(key, (B, 2, L, L), dtype=jnp.float32,
                           minval=-PI, maxval=PI)

    for (mask_mu, mask_off) in [(0, 0), (1, 1), (0, 2), (1, 3)]:
        active_mask = jnp.asarray(
            make_2d_link_active_stripes((2, L, L), mask_mu, mask_off))
        active_pmask = jnp.asarray(
            make_single_stripes((L, L), mask_mu, mask_off))

        fx, logj = gauge_equiv_coupling_forward(
            x, W, bvec, mask_mu=mask_mu, mask_off=mask_off)
        fx = jax.block_until_ready(fx)
        logj = jax.block_until_ready(logj)

        fx_ref, logj_ref = reference_forward(
            x, active_mask, active_pmask, W, bvec, mask_mu=mask_mu)

        # Link angles are compared modulo 2*pi: the kernel folds the double
        # torch_mod into a single link-level mod (perf feedback #1), which can
        # land a value on the other side of the +/-pi branch cut by exactly 2*pi.
        dphase = np.asarray(_mod_2pi(fx - fx_ref))
        np.testing.assert_allclose(dphase, np.zeros_like(dphase), atol=2e-4)
        np.testing.assert_allclose(np.asarray(logj), np.asarray(logj_ref),
                                   rtol=2e-4, atol=2e-4)

    print("KERNEL_OK")
</pallas_src>

<mosaic_0001>
module attributes {stable_mosaic.version = 11 : i64} {
  func.func @kernel(%arg0: i32, %arg1: memref<2x16x16x128xf32, #tpu.memory_space<vmem>>, %arg2: memref<6xf32, #tpu.memory_space<smem>>, %arg3: memref<16x16x128xf32, #tpu.memory_space<vmem>>, %arg4: memref<1x128xf32, #tpu.memory_space<vmem>>) attributes {dimension_semantics = [#tpu.dimension_semantics<parallel>], iteration_bounds = array<i64: 1>, scalar_prefetch = 0 : i64, scratch_operands = 0 : i64, tpu.core_type = #tpu.core_type<tc>, window_params = [{transform_indices = @transform_0, window_bounds = array<i64: 2, 16, 16, 128>}, {transform_indices = @transform_1, window_bounds = array<i64: 6>}, {transform_indices = @transform_2, window_bounds = array<i64: 16, 16, 128>}, {transform_indices = @transform_3, window_bounds = array<i64: 1, 128>}]} {
    %c0 = arith.constant 0 : index
    %0 = memref.load %arg2[%c0] : memref<6xf32, #tpu.memory_space<smem>>
    %c1 = arith.constant 1 : index
    %1 = memref.load %arg2[%c1] : memref<6xf32, #tpu.memory_space<smem>>
    %c2 = arith.constant 2 : index
    %2 = memref.load %arg2[%c2] : memref<6xf32, #tpu.memory_space<smem>>
    %c3 = arith.constant 3 : index
    %3 = memref.load %arg2[%c3] : memref<6xf32, #tpu.memory_space<smem>>
    %c4 = arith.constant 4 : index
    %4 = memref.load %arg2[%c4] : memref<6xf32, #tpu.memory_space<smem>>
    %c5 = arith.constant 5 : index
    %5 = memref.load %arg2[%c5] : memref<6xf32, #tpu.memory_space<smem>>
    %c0_0 = arith.constant 0 : index
    %c1_1 = arith.constant 1 : index
    %c0_2 = arith.constant 0 : index
    %c0_3 = arith.constant 0 : index
    %6 = vector.load %arg1[%c0_0, %c1_1, %c0_2, %c0_3] : memref<2x16x16x128xf32, #tpu.memory_space<vmem>>, vector<1x1x16x128xf32>
    %7 = vector.shape_cast %6 : vector<1x1x16x128xf32> to vector<16x128xf32>
    %c1_4 = arith.constant 1 : index
    %c0_5 = arith.constant 0 : index
    %c0_6 = arith.constant 0 : index
    %8 = vector.load %arg3[%c1_4, %c0_5, %c0_6] : memref<16x16x128xf32, #tpu.memory_space<vmem>>, vector<1x16x128xf32>
    %9 = vector.shape_cast %8 : vector<1x16x128xf32> to vector<16x128xf32>
    %10 = vector.shape_cast %7 : vector<16x128xf32> to vector<1x16x128xf32>
    tpu.vector_store %arg3[%c1_4, %c0_5, %c0_6], %10 {strides = array<i32>} : memref<16x16x128xf32, #tpu.memory_space<vmem>>, vector<1x16x128xf32>,
    %c0_7 = arith.constant 0 : index
    %c2_8 = arith.constant 2 : index
    %c0_9 = arith.constant 0 : index
    %c0_10 = arith.constant 0 : index
    %11 = vector.load %arg1[%c0_7, %c2_8, %c0_9, %c0_10] : memref<2x16x16x128xf32, #tpu.memory_space<vmem>>, vector<1x1x16x128xf32>
    %12 = vector.shape_cast %11 : vector<1x1x16x128xf32> to vector<16x128xf32>
    %c2_11 = arith.constant 2 : index
    %c0_12 = arith.constant 0 : index
    %c0_13 = arith.constant 0 : index
    %13 = vector.load %arg3[%c2_11, %c0_12, %c0_13] : memref<16x16x128xf32, #tpu.memory_space<vmem>>, vector<1x16x128xf32>
    %14 = vector.shape_cast %13 : vector<1x16x128xf32> to vector<16x128xf32>
    %15 = vector.shape_cast %12 : vector<16x128xf32> to vector<1x16x128xf32>
    tpu.vector_store %arg3[%c2_11, %c0_12, %c0_13], %15 {strides = array<i32>} : memref<16x16x128xf32, #tpu.memory_space<vmem>>, vector<1x16x128xf32>,
    %c0_14 = arith.constant 0 : index
    %c3_15 = arith.constant 3 : index
    %c0_16 = arith.constant 0 : index
    %c0_17 = arith.constant 0 : index
    %16 = vector.load %arg1[%c0_14, %c3_15, %c0_16, %c0_17] : memref<2x16x16x128xf32, #tpu.memory_space<vmem>>, vector<1x1x16x128xf32>
    %17 = vector.shape_cast %16 : vector<1x1x16x128xf32> to vector<16x128xf32>
    %c3_18 = arith.constant 3 : index
    %c0_19 = arith.constant 0 : index
    %c0_20 = arith.constant 0 : index
    %18 = vector.load %arg3[%c3_18, %c0_19, %c0_20] : memref<16x16x128xf32, #tpu.memory_space<vmem>>, vector<1x16x128xf32>
    %19 = vector.shape_cast %18 : vector<1x16x128xf32> to vector<16x128xf32>
    %20 = vector.shape_cast %17 : vector<16x128xf32> to vector<1x16x128xf32>
    tpu.vector_store %arg3[%c3_18, %c0_19, %c0_20], %20 {strides = array<i32>} : memref<16x16x128xf32, #tpu.memory_space<vmem>>, vector<1x16x128xf32>,
    %c0_21 = arith.constant 0 : index
    %c5_22 = arith.constant 5 : index
    %c0_23 = arith.constant 0 : index
    %c0_24 = arith.constant 0 : index
    %21 = vector.load %arg1[%c0_21, %c5_22, %c0_23, %c0_24] : memref<2x16x16x128xf32, #tpu.memory_space<vmem>>, vector<1x1x16x128xf32>
    %22 = vector.shape_cast %21 : vector<1x1x16x128xf32> to vector<16x128xf32>
    %c5_25 = arith.constant 5 : index
    %c0_26 = arith.constant 0 : index
    %c0_27 = arith.constant 0 : index
    %23 = vector.load %arg3[%c5_25, %c0_26, %c0_27] : memref<16x16x128xf32, #tpu.memory_space<vmem>>, vector<1x16x128xf32>
    %24 = vector.shape_cast %23 : vector<1x16x128xf32> to vector<16x128xf32>
    %25 = vector.shape_cast %22 : vector<16x128xf32> to vector<1x16x128xf32>
    tpu.vector_store %arg3[%c5_25, %c0_26, %c0_27], %25 {strides = array<i32>} : memref<16x16x128xf32, #tpu.memory_space<vmem>>, vector<1x16x128xf32>,
    %c0_28 = arith.constant 0 : index
    %c6 = arith.constant 6 : index
    %c0_29 = arith.constant 0 : index
    %c0_30 = arith.constant 0 : index
    %26 = vector.load %arg1[%c0_28, %c6, %c0_29, %c0_30] : memref<2x16x16x128xf32, #tpu.memory_space<vmem>>, vector<1x1x16x128xf32>
    %27 = vector.shape_cast %26 : vector<1x1x16x128xf32> to vector<16x128xf32>
    %c6_31 = arith.constant 6 : index
    %c0_32 = arith.constant 0 : index
    %c0_33 = arith.constant 0 : index
    %28 = vector.load %arg3[%c6_31, %c0_32, %c0_33] : memref<16x16x128xf32, #tpu.memory_space<vmem>>, vector<1x16x128xf32>
    %29 = vector.shape_cast %28 : vector<1x16x128xf32> to vector<16x128xf32>
    %30 = vector.shape_cast %27 : vector<16x128xf32> to vector<1x16x128xf32>
    tpu.vector_store %arg3[%c6_31, %c0_32, %c0_33], %30 {strides = array<i32>} : memref<16x16x128xf32, #tpu.memory_space<vmem>>, vector<1x16x128xf32>,
    %c0_34 = arith.constant 0 : index
    %c7 = arith.constant 7 : index
    %c0_35 = arith.constant 0 : index
    %c0_36 = arith.constant 0 : index
    %31 = vector.load %arg1[%c0_34, %c7, %c0_35, %c0_36] : memref<2x16x16x128xf32, #tpu.memory_space<vmem>>, vector<1x1x16x128xf32>
    %32 = vector.shape_cast %31 : vector<1x1x16x128xf32> to vector<16x128xf32>
    %c7_37 = arith.constant 7 : index
    %c0_38 = arith.constant 0 : index
    %c0_39 = arith.constant 0 : index
    %33 = vector.load %arg3[%c7_37, %c0_38, %c0_39] : memref<16x16x128xf32, #tpu.memory_space<vmem>>, vector<1x16x128xf32>
    %34 = vector.shape_cast %33 : vector<1x16x128xf32> to vector<16x128xf32>
    %35 = vector.shape_cast %32 : vector<16x128xf32> to vector<1x16x128xf32>
    tpu.vector_store %arg3[%c7_37, %c0_38, %c0_39], %35 {strides = array<i32>} : memref<16x16x128xf32, #tpu.memory_space<vmem>>, vector<1x16x128xf32>,
    %c0_40 = arith.constant 0 : index
    %c9 = arith.constant 9 : index
    %c0_41 = arith.constant 0 : index
    %c0_42 = arith.constant 0 : index
    %36 = vector.load %arg1[%c0_40, %c9, %c0_41, %c0_42] : memref<2x16x16x128xf32, #tpu.memory_space<vmem>>, vector<1x1x16x128xf32>
    %37 = vector.shape_cast %36 : vector<1x1x16x128xf32> to vector<16x128xf32>
    %c9_43 = arith.constant 9 : index
    %c0_44 = arith.constant 0 : index
    %c0_45 = arith.constant 0 : index
    %38 = vector.load %arg3[%c9_43, %c0_44, %c0_45] : memref<16x16x128xf32, #tpu.memory_space<vmem>>, vector<1x16x128xf32>
    %39 = vector.shape_cast %38 : vector<1x16x128xf32> to vector<16x128xf32>
    %40 = vector.shape_cast %37 : vector<16x128xf32> to vector<1x16x128xf32>
    tpu.vector_store %arg3[%c9_43, %c0_44, %c0_45], %40 {strides = array<i32>} : memref<16x16x128xf32, #tpu.memory_space<vmem>>, vector<1x16x128xf32>,
    %c0_46 = arith.constant 0 : index
    %c10 = arith.constant 10 : index
    %c0_47 = arith.constant 0 : index
    %c0_48 = arith.constant 0 : index
    %41 = vector.load %arg1[%c0_46, %c10, %c0_47, %c0_48] : memref<2x16x16x128xf32, #tpu.memory_space<vmem>>, vector<1x1x16x128xf32>
    %42 = vector.shape_cast %41 : vector<1x1x16x128xf32> to vector<16x128xf32>
    %c10_49 = arith.constant 10 : index
    %c0_50 = arith.constant 0 : index
    %c0_51 = arith.constant 0 : index
    %43 = vector.load %arg3[%c10_49, %c0_50, %c0_51] : memref<16x16x128xf32, #tpu.memory_space<vmem>>, vector<1x16x128xf32>
    %44 = vector.shape_cast %43 : vector<1x16x128xf32> to vector<16x128xf32>
    %45 = vector.shape_cast %42 : vector<16x128xf32> to vector<1x16x128xf32>
    tpu.vector_store %arg3[%c10_49, %c0_50, %c0_51], %45 {strides = array<i32>} : memref<16x16x128xf32, #tpu.memory_space<vmem>>, vector<1x16x128xf32>,
    %c0_52 = arith.constant 0 : index
    %c11 = arith.constant 11 : index
    %c0_53 = arith.constant 0 : index
    %c0_54 = arith.constant 0 : index
    %46 = vector.load %arg1[%c0_52, %c11, %c0_53, %c0_54] : memref<2x16x16x128xf32, #tpu.memory_space<vmem>>, vector<1x1x16x128xf32>
    %47 = vector.shape_cast %46 : vector<1x1x16x128xf32> to vector<16x128xf32>
    %c11_55 = arith.constant 11 : index
    %c0_56 = arith.constant 0 : index
    %c0_57 = arith.constant 0 : index
    %48 = vector.load %arg3[%c11_55, %c0_56, %c0_57] : memref<16x16x128xf32, #tpu.memory_space<vmem>>, vector<1x16x128xf32>
    %49 = vector.shape_cast %48 : vector<1x16x128xf32> to vector<16x128xf32>
    %50 = vector.shape_cast %47 : vector<16x128xf32> to vector<1x16x128xf32>
    tpu.vector_store %arg3[%c11_55, %c0_56, %c0_57], %50 {strides = array<i32>} : memref<16x16x128xf32, #tpu.memory_space<vmem>>, vector<1x16x128xf32>,
    %c0_58 = arith.constant 0 : index
    %c13 = arith.constant 13 : index
    %c0_59 = arith.constant 0 : index
    %c0_60 = arith.constant 0 : index
    %51 = vector.load %arg1[%c0_58, %c13, %c0_59, %c0_60] : memref<2x16x16x128xf32, #tpu.memory_space<vmem>>, vector<1x1x16x128xf32>
    %52 = vector.shape_cast %51 : vector<1x1x16x128xf32> to vector<16x128xf32>
    %c13_61 = arith.constant 13 : index
    %c0_62 = arith.constant 0 : index
    %c0_63 = arith.constant 0 : index
    %53 = vector.load %arg3[%c13_61, %c0_62, %c0_63] : memref<16x16x128xf32, #tpu.memory_space<vmem>>, vector<1x16x128xf32>
    %54 = vector.shape_cast %53 : vector<1x16x128xf32> to vector<16x128xf32>
    %55 = vector.shape_cast %52 : vector<16x128xf32> to vector<1x16x128xf32>
    tpu.vector_store %arg3[%c13_61, %c0_62, %c0_63], %55 {strides = array<i32>} : memref<16x16x128xf32, #tpu.memory_space<vmem>>, vector<1x16x128xf32>,
    %c0_64 = arith.constant 0 : index
    %c14 = arith.constant 14 : index
    %c0_65 = arith.constant 0 : index
    %c0_66 = arith.constant 0 : index
    %56 = vector.load %arg1[%c0_64, %c14, %c0_65, %c0_66] : memref<2x16x16x128xf32, #tpu.memory_space<vmem>>, vector<1x1x16x128xf32>
    %57 = vector.shape_cast %56 : vector<1x1x16x128xf32> to vector<16x128xf32>
    %c14_67 = arith.constant 14 : index
    %c0_68 = arith.constant 0 : index
    %c0_69 = arith.constant 0 : index
    %58 = vector.load %arg3[%c14_67, %c0_68, %c0_69] : memref<16x16x128xf32, #tpu.memory_space<vmem>>, vector<1x16x128xf32>
    %59 = vector.shape_cast %58 : vector<1x16x128xf32> to vector<16x128xf32>
    %60 = vector.shape_cast %57 : vector<16x128xf32> to vector<1x16x128xf32>
    tpu.vector_store %arg3[%c14_67, %c0_68, %c0_69], %60 {strides = array<i32>} : memref<16x16x128xf32, #tpu.memory_space<vmem>>, vector<1x16x128xf32>,
    %c0_70 = arith.constant 0 : index
    %c15 = arith.constant 15 : index
    %c0_71 = arith.constant 0 : index
    %c0_72 = arith.constant 0 : index
    %61 = vector.load %arg1[%c0_70, %c15, %c0_71, %c0_72] : memref<2x16x16x128xf32, #tpu.memory_space<vmem>>, vector<1x1x16x128xf32>
    %62 = vector.shape_cast %61 : vector<1x1x16x128xf32> to vector<16x128xf32>
    %c15_73 = arith.constant 15 : index
    %c0_74 = arith.constant 0 : index
    %c0_75 = arith.constant 0 : index
    %63 = vector.load %arg3[%c15_73, %c0_74, %c0_75] : memref<16x16x128xf32, #tpu.memory_space<vmem>>, vector<1x16x128xf32>
    %64 = vector.shape_cast %63 : vector<1x16x128xf32> to vector<16x128xf32>
    %65 = vector.shape_cast %62 : vector<16x128xf32> to vector<1x16x128xf32>
    tpu.vector_store %arg3[%c15_73, %c0_74, %c0_75], %65 {strides = array<i32>} : memref<16x16x128xf32, #tpu.memory_space<vmem>>, vector<1x16x128xf32>,
    %cst = arith.constant 0.000000e+00 : f32
    %66 = vector.broadcast %cst : f32 to vector<1x128xf32>
    %c0_76 = arith.constant 0 : index
    %c0_77 = arith.constant 0 : index
    %c0_78 = arith.constant 0 : index
    %c0_79 = arith.constant 0 : index
    %67 = vector.load %arg1[%c0_76, %c0_77, %c0_78, %c0_79] : memref<2x16x16x128xf32, #tpu.memory_space<vmem>>, vector<1x1x16x128xf32>
    %68 = vector.shape_cast %67 : vector<1x1x16x128xf32> to vector<16x128xf32>
    %c1_80 = arith.constant 1 : index
    %c0_81 = arith.constant 0 : index
    %c0_82 = arith.constant 0 : index
    %c0_83 = arith.constant 0 : index
    %69 = vector.load %arg1[%c1_80, %c0_81, %c0_82, %c0_83] : memref<2x16x16x128xf32, #tpu.memory_space<vmem>>, vector<1x1x16x128xf32>
    %70 = vector.shape_cast %69 : vector<1x1x16x128xf32> to vector<16x128xf32>
    %71 = vector.extract_strided_slice %70 {offsets = [1, 0], sizes = [15, 128], strides = [1, 1]} : vector<16x128xf32> to vector<15x128xf32>
    %72 = vector.extract_strided_slice %70 {offsets = [0, 0], sizes = [1, 128], strides = [1, 1]} : vector<16x128xf32> to vector<1x128xf32>
    %73 = tpu.concatenate %71, %72 in 0 : vector<15x128xf32>, vector<1x128xf32> -> vector<16x128xf32>
    %74 = arith.addf %68, %73 : vector<16x128xf32>
    %c0_84 = arith.constant 0 : index
    %c1_85 = arith.constant 1 : index
    %c0_86 = arith.constant 0 : index
    %c0_87 = arith.constant 0 : index
    %75 = vector.load %arg1[%c0_84, %c1_85, %c0_86, %c0_87] : memref<2x16x16x128xf32, #tpu.memory_space<vmem>>, vector<1x1x16x128xf32>
    %76 = vector.shape_cast %75 : vector<1x1x16x128xf32> to vector<16x128xf32>
    %77 = arith.subf %74, %76 : vector<16x128xf32>
    %c1_88 = arith.constant 1 : index
    %c0_89 = arith.constant 0 : index
    %c0_90 = arith.constant 0 : index
    %c0_91 = arith.constant 0 : index
    %78 = vector.load %arg1[%c1_88, %c0_89, %c0_90, %c0_91] : memref<2x16x16x128xf32, #tpu.memory_space<vmem>>, vector<1x1x16x128xf32>
    %79 = vector.shape_cast %78 : vector<1x1x16x128xf32> to vector<16x128xf32>
    %80 = arith.subf %77, %79 : vector<16x128xf32>
    %c0_92 = arith.constant 0 : index
    %c1_93 = arith.constant 1 : index
    %c0_94 = arith.constant 0 : index
    %c0_95 = arith.constant 0 : index
    %81 = vector.load %arg1[%c0_92, %c1_93, %c0_94, %c0_95] : memref<2x16x16x128xf32, #tpu.memory_space<vmem>>, vector<1x1x16x128xf32>
    %82 = vector.shape_cast %81 : vector<1x1x16x128xf32> to vector<16x128xf32>
    %c1_96 = arith.constant 1 : index
    %c1_97 = arith.constant 1 : index
    %c0_98 = arith.constant 0 : index
    %c0_99 = arith.constant 0 : index
    %83 = vector.load %arg1[%c1_96, %c1_97, %c0_98, %c0_99] : memref<2x16x16x128xf32, #tpu.memory_space<vmem>>, vector<1x1x16x128xf32>
    %84 = vector.shape_cast %83 : vector<1x1x16x128xf32> to vector<16x128xf32>
    %85 = vector.extract_strided_slice %84 {offsets = [1, 0], sizes = [15, 128], strides = [1, 1]} : vector<16x128xf32> to vector<15x128xf32>
    %86 = vector.extract_strided_slice %84 {offsets = [0, 0], sizes = [1, 128], strides = [1, 1]} : vector<16x128xf32> to vector<1x128xf32>
    %87 = tpu.concatenate %85, %86 in 0 : vector<15x128xf32>, vector<1x128xf32> -> vector<16x128xf32>
    %88 = arith.addf %82, %87 : vector<16x128xf32>
    %c0_100 = arith.constant 0 : index
    %c2_101 = arith.constant 2 : index
    %c0_102 = arith.constant 0 : index
    %c0_103 = arith.constant 0 : index
    %89 = vector.load %arg1[%c0_100, %c2_101, %c0_102, %c0_103] : memref<2x16x16x128xf32, #tpu.memory_space<vmem>>, vector<1x1x16x128xf32>
    %90 = vector.shape_cast %89 : vector<1x1x16x128xf32> to vector<16x128xf32>
    %91 = arith.subf %88, %90 : vector<16x128xf32>
    %c1_104 = arith.constant 1 : index
    %c1_105 = arith.constant 1 : index
    %c0_106 = arith.constant 0 : index
    %c0_107 = arith.constant 0 : index
    %92 = vector.load %arg1[%c1_104, %c1_105, %c0_106, %c0_107] : memref<2x16x16x128xf32, #tpu.memory_space<vmem>>, vector<1x1x16x128xf32>
    %93 = vector.shape_cast %92 : vector<1x1x16x128xf32> to vector<16x128xf32>
    %94 = arith.subf %91, %93 : vector<16x128xf32>
    %c0_108 = arith.constant 0 : index
    %c2_109 = arith.constant 2 : index
    %c0_110 = arith.constant 0 : index
    %c0_111 = arith.constant 0 : index
    %95 = vector.load %arg1[%c0_108, %c2_109, %c0_110, %c0_111] : memref<2x16x16x128xf32, #tpu.memory_space<vmem>>, vector<1x1x16x128xf32>
    %96 = vector.shape_cast %95 : vector<1x1x16x128xf32> to vector<16x128xf32>
    %c1_112 = arith.constant 1 : index
    %c2_113 = arith.constant 2 : index
    %c0_114 = arith.constant 0 : index
    %c0_115 = arith.constant 0 : index
    %97 = vector.load %arg1[%c1_112, %c2_113, %c0_114, %c0_115] : memref<2x16x16x128xf32, #tpu.memory_space<vmem>>, vector<1x1x16x128xf32>
    %98 = vector.shape_cast %97 : vector<1x1x16x128xf32> to vector<16x128xf32>
    %99 = vector.extract_strided_slice %98 {offsets = [1, 0], sizes = [15, 128], strides = [1, 1]} : vector<16x128xf32> to vector<15x128xf32>
    %100 = vector.extract_strided_slice %98 {offsets = [0, 0], sizes = [1, 128], strides = [1, 1]} : vector<16x128xf32> to vector<1x128xf32>
    %101 = tpu.concatenate %99, %100 in 0 : vector<15x128xf32>, vector<1x128xf32> -> vector<16x128xf32>
    %102 = arith.addf %96, %101 : vector<16x128xf32>
    %c0_116 = arith.constant 0 : index
    %c3_117 = arith.constant 3 : index
    %c0_118 = arith.constant 0 : index
    %c0_119 = arith.constant 0 : index
    %103 = vector.load %arg1[%c0_116, %c3_117, %c0_118, %c0_119] : memref<2x16x16x128xf32, #tpu.memory_space<vmem>>, vector<1x1x16x128xf32>
    %104 = vector.shape_cast %103 : vector<1x1x16x128xf32> to vector<16x128xf32>
    %105 = arith.subf %102, %104 : vector<16x128xf32>
    %c1_120 = arith.constant 1 : index
    %c2_121 = arith.constant 2 : index
    %c0_122 = arith.constant 0 : index
    %c0_123 = arith.constant 0 : index
    %106 = vector.load %arg1[%c1_120, %c2_121, %c0_122, %c0_123] : memref<2x16x16x128xf32, #tpu.memory_space<vmem>>, vector<1x1x16x128xf32>
    %107 = vector.shape_cast %106 : vector<1x1x16x128xf32> to vector<16x128xf32>
    %108 = arith.subf %105, %107 : vector<16x128xf32>
    %109 = math.cos %94 : vector<16x128xf32>
    %110 = math.cos %108 : vector<16x128xf32>
    %111 = arith.addf %109, %110 : vector<16x128xf32>
    %cst_124 = arith.constant 5.000000e-01 : f32
    %112 = vector.broadcast %cst_124 : f32 to vector<16x128xf32>
    %113 = arith.mulf %112, %111 : vector<16x128xf32>
    %114 = math.sin %94 : vector<16x128xf32>
    %115 = math.sin %108 : vector<16x128xf32>
    %116 = arith.addf %114, %115 : vector<16x128xf32>
    %cst_125 = arith.constant 5.000000e-01 : f32
    %117 = vector.broadcast %cst_125 : f32 to vector<16x128xf32>
    %118 = arith.mulf %117, %116 : vector<16x128xf32>
    %119 = vector.broadcast %0 : f32 to vector<16x128xf32>
    %120 = arith.mulf %119, %113 : vector<16x128xf32>
    %121 = vector.broadcast %1 : f32 to vector<16x128xf32>
    %122 = arith.mulf %121, %118 : vector<16x128xf32>
    %123 = arith.addf %120, %122 : vector<16x128xf32>
    %124 = vector.broadcast %4 : f32 to vector<16x128xf32>
    %125 = arith.addf %123, %124 : vector<16x128xf32>
    %126 = vector.broadcast %2 : f32 to vector<16x128xf32>
    %127 = arith.mulf %126, %113 : vector<16x128xf32>
    %128 = vector.broadcast %3 : f32 to vector<16x128xf32>
    %129 = arith.mulf %128, %118 : vector<16x128xf32>
    %130 = arith.addf %127, %129 : vector<16x128xf32>
    %131 = vector.broadcast %5 : f32 to vector<16x128xf32>
    %132 = arith.addf %130, %131 : vector<16x128xf32>
    %133 = math.exp %125 : vector<16x128xf32>
    %134 = arith.mulf %133, %80 : vector<16x128xf32>
    %135 = arith.addf %134, %132 : vector<16x128xf32>
    %136 = arith.subf %135, %80 : vector<16x128xf32>
    %cst_126 = arith.constant 1.000000e+00 : f32
    %137 = vector.broadcast %cst_126 : f32 to vector<16x128xf32>
    %138 = arith.mulf %137, %136 : vector<16x128xf32>
    %c0_127 = arith.constant 0 : index
    %c0_128 = arith.constant 0 : index
    %c0_129 = arith.constant 0 : index
    %c0_130 = arith.constant 0 : index
    %139 = vector.load %arg1[%c0_127, %c0_128, %c0_129, %c0_130] : memref<2x16x16x128xf32, #tpu.memory_space<vmem>>, vector<1x1x16x128xf32>
    %140 = vector.shape_cast %139 : vector<1x1x16x128xf32> to vector<16x128xf32>
    %141 = arith.addf %138, %140 : vector<16x128xf32>
    %cst_131 = arith.constant 3.14159274 : f32
    %142 = vector.broadcast %cst_131 : f32 to vector<16x128xf32>
    %143 = arith.addf %141, %142 : vector<16x128xf32>
    %cst_132 = arith.constant 0.159154937 : f32
    %144 = vector.broadcast %cst_132 : f32 to vector<16x128xf32>
    %145 = arith.mulf %143, %144 : vector<16x128xf32>
    %146 = math.floor %145 : vector<16x128xf32>
    %cst_133 = arith.constant 6.28318548 : f32
    %147 = vector.broadcast %cst_133 : f32 to vector<16x128xf32>
    %148 = arith.mulf %147, %146 : vector<16x128xf32>
    %149 = arith.subf %143, %148 : vector<16x128xf32>
    %cst_134 = arith.constant 3.14159274 : f32
    %150 = vector.broadcast %cst_134 : f32 to vector<16x128xf32>
    %151 = arith.subf %149, %150 : vector<16x128xf32>
    %c0_135 = arith.constant 0 : index
    %c0_136 = arith.constant 0 : index
    %c0_137 = arith.constant 0 : index
    %152 = vector.load %arg3[%c0_135, %c0_136, %c0_137] : memref<16x16x128xf32, #tpu.memory_space<vmem>>, vector<1x16x128xf32>
    %153 = vector.shape_cast %152 : vector<1x16x128xf32> to vector<16x128xf32>
    %154 = vector.shape_cast %151 : vector<16x128xf32> to vector<1x16x128xf32>
    tpu.vector_store %arg3[%c0_135, %c0_136, %c0_137], %154 {strides = array<i32>} : memref<16x16x128xf32, #tpu.memory_space<vmem>>, vector<1x16x128xf32>,
    %cst_138 = arith.constant dense<0.000000e+00> : vector<128xf32>
    %155 = vector.multi_reduction <add>, %125, %cst_138 [0] : vector<16x128xf32> to vector<128xf32>
    %156 = vector.shape_cast %155 : vector<128xf32> to vector<1x128xf32>
    %157 = arith.addf %66, %156 : vector<1x128xf32>
    %c0_139 = arith.constant 0 : index
    %c4_140 = arith.constant 4 : index
    %c0_141 = arith.constant 0 : index
    %c0_142 = arith.constant 0 : index
    %158 = vector.load %arg1[%c0_139, %c4_140, %c0_141, %c0_142] : memref<2x16x16x128xf32, #tpu.memory_space<vmem>>, vector<1x1x16x128xf32>
    %159 = vector.shape_cast %158 : vector<1x1x16x128xf32> to vector<16x128xf32>
    %c1_143 = arith.constant 1 : index
    %c4_144 = arith.constant 4 : index
    %c0_145 = arith.constant 0 : index
    %c0_146 = arith.constant 0 : index
    %160 = vector.load %arg1[%c1_143, %c4_144, %c0_145, %c0_146] : memref<2x16x16x128xf32, #tpu.memory_space<vmem>>, vector<1x1x16x128xf32>
    %161 = vector.shape_cast %160 : vector<1x1x16x128xf32> to vector<16x128xf32>
    %162 = vector.extract_strided_slice %161 {offsets = [1, 0], sizes = [15, 128], strides = [1, 1]} : vector<16x128xf32> to vector<15x128xf32>
    %163 = vector.extract_strided_slice %161 {offsets = [0, 0], sizes = [1, 128], strides = [1, 1]} : vector<16x128xf32> to vector<1x128xf32>
    %164 = tpu.concatenate %162, %163 in 0 : vector<15x128xf32>, vector<1x128xf32> -> vector<16x128xf32>
    %165 = arith.addf %159, %164 : vector<16x128xf32>
    %c0_147 = arith.constant 0 : index
    %c5_148 = arith.constant 5 : index
    %c0_149 = arith.constant 0 : index
    %c0_150 = arith.constant 0 : index
    %166 = vector.load %arg1[%c0_147, %c5_148, %c0_149, %c0_150] : memref<2x16x16x128xf32, #tpu.memory_space<vmem>>, vector<1x1x16x128xf32>
    %167 = vector.shape_cast %166 : vector<1x1x16x128xf32> to vector<16x128xf32>
    %168 = arith.subf %165, %167 : vector<16x128xf32>
    %c1_151 = arith.constant 1 : index
    %c4_152 = arith.constant 4 : index
    %c0_153 = arith.constant 0 : index
    %c0_154 = arith.constant 0 : index
    %169 = vector.load %arg1[%c1_151, %c4_152, %c0_153, %c0_154] : memref<2x16x16x128xf32, #tpu.memory_space<vmem>>, vector<1x1x16x128xf32>
    %170 = vector.shape_cast %169 : vector<1x1x16x128xf32> to vector<16x128xf32>
    %171 = arith.subf %168, %170 : vector<16x128xf32>
    %c0_155 = arith.constant 0 : index
    %c5_156 = arith.constant 5 : index
    %c0_157 = arith.constant 0 : index
    %c0_158 = arith.constant 0 : index
    %172 = vector.load %arg1[%c0_155, %c5_156, %c0_157, %c0_158] : memref<2x16x16x128xf32, #tpu.memory_space<vmem>>, vector<1x1x16x128xf32>
    %173 = vector.shape_cast %172 : vector<1x1x16x128xf32> to vector<16x128xf32>
    %c1_159 = arith.constant 1 : index
    %c5_160 = arith.constant 5 : index
    %c0_161 = arith.constant 0 : index
    %c0_162 = arith.constant 0 : index
    %174 = vector.load %arg1[%c1_159, %c5_160, %c0_161, %c0_162] : memref<2x16x16x128xf32, #tpu.memory_space<vmem>>, vector<1x1x16x128xf32>
    %175 = vector.shape_cast %174 : vector<1x1x16x128xf32> to vector<16x128xf32>
    %176 = vector.extract_strided_slice %175 {offsets = [1, 0], sizes = [15, 128], strides = [1, 1]} : vector<16x128xf32> to vector<15x128xf32>
    %177 = vector.extract_strided_slice %175 {offsets = [0, 0], sizes = [1, 128], strides = [1, 1]} : vector<16x128xf32> to vector<1x128xf32>
    %178 = tpu.concatenate %176, %177 in 0 : vector<15x128xf32>, vector<1x128xf32> -> vector<16x128xf32>
    %179 = arith.addf %173, %178 : vector<16x128xf32>
    %c0_163 = arith.constant 0 : index
    %c6_164 = arith.constant 6 : index
    %c0_165 = arith.constant 0 : index
    %c0_166 = arith.constant 0 : index
    %180 = vector.load %arg1[%c0_163, %c6_164, %c0_165, %c0_166] : memref<2x16x16x128xf32, #tpu.memory_space<vmem>>, vector<1x1x16x128xf32>
    %181 = vector.shape_cast %180 : vector<1x1x16x128xf32> to vector<16x128xf32>
    %182 = arith.subf %179, %181 : vector<16x128xf32>
    %c1_167 = arith.constant 1 : index
    %c5_168 = arith.constant 5 : index
    %c0_169 = arith.constant 0 : index
    %c0_170 = arith.constant 0 : index
    %183 = vector.load %arg1[%c1_167, %c5_168, %c0_169, %c0_170] : memref<2x16x16x128xf32, #tpu.memory_space<vmem>>, vector<1x1x16x128xf32>
    %184 = vector.shape_cast %183 : vector<1x1x16x128xf32> to vector<16x128xf32>
    %185 = arith.subf %182, %184 : vector<16x128xf32>
    %c0_171 = arith.constant 0 : index
    %c6_172 = arith.constant 6 : index
    %c0_173 = arith.constant 0 : index
    %c0_174 = arith.constant 0 : index
    %186 = vector.load %arg1[%c0_171, %c6_172, %c0_173, %c0_174] : memref<2x16x16x128xf32, #tpu.memory_space<vmem>>, vector<1x1x16x128xf32>
    %187 = vector.shape_cast %186 : vector<1x1x16x128xf32> to vector<16x128xf32>
    %c1_175 = arith.constant 1 : index
    %c6_176 = arith.constant 6 : index
    %c0_177 = arith.constant 0 : index
    %c0_178 = arith.constant 0 : index
    %188 = vector.load %arg1[%c1_175, %c6_176, %c0_177, %c0_178] : memref<2x16x16x128xf32, #tpu.memory_space<vmem>>, vector<1x1x16x128xf32>
    %189 = vector.shape_cast %188 : vector<1x1x16x128xf32> to vector<16x128xf32>
    %190 = vector.extract_strided_slice %189 {offsets = [1, 0], sizes = [15, 128], strides = [1, 1]} : vector<16x128xf32> to vector<15x128xf32>
    %191 = vector.extract_strided_slice %189 {offsets = [0, 0], sizes = [1, 128], strides = [1, 1]} : vector<16x128xf32> to vector<1x128xf32>
    %192 = tpu.concatenate %190, %191 in 0 : vector<15x128xf32>, vector<1x128xf32> -> vector<16x128xf32>
    %193 = arith.addf %187, %192 : vector<16x128xf32>
    %c0_179 = arith.constant 0 : index
    %c7_180 = arith.constant 7 : index
    %c0_181 = arith.constant 0 : index
    %c0_182 = arith.constant 0 : index
    %194 = vector.load %arg1[%c0_179, %c7_180, %c0_181, %c0_182] : memref<2x16x16x128xf32, #tpu.memory_space<vmem>>, vector<1x1x16x128xf32>
    %195 = vector.shape_cast %194 : vector<1x1x16x128xf32> to vector<16x128xf32>
    %196 = arith.subf %193, %195 : vector<16x128xf32>
    %c1_183 = arith.constant 1 : index
    %c6_184 = arith.constant 6 : index
    %c0_185 = arith.constant 0 : index
    %c0_186 = arith.constant 0 : index
    %197 = vector.load %arg1[%c1_183, %c6_184, %c0_185, %c0_186] : memref<2x16x16x128xf32, #tpu.memory_space<vmem>>, vector<1x1x16x128xf32>
    %198 = vector.shape_cast %197 : vector<1x1x16x128xf32> to vector<16x128xf32>
    %199 = arith.subf %196, %198 : vector<16x128xf32>
    %200 = math.cos %185 : vector<16x128xf32>
    %201 = math.cos %199 : vector<16x128xf32>
    %202 = arith.addf %200, %201 : vector<16x128xf32>
    %cst_187 = arith.constant 5.000000e-01 : f32
    %203 = vector.broadcast %cst_187 : f32 to vector<16x128xf32>
    %204 = arith.mulf %203, %202 : vector<16x128xf32>
    %205 = math.sin %185 : vector<16x128xf32>
    %206 = math.sin %199 : vector<16x128xf32>
    %207 = arith.addf %205, %206 : vector<16x128xf32>
    %cst_188 = arith.constant 5.000000e-01 : f32
    %208 = vector.broadcast %cst_188 : f32 to vector<16x128xf32>
    %209 = arith.mulf %208, %207 : vector<16x128xf32>
    %210 = vector.broadcast %0 : f32 to vector<16x128xf32>
    %211 = arith.mulf %210, %204 : vector<16x128xf32>
    %212 = vector.broadcast %1 : f32 to vector<16x128xf32>
    %213 = arith.mulf %212, %209 : vector<16x128xf32>
    %214 = arith.addf %211, %213 : vector<16x128xf32>
    %215 = vector.broadcast %4 : f32 to vector<16x128xf32>
    %216 = arith.addf %214, %215 : vector<16x128xf32>
    %217 = vector.broadcast %2 : f32 to vector<16x128xf32>
    %218 = arith.mulf %217, %204 : vector<16x128xf32>
    %219 = vector.broadcast %3 : f32 to vector<16x128xf32>
    %220 = arith.mulf %219, %209 : vector<16x128xf32>
    %221 = arith.addf %218, %220 : vector<16x128xf32>
    %222 = vector.broadcast %5 : f32 to vector<16x128xf32>
    %223 = arith.addf %221, %222 : vector<16x128xf32>
    %224 = math.exp %216 : vector<16x128xf32>
    %225 = arith.mulf %224, %171 : vector<16x128xf32>
    %226 = arith.addf %225, %223 : vector<16x128xf32>
    %227 = arith.subf %226, %171 : vector<16x128xf32>
    %cst_189 = arith.constant 1.000000e+00 : f32
    %228 = vector.broadcast %cst_189 : f32 to vector<16x128xf32>
    %229 = arith.mulf %228, %227 : vector<16x128xf32>
    %c0_190 = arith.constant 0 : index
    %c4_191 = arith.constant 4 : index
    %c0_192 = arith.constant 0 : index
    %c0_193 = arith.constant 0 : index
    %230 = vector.load %arg1[%c0_190, %c4_191, %c0_192, %c0_193] : memref<2x16x16x128xf32, #tpu.memory_space<vmem>>, vector<1x1x16x128xf32>
    %231 = vector.shape_cast %230 : vector<1x1x16x128xf32> to vector<16x128xf32>
    %232 = arith.addf %229, %231 : vector<16x128xf32>
    %cst_194 = arith.constant 3.14159274 : f32
    %233 = vector.broadcast %cst_194 : f32 to vector<16x128xf32>
    %234 = arith.addf %232, %233 : vector<16x128xf32>
    %cst_195 = arith.constant 0.159154937 : f32
    %235 = vector.broadcast %cst_195 : f32 to vector<16x128xf32>
    %236 = arith.mulf %234, %235 : vector<16x128xf32>
    %237 = math.floor %236 : vector<16x128xf32>
    %cst_196 = arith.constant 6.28318548 : f32
    %238 = vector.broadcast %cst_196 : f32 to vector<16x128xf32>
    %239 = arith.mulf %238, %237 : vector<16x128xf32>
    %240 = arith.subf %234, %239 : vector<16x128xf32>
    %cst_197 = arith.constant 3.14159274 : f32
    %241 = vector.broadcast %cst_197 : f32 to vector<16x128xf32>
    %242 = arith.subf %240, %241 : vector<16x128xf32>
    %c4_198 = arith.constant 4 : index
    %c0_199 = arith.constant 0 : index
    %c0_200 = arith.constant 0 : index
    %243 = vector.load %arg3[%c4_198, %c0_199, %c0_200] : memref<16x16x128xf32, #tpu.memory_space<vmem>>, vector<1x16x128xf32>
    %244 = vector.shape_cast %243 : vector<1x16x128xf32> to vector<16x128xf32>
    %245 = vector.shape_cast %242 : vector<16x128xf32> to vector<1x16x128xf32>
    tpu.vector_store %arg3[%c4_198, %c0_199, %c0_200], %245 {strides = array<i32>} : memref<16x16x128xf32, #tpu.memory_space<vmem>>, vector<1x16x128xf32>,
    %cst_201 = arith.constant dense<0.000000e+00> : vector<128xf32>
    %246 = vector.multi_reduction <add>, %216, %cst_201 [0] : vector<16x128xf32> to vector<128xf32>
    %247 = vector.shape_cast %246 : vector<128xf32> to vector<1x128xf32>
    %248 = arith.addf %157, %247 : vector<1x128xf32>
    %c0_202 = arith.constant 0 : index
    %c8 = arith.constant 8 : index
    %c0_203 = arith.constant 0 : index
    %c0_204 = arith.constant 0 : index
    %249 = vector.load %arg1[%c0_202, %c8, %c0_203, %c0_204] : memref<2x16x16x128xf32, #tpu.memory_space<vmem>>, vector<1x1x16x128xf32>
    %250 = vector.shape_cast %249 : vector<1x1x16x128xf32> to vector<16x128xf32>
    %c1_205 = arith.constant 1 : index
    %c8_206 = arith.constant 8 : index
    %c0_207 = arith.constant 0 : index
    %c0_208 = arith.constant 0 : index
    %251 = vector.load %arg1[%c1_205, %c8_206, %c0_207, %c0_208] : memref<2x16x16x128xf32, #tpu.memory_space<vmem>>, vector<1x1x16x128xf32>
    %252 = vector.shape_cast %251 : vector<1x1x16x128xf32> to vector<16x128xf32>
    %253 = vector.extract_strided_slice %252 {offsets = [1, 0], sizes = [15, 128], strides = [1, 1]} : vector<16x128xf32> to vector<15x128xf32>
    %254 = vector.extract_strided_slice %252 {offsets = [0, 0], sizes = [1, 128], strides = [1, 1]} : vector<16x128xf32> to vector<1x128xf32>
    %255 = tpu.concatenate %253, %254 in 0 : vector<15x128xf32>, vector<1x128xf32> -> vector<16x128xf32>
    %256 = arith.addf %250, %255 : vector<16x128xf32>
    %c0_209 = arith.constant 0 : index
    %c9_210 = arith.constant 9 : index
    %c0_211 = arith.constant 0 : index
    %c0_212 = arith.constant 0 : index
    %257 = vector.load %arg1[%c0_209, %c9_210, %c0_211, %c0_212] : memref<2x16x16x128xf32, #tpu.memory_space<vmem>>, vector<1x1x16x128xf32>
    %258 = vector.shape_cast %257 : vector<1x1x16x128xf32> to vector<16x128xf32>
    %259 = arith.subf %256, %258 : vector<16x128xf32>
    %c1_213 = arith.constant 1 : index
    %c8_214 = arith.constant 8 : index
    %c0_215 = arith.constant 0 : index
    %c0_216 = arith.constant 0 : index
    %260 = vector.load %arg1[%c1_213, %c8_214, %c0_215, %c0_216] : memref<2x16x16x128xf32, #tpu.memory_space<vmem>>, vector<1x1x16x128xf32>
    %261 = vector.shape_cast %260 : vector<1x1x16x128xf32> to vector<16x128xf32>
    %262 = arith.subf %259, %261 : vector<16x128xf32>
    %c0_217 = arith.constant 0 : index
    %c9_218 = arith.constant 9 : index
    %c0_219 = arith.constant 0 : index
    %c0_220 = arith.constant 0 : index
    %263 = vector.load %arg1[%c0_217, %c9_218, %c0_219, %c0_220] : memref<2x16x16x128xf32, #tpu.memory_space<vmem>>, vector<1x1x16x128xf32>
    %264 = vector.shape_cast %263 : vector<1x1x16x128xf32> to vector<16x128xf32>
    %c1_221 = arith.constant 1 : index
    %c9_222 = arith.constant 9 : index
    %c0_223 = arith.constant 0 : index
    %c0_224 = arith.constant 0 : index
    %265 = vector.load %arg1[%c1_221, %c9_222, %c0_223, %c0_224] : memref<2x16x16x128xf32, #tpu.memory_space<vmem>>, vector<1x1x16x128xf32>
    %266 = vector.shape_cast %265 : vector<1x1x16x128xf32> to vector<16x128xf32>
    %267 = vector.extract_strided_slice %266 {offsets = [1, 0], sizes = [15, 128], strides = [1, 1]} : vector<16x128xf32> to vector<15x128xf32>
    %268 = vector.extract_strided_slice %266 {offsets = [0, 0], sizes = [1, 128], strides = [1, 1]} : vector<16x128xf32> to vector<1x128xf32>
    %269 = tpu.concatenate %267, %268 in 0 : vector<15x128xf32>, vector<1x128xf32> -> vector<16x128xf32>
    %270 = arith.addf %264, %269 : vector<16x128xf32>
    %c0_225 = arith.constant 0 : index
    %c10_226 = arith.constant 10 : index
    %c0_227 = arith.constant 0 : index
    %c0_228 = arith.constant 0 : index
    %271 = vector.load %arg1[%c0_225, %c10_226, %c0_227, %c0_228] : memref<2x16x16x128xf32, #tpu.memory_space<vmem>>, vector<1x1x16x128xf32>
    %272 = vector.shape_cast %271 : vector<1x1x16x128xf32> to vector<16x128xf32>
    %273 = arith.subf %270, %272 : vector<16x128xf32>
    %c1_229 = arith.constant 1 : index
    %c9_230 = arith.constant 9 : index
    %c0_231 = arith.constant 0 : index
    %c0_232 = arith.constant 0 : index
    %274 = vector.load %arg1[%c1_229, %c9_230, %c0_231, %c0_232] : memref<2x16x16x128xf32, #tpu.memory_space<vmem>>, vector<1x1x16x128xf32>
    %275 = vector.shape_cast %274 : vector<1x1x16x128xf32> to vector<16x128xf32>
    %276 = arith.subf %273, %275 : vector<16x128xf32>
    %c0_233 = arith.constant 0 : index
    %c10_234 = arith.constant 10 : index
    %c0_235 = arith.constant 0 : index
    %c0_236 = arith.constant 0 : index
    %277 = vector.load %arg1[%c0_233, %c10_234, %c0_235, %c0_236] : memref<2x16x16x128xf32, #tpu.memory_space<vmem>>, vector<1x1x16x128xf32>
    %278 = vector.shape_cast %277 : vector<1x1x16x128xf32> to vector<16x128xf32>
    %c1_237 = arith.constant 1 : index
    %c10_238 = arith.constant 10 : index
    %c0_239 = arith.constant 0 : index
    %c0_240 = arith.constant 0 : index
    %279 = vector.load %arg1[%c1_237, %c10_238, %c0_239, %c0_240] : memref<2x16x16x128xf32, #tpu.memory_space<vmem>>, vector<1x1x16x128xf32>
    %280 = vector.shape_cast %279 : vector<1x1x16x128xf32> to vector<16x128xf32>
    %281 = vector.extract_strided_slice %280 {offsets = [1, 0], sizes = [15, 128], strides = [1, 1]} : vector<16x128xf32> to vector<15x128xf32>
    %282 = vector.extract_strided_slice %280 {offsets = [0, 0], sizes = [1, 128], strides = [1, 1]} : vector<16x128xf32> to vector<1x128xf32>
    %283 = tpu.concatenate %281, %282 in 0 : vector<15x128xf32>, vector<1x128xf32> -> vector<16x128xf32>
    %284 = arith.addf %278, %283 : vector<16x128xf32>
    %c0_241 = arith.constant 0 : index
    %c11_242 = arith.constant 11 : index
    %c0_243 = arith.constant 0 : index
    %c0_244 = arith.constant 0 : index
    %285 = vector.load %arg1[%c0_241, %c11_242, %c0_243, %c0_244] : memref<2x16x16x128xf32, #tpu.memory_space<vmem>>, vector<1x1x16x128xf32>
    %286 = vector.shape_cast %285 : vector<1x1x16x128xf32> to vector<16x128xf32>
    %287 = arith.subf %284, %286 : vector<16x128xf32>
    %c1_245 = arith.constant 1 : index
    %c10_246 = arith.constant 10 : index
    %c0_247 = arith.constant 0 : index
    %c0_248 = arith.constant 0 : index
    %288 = vector.load %arg1[%c1_245, %c10_246, %c0_247, %c0_248] : memref<2x16x16x128xf32, #tpu.memory_space<vmem>>, vector<1x1x16x128xf32>
    %289 = vector.shape_cast %288 : vector<1x1x16x128xf32> to vector<16x128xf32>
    %290 = arith.subf %287, %289 : vector<16x128xf32>
    %291 = math.cos %276 : vector<16x128xf32>
    %292 = math.cos %290 : vector<16x128xf32>
    %293 = arith.addf %291, %292 : vector<16x128xf32>
    %cst_249 = arith.constant 5.000000e-01 : f32
    %294 = vector.broadcast %cst_249 : f32 to vector<16x128xf32>
    %295 = arith.mulf %294, %293 : vector<16x128xf32>
    %296 = math.sin %276 : vector<16x128xf32>
    %297 = math.sin %290 : vector<16x128xf32>
    %298 = arith.addf %296, %297 : vector<16x128xf32>
    %cst_250 = arith.constant 5.000000e-01 : f32
    %299 = vector.broadcast %cst_250 : f32 to vector<16x128xf32>
    %300 = arith.mulf %299, %298 : vector<16x128xf32>
    %301 = vector.broadcast %0 : f32 to vector<16x128xf32>
    %302 = arith.mulf %301, %295 : vector<16x128xf32>
    %303 = vector.broadcast %1 : f32 to vector<16x128xf32>
    %304 = arith.mulf %303, %300 : vector<16x128xf32>
    %305 = arith.addf %302, %304 : vector<16x128xf32>
    %306 = vector.broadcast %4 : f32 to vector<16x128xf32>
    %307 = arith.addf %305, %306 : vector<16x128xf32>
    %308 = vector.broadcast %2 : f32 to vector<16x128xf32>
    %309 = arith.mulf %308, %295 : vector<16x128xf32>
    %310 = vector.broadcast %3 : f32 to vector<16x128xf32>
    %311 = arith.mulf %310, %300 : vector<16x128xf32>
    %312 = arith.addf %309, %311 : vector<16x128xf32>
    %313 = vector.broadcast %5 : f32 to vector<16x128xf32>
    %314 = arith.addf %312, %313 : vector<16x128xf32>
    %315 = math.exp %307 : vector<16x128xf32>
    %316 = arith.mulf %315, %262 : vector<16x128xf32>
    %317 = arith.addf %316, %314 : vector<16x128xf32>
    %318 = arith.subf %317, %262 : vector<16x128xf32>
    %cst_251 = arith.constant 1.000000e+00 : f32
    %319 = vector.broadcast %cst_251 : f32 to vector<16x128xf32>
    %320 = arith.mulf %319, %318 : vector<16x128xf32>
    %c0_252 = arith.constant 0 : index
    %c8_253 = arith.constant 8 : index
    %c0_254 = arith.constant 0 : index
    %c0_255 = arith.constant 0 : index
    %321 = vector.load %arg1[%c0_252, %c8_253, %c0_254, %c0_255] : memref<2x16x16x128xf32, #tpu.memory_space<vmem>>, vector<1x1x16x128xf32>
    %322 = vector.shape_cast %321 : vector<1x1x16x128xf32> to vector<16x128xf32>
    %323 = arith.addf %320, %322 : vector<16x128xf32>
    %cst_256 = arith.constant 3.14159274 : f32
    %324 = vector.broadcast %cst_256 : f32 to vector<16x128xf32>
    %325 = arith.addf %323, %324 : vector<16x128xf32>
    %cst_257 = arith.constant 0.159154937 : f32
    %326 = vector.broadcast %cst_257 : f32 to vector<16x128xf32>
    %327 = arith.mulf %325, %326 : vector<16x128xf32>
    %328 = math.floor %327 : vector<16x128xf32>
    %cst_258 = arith.constant 6.28318548 : f32
    %329 = vector.broadcast %cst_258 : f32 to vector<16x128xf32>
    %330 = arith.mulf %329, %328 : vector<16x128xf32>
    %331 = arith.subf %325, %330 : vector<16x128xf32>
    %cst_259 = arith.constant 3.14159274 : f32
    %332 = vector.broadcast %cst_259 : f32 to vector<16x128xf32>
    %333 = arith.subf %331, %332 : vector<16x128xf32>
    %c8_260 = arith.constant 8 : index
    %c0_261 = arith.constant 0 : index
    %c0_262 = arith.constant 0 : index
    %334 = vector.load %arg3[%c8_260, %c0_261, %c0_262] : memref<16x16x128xf32, #tpu.memory_space<vmem>>, vector<1x16x128xf32>
    %335 = vector.shape_cast %334 : vector<1x16x128xf32> to vector<16x128xf32>
    %336 = vector.shape_cast %333 : vector<16x128xf32> to vector<1x16x128xf32>
    tpu.vector_store %arg3[%c8_260, %c0_261, %c0_262], %336 {strides = array<i32>} : memref<16x16x128xf32, #tpu.memory_space<vmem>>, vector<1x16x128xf32>,
    %cst_263 = arith.constant dense<0.000000e+00> : vector<128xf32>
    %337 = vector.multi_reduction <add>, %307, %cst_263 [0] : vector<16x128xf32> to vector<128xf32>
    %338 = vector.shape_cast %337 : vector<128xf32> to vector<1x128xf32>
    %339 = arith.addf %248, %338 : vector<1x128xf32>
    %c0_264 = arith.constant 0 : index
    %c12 = arith.constant 12 : index
    %c0_265 = arith.constant 0 : index
    %c0_266 = arith.constant 0 : index
    %340 = vector.load %arg1[%c0_264, %c12, %c0_265, %c0_266] : memref<2x16x16x128xf32, #tpu.memory_space<vmem>>, vector<1x1x16x128xf32>
    %341 = vector.shape_cast %340 : vector<1x1x16x128xf32> to vector<16x128xf32>
    %c1_267 = arith.constant 1 : index
    %c12_268 = arith.constant 12 : index
    %c0_269 = arith.constant 0 : index
    %c0_270 = arith.constant 0 : index
    %342 = vector.load %arg1[%c1_267, %c12_268, %c0_269, %c0_270] : memref<2x16x16x128xf32, #tpu.memory_space<vmem>>, vector<1x1x16x128xf32>
    %343 = vector.shape_cast %342 : vector<1x1x16x128xf32> to vector<16x128xf32>
    %344 = vector.extract_strided_slice %343 {offsets = [1, 0], sizes = [15, 128], strides = [1, 1]} : vector<16x128xf32> to vector<15x128xf32>
    %345 = vector.extract_strided_slice %343 {offsets = [0, 0], sizes = [1, 128], strides = [1, 1]} : vector<16x128xf32> to vector<1x128xf32>
    %346 = tpu.concatenate %344, %345 in 0 : vector<15x128xf32>, vector<1x128xf32> -> vector<16x128xf32>
    %347 = arith.addf %341, %346 : vector<16x128xf32>
    %c0_271 = arith.constant 0 : index
    %c13_272 = arith.constant 13 : index
    %c0_273 = arith.constant 0 : index
    %c0_274 = arith.constant 0 : index
    %348 = vector.load %arg1[%c0_271, %c13_272, %c0_273, %c0_274] : memref<2x16x16x128xf32, #tpu.memory_space<vmem>>, vector<1x1x16x128xf32>
    %349 = vector.shape_cast %348 : vector<1x1x16x128xf32> to vector<16x128xf32>
    %350 = arith.subf %347, %349 : vector<16x128xf32>
    %c1_275 = arith.constant 1 : index
    %c12_276 = arith.constant 12 : index
    %c0_277 = arith.constant 0 : index
    %c0_278 = arith.constant 0 : index
    %351 = vector.load %arg1[%c1_275, %c12_276, %c0_277, %c0_278] : memref<2x16x16x128xf32, #tpu.memory_space<vmem>>, vector<1x1x16x128xf32>
    %352 = vector.shape_cast %351 : vector<1x1x16x128xf32> to vector<16x128xf32>
    %353 = arith.subf %350, %352 : vector<16x128xf32>
    %c0_279 = arith.constant 0 : index
    %c13_280 = arith.constant 13 : index
    %c0_281 = arith.constant 0 : index
    %c0_282 = arith.constant 0 : index
    %354 = vector.load %arg1[%c0_279, %c13_280, %c0_281, %c0_282] : memref<2x16x16x128xf32, #tpu.memory_space<vmem>>, vector<1x1x16x128xf32>
    %355 = vector.shape_cast %354 : vector<1x1x16x128xf32> to vector<16x128xf32>
    %c1_283 = arith.constant 1 : index
    %c13_284 = arith.constant 13 : index
    %c0_285 = arith.constant 0 : index
    %c0_286 = arith.constant 0 : index
    %356 = vector.load %arg1[%c1_283, %c13_284, %c0_285, %c0_286] : memref<2x16x16x128xf32, #tpu.memory_space<vmem>>, vector<1x1x16x128xf32>
    %357 = vector.shape_cast %356 : vector<1x1x16x128xf32> to vector<16x128xf32>
    %358 = vector.extract_strided_slice %357 {offsets = [1, 0], sizes = [15, 128], strides = [1, 1]} : vector<16x128xf32> to vector<15x128xf32>
    %359 = vector.extract_strided_slice %357 {offsets = [0, 0], sizes = [1, 128], strides = [1, 1]} : vector<16x128xf32> to vector<1x128xf32>
    %360 = tpu.concatenate %358, %359 in 0 : vector<15x128xf32>, vector<1x128xf32> -> vector<16x128xf32>
    %361 = arith.addf %355, %360 : vector<16x128xf32>
    %c0_287 = arith.constant 0 : index
    %c14_288 = arith.constant 14 : index
    %c0_289 = arith.constant 0 : index
    %c0_290 = arith.constant 0 : index
    %362 = vector.load %arg1[%c0_287, %c14_288, %c0_289, %c0_290] : memref<2x16x16x128xf32, #tpu.memory_space<vmem>>, vector<1x1x16x128xf32>
    %363 = vector.shape_cast %362 : vector<1x1x16x128xf32> to vector<16x128xf32>
    %364 = arith.subf %361, %363 : vector<16x128xf32>
    %c1_291 = arith.constant 1 : index
    %c13_292 = arith.constant 13 : index
    %c0_293 = arith.constant 0 : index
    %c0_294 = arith.constant 0 : index
    %365 = vector.load %arg1[%c1_291, %c13_292, %c0_293, %c0_294] : memref<2x16x16x128xf32, #tpu.memory_space<vmem>>, vector<1x1x16x128xf32>
    %366 = vector.shape_cast %365 : vector<1x1x16x128xf32> to vector<16x128xf32>
    %367 = arith.subf %364, %366 : vector<16x128xf32>
    %c0_295 = arith.constant 0 : index
    %c14_296 = arith.constant 14 : index
    %c0_297 = arith.constant 0 : index
    %c0_298 = arith.constant 0 : index
    %368 = vector.load %arg1[%c0_295, %c14_296, %c0_297, %c0_298] : memref<2x16x16x128xf32, #tpu.memory_space<vmem>>, vector<1x1x16x128xf32>
    %369 = vector.shape_cast %368 : vector<1x1x16x128xf32> to vector<16x128xf32>
    %c1_299 = arith.constant 1 : index
    %c14_300 = arith.constant 14 : index
    %c0_301 = arith.constant 0 : index
    %c0_302 = arith.constant 0 : index
    %370 = vector.load %arg1[%c1_299, %c14_300, %c0_301, %c0_302] : memref<2x16x16x128xf32, #tpu.memory_space<vmem>>, vector<1x1x16x128xf32>
    %371 = vector.shape_cast %370 : vector<1x1x16x128xf32> to vector<16x128xf32>
    %372 = vector.extract_strided_slice %371 {offsets = [1, 0], sizes = [15, 128], strides = [1, 1]} : vector<16x128xf32> to vector<15x128xf32>
    %373 = vector.extract_strided_slice %371 {offsets = [0, 0], sizes = [1, 128], strides = [1, 1]} : vector<16x128xf32> to vector<1x128xf32>
    %374 = tpu.concatenate %372, %373 in 0 : vector<15x128xf32>, vector<1x128xf32> -> vector<16x128xf32>
    %375 = arith.addf %369, %374 : vector<16x128xf32>
    %c0_303 = arith.constant 0 : index
    %c15_304 = arith.constant 15 : index
    %c0_305 = arith.constant 0 : index
    %c0_306 = arith.constant 0 : index
    %376 = vector.load %arg1[%c0_303, %c15_304, %c0_305, %c0_306] : memref<2x16x16x128xf32, #tpu.memory_space<vmem>>, vector<1x1x16x128xf32>
    %377 = vector.shape_cast %376 : vector<1x1x16x128xf32> to vector<16x128xf32>
    %378 = arith.subf %375, %377 : vector<16x128xf32>
    %c1_307 = arith.constant 1 : index
    %c14_308 = arith.constant 14 : index
    %c0_309 = arith.constant 0 : index
    %c0_310 = arith.constant 0 : index
    %379 = vector.load %arg1[%c1_307, %c14_308, %c0_309, %c0_310] : memref<2x16x16x128xf32, #tpu.memory_space<vmem>>, vector<1x1x16x128xf32>
    %380 = vector.shape_cast %379 : vector<1x1x16x128xf32> to vector<16x128xf32>
    %381 = arith.subf %378, %380 : vector<16x128xf32>
    %382 = math.cos %367 : vector<16x128xf32>
    %383 = math.cos %381 : vector<16x128xf32>
    %384 = arith.addf %382, %383 : vector<16x128xf32>
    %cst_311 = arith.constant 5.000000e-01 : f32
    %385 = vector.broadcast %cst_311 : f32 to vector<16x128xf32>
    %386 = arith.mulf %385, %384 : vector<16x128xf32>
    %387 = math.sin %367 : vector<16x128xf32>
    %388 = math.sin %381 : vector<16x128xf32>
    %389 = arith.addf %387, %388 : vector<16x128xf32>
    %cst_312 = arith.constant 5.000000e-01 : f32
    %390 = vector.broadcast %cst_312 : f32 to vector<16x128xf32>
    %391 = arith.mulf %390, %389 : vector<16x128xf32>
    %392 = vector.broadcast %0 : f32 to vector<16x128xf32>
    %393 = arith.mulf %392, %386 : vector<16x128xf32>
    %394 = vector.broadcast %1 : f32 to vector<16x128xf32>
    %395 = arith.mulf %394, %391 : vector<16x128xf32>
    %396 = arith.addf %393, %395 : vector<16x128xf32>
    %397 = vector.broadcast %4 : f32 to vector<16x128xf32>
    %398 = arith.addf %396, %397 : vector<16x128xf32>
    %399 = vector.broadcast %2 : f32 to vector<16x128xf32>
    %400 = arith.mulf %399, %386 : vector<16x128xf32>
    %401 = vector.broadcast %3 : f32 to vector<16x128xf32>
    %402 = arith.mulf %401, %391 : vector<16x128xf32>
    %403 = arith.addf %400, %402 : vector<16x128xf32>
    %404 = vector.broadcast %5 : f32 to vector<16x128xf32>
    %405 = arith.addf %403, %404 : vector<16x128xf32>
    %406 = math.exp %398 : vector<16x128xf32>
    %407 = arith.mulf %406, %353 : vector<16x128xf32>
    %408 = arith.addf %407, %405 : vector<16x128xf32>
    %409 = arith.subf %408, %353 : vector<16x128xf32>
    %cst_313 = arith.constant 1.000000e+00 : f32
    %410 = vector.broadcast %cst_313 : f32 to vector<16x128xf32>
    %411 = arith.mulf %410, %409 : vector<16x128xf32>
    %c0_314 = arith.constant 0 : index
    %c12_315 = arith.constant 12 : index
    %c0_316 = arith.constant 0 : index
    %c0_317 = arith.constant 0 : index
    %412 = vector.load %arg1[%c0_314, %c12_315, %c0_316, %c0_317] : memref<2x16x16x128xf32, #tpu.memory_space<vmem>>, vector<1x1x16x128xf32>
    %413 = vector.shape_cast %412 : vector<1x1x16x128xf32> to vector<16x128xf32>
    %414 = arith.addf %411, %413 : vector<16x128xf32>
    %cst_318 = arith.constant 3.14159274 : f32
    %415 = vector.broadcast %cst_318 : f32 to vector<16x128xf32>
    %416 = arith.addf %414, %415 : vector<16x128xf32>
    %cst_319 = arith.constant 0.159154937 : f32
    %417 = vector.broadcast %cst_319 : f32 to vector<16x128xf32>
    %418 = arith.mulf %416, %417 : vector<16x128xf32>
    %419 = math.floor %418 : vector<16x128xf32>
    %cst_320 = arith.constant 6.28318548 : f32
    %420 = vector.broadcast %cst_320 : f32 to vector<16x128xf32>
    %421 = arith.mulf %420, %419 : vector<16x128xf32>
    %422 = arith.subf %416, %421 : vector<16x128xf32>
    %cst_321 = arith.constant 3.14159274 : f32
    %423 = vector.broadcast %cst_321 : f32 to vector<16x128xf32>
    %424 = arith.subf %422, %423 : vector<16x128xf32>
    %c12_322 = arith.constant 12 : index
    %c0_323 = arith.constant 0 : index
    %c0_324 = arith.constant 0 : index
    %425 = vector.load %arg3[%c12_322, %c0_323, %c0_324] : memref<16x16x128xf32, #tpu.memory_space<vmem>>, vector<1x16x128xf32>
    %426 = vector.shape_cast %425 : vector<1x16x128xf32> to vector<16x128xf32>
    %427 = vector.shape_cast %424 : vector<16x128xf32> to vector<1x16x128xf32>
    tpu.vector_store %arg3[%c12_322, %c0_323, %c0_324], %427 {strides = array<i32>} : memref<16x16x128xf32, #tpu.memory_space<vmem>>, vector<1x16x128xf32>,
    %cst_325 = arith.constant dense<0.000000e+00> : vector<128xf32>
    %428 = vector.multi_reduction <add>, %398, %cst_325 [0] : vector<16x128xf32> to vector<128xf32>
    %429 = vector.shape_cast %428 : vector<128xf32> to vector<1x128xf32>
    %430 = arith.addf %339, %429 : vector<1x128xf32>
    %c0_326 = arith.constant 0 : index
    %c0_327 = arith.constant 0 : index
    %431 = vector.load %arg4[%c0_326, %c0_327] : memref<1x128xf32, #tpu.memory_space<vmem>>, vector<1x128xf32>
    tpu.vector_store %arg4[%c0_326, %c0_327], %430 {strides = array<i32>} : memref<1x128xf32, #tpu.memory_space<vmem>>, vector<1x128xf32>,
    return
  }
  func.func @transform_0(%arg0: i32) -> (i32, i32, i32, i32) {
    %c0_i32 = arith.constant 0 : i32
    %c0_i32_0 = arith.constant 0 : i32
    %c0_i32_1 = arith.constant 0 : i32
    %c0_i32_2 = arith.constant 0 : i32
    return %c0_i32, %c0_i32_0, %c0_i32_1, %arg0 : i32, i32, i32, i32
  }
  func.func @transform_1(%arg0: i32) -> i32 {
    %c0_i32 = arith.constant 0 : i32
    %c0_i32_0 = arith.constant 0 : i32
    return %c0_i32 : i32
  }
  func.func @transform_2(%arg0: i32) -> (i32, i32, i32) {
    %c0_i32 = arith.constant 0 : i32
    %c0_i32_0 = arith.constant 0 : i32
    %c0_i32_1 = arith.constant 0 : i32
    return %c0_i32, %c0_i32_0, %arg0 : i32, i32, i32
  }
  func.func @transform_3(%arg0: i32) -> (i32, i32) {
    %c0_i32 = arith.constant 0 : i32
    %c0_i32_0 = arith.constant 0 : i32
    return %c0_i32, %arg0 : i32, i32
  }
}

</mosaic_0001>

<bundles_post_ra>
// kernel: tpu_custom_call.1
= control target key start
LH: loop header
LB: loop body
LE: loop exit
PB: predicated region body
PF: predicated region fallthrough
CT: control target
= control target key end

     0   :  { %9 = vsyncpa [#allocation3], 0  ;;  %s8575_s0 = inlined_call_operand.hbm [shape: f32[2,16,16,128], index: 0, kind: input, shape index: {}]   ;;  %s8576_s1 = inlined_call_operand.hbm [shape: f32[6], index: 1, kind: input, shape index: {}]   ;;  %s8577_s2 = inlined_call_operand.hbm [shape: f32[16,16,128], index: 2, kind: output, shape index: {0}]   ;;  %s8578_s3 = inlined_call_operand.hbm [shape: f32[1,128], index: 3, kind: output, shape index: {1}]  }
   0x1   :  { %10 = vsyncpa [#allocation5], 0 }
   0x2   :  { %11 = vsyncpa [#allocation4], 0 }
   0x3   :  { %12 = vsyncpa [#allocation9], 0  ;;  %s17_s14 = sshll.u32 %s8575_s0, 4  ;;  %s5838_s15 = smov [#allocation2]   ;;  %s18_s14 = int_to_ptr.hbm [resolvable:$true] %s17_s14 }
   0x4   :  { %s19_s16 = sshll.u32 %s5838_s15, 4  ;;  %s31_s19 = sshll.u32 %s8576_s1, 4  ;;  %s20_s16 = int_to_ptr.vmem [resolvable:$true] %s19_s16  ;;  %s32_s19 = int_to_ptr.hbm [resolvable:$true] %s31_s19 }
   0x5   :  { %s5839_s20 = smov 128   ;;  %s5840_s21 = smov 8  }
   0x6   :  { %25 = dma.hbm_to_vmem [thread:$0]  %s18_s14, 8192, %s20_s16, [#allocation3], %s5839_s20, %s5839_s20, %s5840_s21  }
   0x7   :  { %s5841_s22 = smov [#allocation6]  }
   0x8   :  { %34 = dma.hbm_to_smem %s32_s19, 16, %s5841_s22, [#allocation5]  }
   0x9   :  { %5830 = dma.done.wait [#allocation3], 8192  }
   0xa   :  { %5831 = vsyncadd [#allocation3], 4294959104 }
   0xb   :  { %5832 = dma.done.wait [#allocation5], 16  }
   0xc   :  { %5833 = vsyncadd [#allocation5], 4294967280 }
   0xd   :  { %43 = sfence }
   0xe   :  { %v5880_v0 = vld [vmem:[#allocation2 + $0x10] sm:$0xff]  ;;  %v52_v1 = vld [vmem:[#allocation2 + $0x18] sm:$0xff]  ;;  %v57_v2 = vld [vmem:[#allocation2 + $0x20] sm:$0xff]  ;;  %vm129_vm0 = vcmask 1046528   ;;  %s6517_s0 = sld [smem:[#allocation6]]  ;;  %s5849_s27 = smov [#allocation8]  }
   0xf   :  { %54 = vst [vmem:[#allocation7 + $0x10] sm:$0xff] %v5880_v0  ;;  %v58_v3 = vld [vmem:[#allocation2 + $0x28] sm:$0xff]  ;;  %v5883_v4 = vld [vmem:[#allocation2 + $0x30] sm:$0xff]  ;;  %v5885_v6 = vld [vmem:[#allocation2 + $0x38] sm:$0xff]  ;;  %s6522_s1 = sld [smem:[#allocation6 + $0x1]]  ;;  %s5578_s28 = sshll.u32 %s5849_s27, 4  ;;  %s5579_s28 = int_to_ptr.vmem [resolvable:$true] %s5578_s28 }
  0x10   :  { %55 = vst [vmem:[#allocation7 + $0x18] sm:$0xff] %v52_v1  ;;  %v69_v5 = vld [vmem:[#allocation2 + $0x50] sm:$0xff]  ;;  %v70_v7 = vld [vmem:[#allocation2 + $0x58] sm:$0xff]  ;;  %v75_v8 = vld [vmem:[#allocation2 + $0x60] sm:$0xff]  ;;  %s6530_s23 = sld [smem:[#allocation6 + $0x2]]  ;;  %s5580_s4 = sshll.u32 %s8578_s3, 4  ;;  %s5581_s4 = int_to_ptr.hbm [resolvable:$true] %s5580_s4 }
  0x11   :  { %60 = vst [vmem:[#allocation7 + $0x20] sm:$0xff] %v57_v2  ;;  %v76_v9 = vld [vmem:[#allocation2 + $0x68] sm:$0xff]  ;;  %v81_v10 = vld [vmem:[#allocation2 + $0x70] sm:$0xff]  ;;  %v82_v11 = vld [vmem:[#allocation2 + $0x78] sm:$0xff]  ;;  %s6534_s24 = sld [smem:[#allocation6 + $0x3]]  ;;  %s5850_s5 = smov [#allocation7]  }
  0x12   :  { %61 = vst [vmem:[#allocation7 + $0x28] sm:$0xff] %v58_v3  ;;  %v146_v12 = vld [vmem:[#allocation2 + $0x110] sm:$0xff]  ;;  %v147_v13 = vld [vmem:[#allocation2 + $0x118] sm:$0xff]  ;;  %v166_v17 = vld [vmem:[#allocation2 + $0x120] sm:$0xff]  ;;  %s6545_s25 = sld [smem:[#allocation6 + $0x4]]  ;;  %s5564_s6 = sshll.u32 %s5850_s5, 4  ;;  %s5565_s6 = int_to_ptr.vmem [resolvable:$true] %s5564_s6 }
  0x13   :  { %66 = vst [vmem:[#allocation7 + $0x30] sm:$0xff] %v5883_v4  ;;  %v87_v14 = vld [vmem:[#allocation2 + $0x90] sm:$0xff]  ;;  %v150_v15 = vrot.slane %v146_v12, 1  ;;  %v151_v16 = vrot.slane %v147_v13, 1  ;;  %v5889_v18 = vld [vmem:[#allocation2 + $0x128] sm:$0xff]  ;;  %v88_v19 = vld [vmem:[#allocation2 + $0x98] sm:$0xff] }
  0x14   :  { %67 = vst [vmem:[#allocation7 + $0x38] sm:$0xff] %v5885_v6  ;;  %v170_v20 = vrot.slane %v166_v17, 1  ;;  %v171_v21 = vrot.slane %v5889_v18, 1  ;;  %v93_v22 = vld [vmem:[#allocation2 + $0xa0] sm:$0xff]  ;;  %v94_v25 = vld [vmem:[#allocation2 + $0xa8] sm:$0xff]  ;;  %v99_v28 = vld [vmem:[#allocation2 + $0xb0] sm:$0xff] }
  0x15   :  { %72 = vst [vmem:[#allocation7 + $0x50] sm:$0xff] %v69_v5  ;;  %v152_v23 = vsel %vm129_vm0, %v150_v15, %v151_v16  ;;  %v156_v24 = vsel %vm129_vm0, %v151_v16, %v150_v15  ;;  %v100_v31 = vld [vmem:[#allocation2 + $0xb8] sm:$0xff]  ;;  %v105_v34 = vld [vmem:[#allocation2 + $0xd0] sm:$0xff]  ;;  %v111_v40 = vld [vmem:[#allocation2 + $0xe0] sm:$0xff]  ;;  %v8590_v15 = vmov 2102212464  }
  0x16   :  { %73 = vst [vmem:[#allocation7 + $0x58] sm:$0xff] %v70_v7  ;;  %v157_v26 = vadd.f32 %v152_v23, %v5880_v0  ;;  %v158_v27 = vadd.f32 %v156_v24, %v52_v1  ;;  %v172_v29 = vsel %vm129_vm0, %v170_v20, %v171_v21  ;;  %v176_v30 = vsel %vm129_vm0, %v171_v21, %v170_v20  ;;  %v106_v37 = vld [vmem:[#allocation2 + $0xd8] sm:$0xff]  ;;  %v112_v43 = vld [vmem:[#allocation2 + $0xe8] sm:$0xff]  ;;  %v117_v47 = vld [vmem:[#allocation2 + $0xf0] sm:$0xff]  ;;  %s6589_s26 = sld [smem:[#allocation6 + $0x5]]  ;;  %s5566_s9 = sshll.u32 %s8577_s2, 4  ;;  %s5567_s9 = int_to_ptr.hbm [resolvable:$true] %s5566_s9 }
  0x17   :  { %78 = vst [vmem:[#allocation7 + $0x60] sm:$0xff] %v75_v8  ;;  %v177_v35 = vadd.f32 %v172_v29, %v57_v2  ;;  %v5897_v36 = vadd.f32 %v176_v30, %v58_v3  ;;  %v118_v49 = vld [vmem:[#allocation2 + $0xf8] sm:$0xff] }
  0x18   :  { %79 = vst [vmem:[#allocation7 + $0x68] sm:$0xff] %v76_v9  ;;  %v161_v32 = vsub.f32 %v157_v26, %v57_v2  ;;  %v162_v33 = vsub.f32 %v158_v27, %v58_v3  ;;  %v8594_v9 = vmov 683565275   ;;  %v8579_v27 = vmov 1326507024  }
  0x19   :  { %84 = vst [vmem:[#allocation7 + $0x70] sm:$0xff] %v81_v10  ;;  %v181_v41 = vsub.f32 %v177_v35, %v5883_v4  ;;  %v182_v42 = vsub.f32 %v5897_v36, %v5885_v6 }
  0x1a   :  { %85 = vst [vmem:[#allocation7 + $0x78] sm:$0xff] %v82_v11  ;;  %v5899_v38 = vsub.f32 %v161_v32, %v146_v12  ;;  %v5901_v39 = vsub.f32 %v162_v33, %v147_v13  ;;  %v8584_v11 = vmov 2475754826   ;;  %v8586_v13 = vmov 2131351028  }
  0x1b   :  { %90 = vst [vmem:[#allocation7 + $0x90] sm:$0xff] %v87_v14  ;;  %v5910_v50 = vsub.f32 %v181_v41, %v166_v17  ;;  %v8581_v17 = vmov 920167782  }
  0x1c   :  { %91 = vst [vmem:[#allocation7 + $0x98] sm:$0xff] %v88_v19  ;;  %v185_v44 = vand.u32 2147483647, %v5899_v38  ;;  %v188_v45 = vand.u32 2139095040, %v5899_v38  ;;  %v342_v46 = vand.u32 2139095040, %v5901_v39 }
  0x1d   :  { %96 = vst [vmem:[#allocation7 + $0xa0] sm:$0xff] %v93_v22  ;;  %v339_v48 = vand.u32 2147483647, %v5901_v39  ;;  %v496_v59 = vand.u32 2139095040, %v5910_v50 }
  0x1e   :  { %97 = vst [vmem:[#allocation7 + $0xa8] sm:$0xff] %v94_v25  ;;  %v189_v51 = vshrl.u32 %v188_v45, 23  ;;  %v192_v52 = vand.u32 8388607, %v185_v44  ;;  %v343_v53 = vshrl.u32 %v342_v46, 23 }
  0x1f   :  { %102 = vst [vmem:[#allocation7 + $0xb0] sm:$0xff] %v99_v28  ;;  %v346_v54 = vand.u32 8388607, %v339_v48  ;;  %v497_v3 = vshrl.u32 %v496_v59, 23 }
  0x20   :  { %103 = vst [vmem:[#allocation7 + $0xb8] sm:$0xff] %v100_v31  ;;  %v5601_v55 = vadd.s32 4294967169, %v189_v51  ;;  %v193_v56 = vor.u32 8388608, %v192_v52  ;;  %v5604_v57 = vadd.s32 4294967169, %v343_v53 }
  0x21   :  { %108 = vst [vmem:[#allocation7 + $0xd0] sm:$0xff] %v105_v34  ;;  %v347_v60 = vor.u32 8388608, %v346_v54  ;;  %v5935_v25 = vadd.s32 4294967169, %v497_v3 }
  0x22   :  { %109 = vst [vmem:[#allocation7 + $0xd8] sm:$0xff] %v106_v37  ;;  %v195_v58 = vadd.s32 1, %v5601_v55  ;;  %v349_v61 = vadd.s32 1, %v5604_v57  ;;  %v5917_v63 = vshll.u32 %v193_v56, 8 }
  0x23   :  { %114 = vst [vmem:[#allocation7 + $0xe0] sm:$0xff] %v111_v40  ;;  %v5923_v7 = vshll.u32 %v347_v60, 8 }
  0x24   :  { %115 = vst [vmem:[#allocation7 + $0xe8] sm:$0xff] %v112_v43  ;;  %vm196_vm1 = vcmp.gt.s32.totalorder %v195_v58, 0  ;;  %vm350_vm2 = vcmp.gt.s32.totalorder %v349_v61, 0  ;;  %v234_v20 = vand.u32 65535, %v5917_v63  ;;  %v235_v21 = vshrl.u32 %v5917_v63, 16 }
  0x25   :  { %120 = vst [vmem:[#allocation7 + $0xf0] sm:$0xff] %v117_v47  ;;  %v197_v62 = vsel %vm196_vm1, %v195_v58, 0  ;;  %v351_v2 = vsel %vm350_vm2, %v349_v61, 0 }
  0x26   :  { %121 = vst [vmem:[#allocation7 + $0xf8] sm:$0xff] %v118_v49  ;;  %v199_v1 = vand.u32 31, %v197_v62  ;;  %v5919_v4 = vshrl.u32 %v197_v62, 5  ;;  %v5921_v5 = vand.u32 31, %v351_v2  ;;  %v5951_v41 = vshrl.u32 %v351_v2, 5 }
  0x28   :  { %v200_v8 = vsub.s32 32, %v199_v1  ;;  %v202_v10 = vshll.u32 %v8594_v9, %v199_v1  ;;  %v205_v12 = vshll.u32 %v8584_v11, %v199_v1  ;;  %v208_v14 = vshll.u32 %v8586_v13, %v199_v1 }
  0x29   :  { %v211_v16 = vshll.u32 %v8590_v15, %v199_v1  ;;  %v214_v19 = vshll.u32 %v8581_v17, %v199_v1  ;;  %vm217_vm3 = vcmp.lt.s32.totalorder %v5919_v4, 1  ;;  %vm220_vm4 = vcmp.lt.s32.totalorder %v5919_v4, 4 }
  0x2a   :  { %v203_v22 = vshrl.u32 %v8584_v11, %v200_v8  ;;  %v206_v23 = vshrl.u32 %v8586_v13, %v200_v8  ;;  %v209_v24 = vshrl.u32 %v8590_v15, %v200_v8  ;;  %v212_v26 = vshrl.u32 %v8581_v17, %v200_v8 }
  0x2b   :  { %v215_v28 = vshrl.u32 %v8579_v27, %v200_v8  ;;  %v5942_v32 = vsub.s32 32, %v5921_v5  ;;  %v201_v33 = vshrl.u32 %v8594_v9, %v200_v8  ;;  %vm219_vm5 = vcmp.lt.s32.totalorder %v5919_v4, 3 }
  0x2c   :  { %v204_v29 = vor.u32 %v203_v22, %v202_v10  ;;  %v207_v30 = vor.u32 %v206_v23, %v205_v12  ;;  %v210_v31 = vor.u32 %v209_v24, %v208_v14  ;;  %v213_v34 = vor.u32 %v212_v26, %v211_v16 }
  0x2d   :  { %v216_v35 = vor.u32 %v215_v28, %v214_v19  ;;  %vm218_vm6 = vcmp.lt.s32.totalorder %v5919_v4, 2  ;;  %v356_v46 = vshll.u32 %v8594_v9, %v5921_v5  ;;  %v359_v47 = vshll.u32 %v8584_v11, %v5921_v5 }
  0x2e   :  { %v225_v37 = vsel %vm217_vm3, %v204_v29, %v207_v30  ;;  %v229_v40 = vsel %vm217_vm3, %v207_v30, %v210_v31  ;;  %v226_v43 = vsel %vm220_vm4, %v213_v34, 920167782  ;;  %v222_v49 = vsel %vm220_vm4, %v210_v31, 2102212464 }
  0x2f   :  { %v230_v45 = vsel %vm220_vm4, %v216_v35, 1326507024  ;;  %v227_v51 = vsel %vm219_vm5, %v210_v31, %v226_v43  ;;  %v357_v53 = vshrl.u32 %v8584_v11, %v5942_v32  ;;  %v221_v54 = vsel %vm217_vm3, %v201_v33, %v204_v29 }
  0x30   :  { %v231_v52 = vsel %vm219_vm5, %v213_v34, %v230_v45  ;;  %v228_v55 = vsel %vm218_vm6, %v225_v37, %v227_v51  ;;  %v360_v57 = vshrl.u32 %v8586_v13, %v5942_v32  ;;  %v223_v62 = vsel %vm219_vm5, %v207_v30, %v222_v49 }
  0x31   :  { %v232_v56 = vsel %vm218_vm6, %v229_v40, %v231_v52  ;;  %v258_v60 = vand.u32 65535, %v228_v55  ;;  %v259_v61 = vshrl.u32 %v228_v55, 16  ;;  %v5979_v1 = vor.u32 %v357_v53, %v356_v46 }
  0x32   :  { %v236_v58 = vand.u32 65535, %v232_v56  ;;  %v237_v59 = vshrl.u32 %v232_v56, 16  ;;  %v5981_v2 = vor.u32 %v360_v57, %v359_v47  ;;  %v362_v3 = vshll.u32 %v8586_v13, %v5921_v5 }
  0x33   :  { %v363_v14 = vshrl.u32 %v8590_v15, %v5942_v32  ;;  %v260_v19 = vmul.u32 %v258_v60, %v234_v20  ;;  %v261_v22 = vmul.u32 %v259_v61, %v234_v20  ;;  %v262_v23 = vmul.u32 %v258_v60, %v235_v21 }
  0x34   :  { %v238_v8 = vmul.u32 %v236_v58, %v234_v20  ;;  %v239_v10 = vmul.u32 %v237_v59, %v234_v20  ;;  %v240_v12 = vmul.u32 %v236_v58, %v235_v21  ;;  %v241_v16 = vmul.u32 %v237_v59, %v235_v21 }
  0x35   :  { %v263_v29 = vmul.u32 %v259_v61, %v235_v21  ;;  %v264_v31 = vshll.u32 %v261_v22, 16  ;;  %v265_v33 = vshrl.u32 %v261_v22, 16  ;;  %v266_v34 = vshll.u32 %v262_v23, 16 }
  0x36   :  { %v242_v24 = vshll.u32 %v239_v10, 16  ;;  %v243_v26 = vshrl.u32 %v239_v10, 16  ;;  %v244_v28 = vshll.u32 %v240_v12, 16  ;;  %v245_v30 = vshrl.u32 %v240_v12, 16 }
  0x37   :  { %v267_v37 = vshrl.u32 %v262_v23, 16  ;;  %v365_v40 = vshll.u32 %v8590_v15, %v5921_v5  ;;  %v8588_v43 = vmov 0   ;;  %vm268_vm8 = vc.u32 %v260_v19, %v264_v31 }
  0x38   :  { %vm246_vm7 = vc.u32 %v238_v8, %v242_v24  ;;  %v248_v35 = vadd.s32 %v242_v24, %v238_v8  ;;  %v270_v20 = vadd.s32 %v264_v31, %v260_v19  ;;  %v366_v46 = vshrl.u32 %v8581_v17, %v5942_v32 }
  0x39   :  { %v247_v45 = vsel %vm246_vm7, 1, %v8588_v43  ;;  %v269_v21 = vsel %vm268_vm8, 1, %v8588_v43  ;;  %v368_v49 = vshll.u32 %v8581_v17, %v5921_v5  ;;  %v364_v53 = vor.u32 %v363_v14, %v362_v3 }
  0x3a   :  { %v249_v47 = vadd.s32 %v247_v45, %v241_v16  ;;  %vm250_vm9 = vc.u32 %v248_v35, %v244_v28  ;;  %v271_v52 = vadd.s32 %v269_v21, %v263_v29  ;;  %vm272_vm10 = vc.u32 %v270_v20, %v266_v34 }
  0x3b   :  { %v251_v51 = vsel %vm250_vm9, 1, %v8588_v43  ;;  %v273_v56 = vsel %vm272_vm10, 1, %v8588_v43  ;;  %v367_v57 = vor.u32 %v366_v46, %v365_v40  ;;  %v369_v58 = vshrl.u32 %v8579_v27, %v5942_v32 }
  0x3c   :  { %v253_v55 = vadd.s32 %v251_v51, %v249_v47  ;;  %v5999_v59 = vadd.s32 %v270_v20, %v266_v34  ;;  %v275_v60 = vadd.s32 %v273_v56, %v271_v52  ;;  %vm371_vm11 = vcmp.lt.s32.totalorder %v5951_v41, 1 }
  0x3d   :  { %vm373_vm12 = vcmp.lt.s32.totalorder %v5951_v41, 3  ;;  %v370_v61 = vor.u32 %v369_v58, %v368_v49  ;;  %vm372_vm13 = vcmp.lt.s32.totalorder %v5951_v41, 2  ;;  %vm374_vm14 = vcmp.lt.s32.totalorder %v5951_v41, 4 }
  0x3e   :  { %v254_v5 = vadd.s32 %v253_v55, %v243_v26  ;;  %v224_v3 = vsel %vm218_vm6, %v221_v54, %v223_v62  ;;  %v276_v8 = vadd.s32 %v275_v60, %v265_v33  ;;  %v379_v10 = vsel %vm371_vm11, %v5979_v1, %v5981_v2 }
  0x3f   :  { %v380_v12 = vsel %vm374_vm14, %v367_v57, 920167782  ;;  %v383_v19 = vsel %vm371_vm11, %v5981_v2, %v364_v53  ;;  %v388_v4 = vand.u32 65535, %v5923_v7  ;;  %v384_v22 = vsel %vm374_vm14, %v370_v61, 1326507024 }
  0x40   :  { %v6013_v14 = vadd.s32 %v254_v5, %v245_v30  ;;  %v381_v16 = vsel %vm373_vm12, %v364_v53, %v380_v12  ;;  %v277_v54 = vadd.s32 %v276_v8, %v267_v37  ;;  %v389_v23 = vshrl.u32 %v5923_v7, 16 }
  0x41   :  { %v382_v62 = vsel %vm372_vm13, %v379_v10, %v381_v16  ;;  %v278_v24 = vmul.u32 %v5917_v63, %v224_v3  ;;  %v385_v26 = vsel %vm373_vm12, %v367_v57, %v384_v22  ;;  %v355_v30 = vshrl.u32 %v8594_v9, %v5942_v32 }
  0x42   :  { %vm280_vm15 = vc.u32 %v6013_v14, %v5999_v59  ;;  %v412_v28 = vand.u32 65535, %v382_v62  ;;  %v281_v29 = vadd.s32 1, %v277_v54  ;;  %v386_v31 = vsel %vm372_vm13, %v383_v19, %v385_v26 }
  0x43   :  { %v413_v33 = vshrl.u32 %v382_v62, 16  ;;  %v376_v34 = vsel %vm374_vm14, %v364_v53, 2102212464  ;;  %v390_v35 = vand.u32 65535, %v386_v31  ;;  %v391_v63 = vshrl.u32 %v386_v31, 16 }
  0x44   :  { %v503_v37 = vadd.s32 1, %v5935_v25  ;;  %v282_v40 = vsel %vm280_vm15, %v281_v29, %v277_v54  ;;  %v414_v45 = vmul.u32 %v412_v28, %v388_v4  ;;  %v416_v46 = vmul.u32 %v412_v28, %v389_v23 }
  0x45   :  { %v415_v20 = vmul.u32 %v413_v33, %v388_v4  ;;  %v283_v47 = vadd.s32 %v282_v40, %v278_v24  ;;  %v392_v21 = vmul.u32 %v390_v35, %v388_v4  ;;  %v393_v49 = vmul.u32 %v391_v63, %v388_v4 }
  0x46   :  { %v394_v51 = vmul.u32 %v390_v35, %v389_v23  ;;  %v375_v32 = vsel %vm371_vm11, %v355_v30, %v5979_v1  ;;  %v377_v53 = vsel %vm373_vm12, %v5981_v2, %v376_v34  ;;  %v395_v56 = vmul.u32 %v391_v63, %v389_v23 }
  0x47   :  { %v418_v52 = vshll.u32 %v415_v20, 16  ;;  %v284_v55 = vadd.s32 536870912, %v283_v47  ;;  %v396_v25 = vshll.u32 %v393_v49, 16  ;;  %v417_v58 = vmul.u32 %v413_v33, %v389_v23 }
  0x48   :  { %v398_v57 = vshll.u32 %v394_v51, 16  ;;  %v420_v60 = vshll.u32 %v416_v46, 16  ;;  %vm504_vm1 = vcmp.gt.s32.totalorder %v503_v37, 0  ;;  %v397_v3 = vshrl.u32 %v393_v49, 16 }
  0x49   :  { %v6044_v5 = vshrl.u32 %v284_v55, 30  ;;  %vm400_vm2 = vc.u32 %v392_v21, %v396_v25  ;;  %v402_v61 = vadd.s32 %v396_v25, %v392_v21  ;;  %vm422_vm3 = vc.u32 %v414_v45, %v418_v52 }
  0x4a   :  { %v401_v1 = vsel %vm400_vm2, 1, %v8588_v43  ;;  %v423_v8 = vsel %vm422_vm3, 1, %v8588_v43  ;;  %v424_v10 = vadd.s32 %v418_v52, %v414_v45  ;;  %v505_v16 = vsel %vm504_vm1, %v503_v37, 0 }
  0x4b   :  { %v286_v12 = vshll.u32 %v6044_v5, 30  ;;  %v403_v2 = vadd.s32 %v401_v1, %v395_v56  ;;  %vm404_vm4 = vc.u32 %v402_v61, %v398_v57  ;;  %v419_v4 = vshrl.u32 %v415_v20, 16 }
  0x4c   :  { %v405_v19 = vsel %vm404_vm4, 1, %v8588_v43  ;;  %v425_v54 = vadd.s32 %v423_v8, %v417_v58  ;;  %vm426_vm5 = vc.u32 %v424_v10, %v420_v60  ;;  %v399_v22 = vshrl.u32 %v394_v51, 16 }
  0x4d   :  { %v287_v62 = vsub.s32 %v283_v47, %v286_v12  ;;  %v407_v23 = vadd.s32 %v405_v19, %v403_v2  ;;  %v427_v24 = vsel %vm426_vm5, 1, %v8588_v43  ;;  %v421_v26 = vshrl.u32 %v416_v46, 16 }
  0x4e   :  { %v429_v28 = vadd.s32 %v427_v24, %v425_v54  ;;  %v493_v29 = vand.u32 2147483647, %v5910_v50  ;;  %v507_v30 = vand.u32 31, %v505_v16  ;;  %v6052_v34 = vadd.s32 %v424_v10, %v420_v60 }
  0x4f   :  { %vm288_vm6 = vcmp.lt.s32.totalorder %v287_v62, 0  ;;  %v289_v31 = vsub.s32 0, %v287_v62  ;;  %v408_v33 = vadd.s32 %v407_v23, %v397_v3  ;;  %v378_v35 = vsel %vm372_vm13, %v375_v32, %v377_v53 }
  0x50   :  { %v430_v63 = vadd.s32 %v429_v28, %v419_v4  ;;  %v6058_v45 = vsub.s32 32, %v507_v30  ;;  %v279_v47 = vadd.s32 %v5999_v59, %v6013_v14  ;;  %v432_v21 = vmul.u32 %v5923_v7, %v378_v35 }
  0x51   :  { %v290_v37 = vsel %vm288_vm6, %v289_v31, %v287_v62  ;;  %v6056_v40 = vadd.s32 %v408_v33, %v399_v22  ;;  %v500_v41 = vand.u32 8388607, %v493_v29  ;;  %v6067_v32 = vshrl.u32 %v505_v16, 5 }
  0x52   :  { %v291_v20 = vclz %v290_v37  ;;  %v431_v46 = vadd.s32 %v430_v63, %v421_v26  ;;  %v510_v52 = vshll.u32 %v8594_v9, %v507_v30  ;;  %v511_v55 = vshrl.u32 %v8584_v11, %v6058_v45 }
  0x53   :  { %vm434_vm7 = vc.u32 %v6056_v40, %v6052_v34  ;;  %v513_v53 = vshll.u32 %v8584_v11, %v507_v30  ;;  %v514_v7 = vshrl.u32 %v8586_v13, %v6058_v45  ;;  %v516_v59 = vshll.u32 %v8586_v13, %v507_v30 }
  0x54   :  { %v5602_v49 = vadd.s32 4294967294, %v291_v20  ;;  %v435_v51 = vadd.s32 1, %v431_v46  ;;  %v519_v56 = vshll.u32 %v8590_v15, %v507_v30  ;;  %v520_v25 = vshrl.u32 %v8581_v17, %v6058_v45 }
  0x55   :  { %v517_v60 = vshrl.u32 %v8590_v15, %v6058_v45  ;;  %v522_v61 = vshll.u32 %v8581_v17, %v507_v30  ;;  %v523_v10 = vshrl.u32 %v8579_v27, %v6058_v45  ;;  %v501_v2 = vor.u32 8388608, %v500_v41 }
  0x56   :  { %vm5603_vm8 = vcmp.lt.s32.totalorder %v5602_v49, 0  ;;  %v436_v14 = vsel %vm434_vm7, %v435_v51, %v431_v46  ;;  %v6084_v16 = vor.u32 %v511_v55, %v510_v52  ;;  %v6086_v19 = vor.u32 %v514_v7, %v513_v53 }
  0x57   :  { %v294_v57 = vsel %vm5603_vm8, 0, %v5602_v49  ;;  %v437_v58 = vadd.s32 %v436_v14, %v432_v21  ;;  %v521_v22 = vor.u32 %v520_v25, %v519_v56  ;;  %vm525_vm9 = vcmp.lt.s32.totalorder %v6067_v32, 1 }
  0x58   :  { %v295_v3 = vsub.s32 32, %v294_v57  ;;  %v296_v1 = vshll.u32 %v287_v62, %v294_v57  ;;  %v299_v8 = vsub.s32 4294967266, %v294_v57  ;;  %v6091_v24 = vor.u32 %v517_v60, %v516_v59 }
  0x59   :  { %v438_v12 = vadd.s32 536870912, %v437_v58  ;;  %vm528_vm10 = vcmp.lt.s32.totalorder %v6067_v32, 4  ;;  %v524_v28 = vor.u32 %v523_v10, %v522_v61  ;;  %vm527_vm11 = vcmp.lt.s32.totalorder %v6067_v32, 3 }
  0x5a   :  { %v297_v4 = vshrl.u32 %v279_v47, %v295_v3  ;;  %v300_v54 = vadd.s32 127, %v299_v8  ;;  %vm526_vm12 = vcmp.lt.s32.totalorder %v6067_v32, 2  ;;  %v533_v31 = vsel %vm525_vm9, %v6084_v16, %v6086_v19 }
  0x5b   :  { %v6089_v23 = vshrl.u32 %v438_v12, 30  ;;  %v6101_v33 = vshll.u32 %v501_v2, 8  ;;  %v534_v37 = vsel %vm528_vm10, %v521_v22, 920167782  ;;  %v537_v47 = vsel %vm525_vm9, %v6086_v19, %v6091_v24 }
  0x5c   :  { %v298_v62 = vor.u32 %v297_v4, %v296_v1  ;;  %v301_v26 = vshll.u32 %v300_v54, 23  ;;  %v535_v46 = vsel %vm527_vm11, %v6091_v24, %v534_v37  ;;  %v538_v49 = vsel %vm528_vm10, %v524_v28, 1326507024 }
  0x5d   :  { %v440_v30 = vshll.u32 %v6089_v23, 30  ;;  %v536_v41 = vsel %vm526_vm12, %v533_v31, %v535_v46  ;;  %v539_v52 = vsel %vm527_vm11, %v521_v22, %v538_v49  ;;  %v542_v55 = vand.u32 65535, %v6101_v33 }
  0x5e   :  { %v302_v35 = vor.u32 4788187, %v301_v26  ;;  %v305_v63 = vcvt.s32.f32 %v298_v62  ;;  %vm187_vm14 = vcmp.lt.s32.totalorder %v5899_v38, 0  ;;  %v540_v7 = vsel %vm526_vm12, %v537_v47, %v539_v52  ;;  %v6135_v62 = vld [vmem:[#allocation2 + $0x100] sm:$0xff] }
  0x5f   :  { %v441_v20 = vsub.s32 %v437_v58, %v440_v30  ;;  %v543_v59 = vshrl.u32 %v6101_v33, 16  ;;  %v544_v56 = vand.u32 65535, %v540_v7  ;;  %v545_v25 = vshrl.u32 %v540_v7, 16 }
  0x60   :  { %v303_v21 = vand.u32 2147483647, %v302_v35  ;;  %v567_v57 = vshrl.u32 %v536_v41, 16  ;;  %vm6125_vm15 = vcmp.le.f32.partialorder %v185_v44, 0.7853982  ;;  %v566_v12 = vand.u32 65535, %v536_v41 }
  0x61   :  { %vm442_vm13 = vcmp.lt.s32.totalorder %v441_v20, 0  ;;  %v443_v51 = vsub.s32 0, %v441_v20  ;;  %v546_v61 = vmul.u32 %v544_v56, %v542_v55  ;;  %v547_v3 = vmul.u32 %v545_v25, %v542_v55 }
  0x62   :  { %v306_v53 = vmul.f32 %v305_v63, %v303_v21  ;;  %v548_v2 = vmul.u32 %v544_v56, %v543_v59  ;;  %v6131_v54 = vmul.u32 %v567_v57, %v542_v55  ;;  %v433_v22 = vadd.s32 %v6052_v34, %v6056_v40 }
  0x63   :  { %v444_v14 = vsel %vm442_vm13, %v443_v51, %v441_v20  ;;  %v550_v4 = vshll.u32 %v547_v3, 16  ;;  %v549_v28 = vmul.u32 %v545_v25, %v543_v59  ;;  %v568_v35 = vmul.u32 %v566_v12, %v542_v55  ;;  %v6158_v25 = vld [vmem:[#allocation2 + $0x108] sm:$0xff] }
  0x64   :  { %v307_v58 = vxor.u32 2147483648, %v306_v53  ;;  %v445_v60 = vclz %v444_v14  ;;  %v570_v63 = vmul.u32 %v566_v12, %v543_v59  ;;  %v552_v46 = vshll.u32 %v548_v2, 16 }
  0x65   :  { %vm554_vm2 = vc.u32 %v546_v61, %v550_v4  ;;  %v572_v34 = vshll.u32 %v6131_v54, 16  ;;  %v130_v40 = vrot.slane %v6135_v62, 1  ;;  %v6149_v21 = vsub.f32 %v182_v42, %v5889_v18 }
  0x66   :  { %v308_v8 = vsel %vm187_vm14, %v307_v58, %v306_v53  ;;  %v5605_v10 = vadd.s32 4294967294, %v445_v60  ;;  %v555_v47 = vsel %vm554_vm2, 1, %v8588_v43  ;;  %v509_v51 = vshrl.u32 %v8594_v9, %v6058_v45 }
  0x67   :  { %v6140_v44 = vsel %vm6125_vm15, %v5899_v38, %v308_v8  ;;  %v556_v52 = vadd.s32 %v550_v4, %v546_v61  ;;  %v557_v55 = vadd.s32 %v555_v47, %v549_v28  ;;  %v551_v14 = vshrl.u32 %v547_v3, 16 }
  0x68   :  { %vm5606_vm1 = vcmp.lt.s32.totalorder %v5605_v10, 0  ;;  %v6153_v41 = vmul.f32 %v6140_v44, %v6140_v44  ;;  %v571_v56 = vmul.u32 %v567_v57, %v543_v59  ;;  %v574_v18 = vshll.u32 %v570_v63, 16 }
  0x69   :  { %v448_v26 = vsel %vm5606_vm1, 0, %v5605_v10  ;;  %vm558_vm3 = vc.u32 %v556_v52, %v552_v46  ;;  %vm576_vm4 = vc.u32 %v568_v35, %v572_v34  ;;  %v530_v45 = vsel %vm528_vm10, %v6091_v24, 2102212464 }
  0x6a   :  { %v449_v30 = vsub.s32 32, %v448_v26  ;;  %v450_v31 = vshll.u32 %v441_v20, %v448_v26  ;;  %v453_v37 = vsub.s32 4294967266, %v448_v26  ;;  %v314_v53 = vmul.f32 -0.001358992, %v6153_v41 }
  0x6b   :  { %v321_v36 = vmul.f32 -0.00019511016, %v6153_v41  ;;  %v559_v58 = vsel %vm558_vm3, 1, %v8588_v43  ;;  %v577_v3 = vsel %vm576_vm4, 1, %v8588_v43  ;;  %v578_v59 = vadd.s32 %v572_v34, %v568_v35 }
  0x6c   :  { %v451_v20 = vshrl.u32 %v433_v22, %v449_v30  ;;  %v454_v49 = vadd.s32 127, %v453_v37  ;;  %v561_v61 = vadd.s32 %v559_v58, %v557_v55  ;;  %v131_v57 = vrot.slane %v6158_v25, 1 }
  0x6d   :  { %v315_v8 = vadd.f32 0.041655596, %v314_v53  ;;  %v553_v10 = vshrl.u32 %v548_v2, 16  ;;  %v579_v12 = vadd.s32 %v577_v3, %v571_v56  ;;  %v573_v26 = vshrl.u32 %v6131_v54, 16 }
  0x6e   :  { %v452_v7 = vor.u32 %v451_v20, %v450_v31  ;;  %v455_v6 = vshll.u32 %v454_v49, 23  ;;  %v562_v22 = vadd.s32 %v561_v61, %v551_v14  ;;  %vm580_vm5 = vc.u32 %v578_v59, %v574_v18  ;;  %v6204_v14 = vld [vmem:[#allocation2] sm:$0xff] }
  0x6f   :  { %v322_v28 = vadd.f32 0.008332121, %v321_v36  ;;  %v529_v24 = vsel %vm525_vm9, %v509_v51, %v6084_v16  ;;  %v531_v30 = vsel %vm527_vm11, %v6086_v19, %v530_v45  ;;  %v581_v31 = vsel %vm580_vm5, 1, %v8588_v43 }
  0x70   :  { %v459_v42 = vcvt.s32.f32 %v452_v7  ;;  %v456_v60 = vor.u32 4788187, %v455_v6  ;;  %v575_v37 = vshrl.u32 %v570_v63, 16  ;;  %v583_v2 = vadd.s32 %v581_v31, %v579_v12 }
  0x71   :  { %v650_v46 = vand.u32 2139095040, %v6149_v21  ;;  %vm6178_vm6 = vcmp.le.f32.partialorder %v339_v48, 0.7853982  ;;  %vm341_vm7 = vcmp.lt.s32.totalorder %v5901_v39, 0  ;;  %v6183_v16 = vadd.s32 %v562_v22, %v553_v10 }
  0x72   :  { %v457_v4 = vand.u32 2147483647, %v456_v60  ;;  %v6185_v47 = vadd.s32 %v578_v59, %v574_v18  ;;  %v316_v19 = vmul.f32 %v315_v8, %v6153_v41  ;;  %v532_v63 = vsel %vm526_vm12, %v529_v24, %v531_v30  ;;  %v6232_v24 = vld [vmem:[#allocation2 + $0x150] sm:$0xff] }
  0x73   :  { %v584_v20 = vadd.s32 %v583_v2, %v573_v26  ;;  %v323_v49 = vmul.f32 %v322_v28, %v6153_v41  ;;  %v651_v51 = vshrl.u32 %v650_v46, 23  ;;  %v132_v48 = vsel %vm129_vm0, %v130_v40, %v131_v57 }
  0x74   :  { %v460_v35 = vmul.f32 %v459_v42, %v457_v4  ;;  %v586_v32 = vmul.u32 %v6101_v33, %v532_v63  ;;  %vm588_vm8 = vc.u32 %v6183_v16, %v6185_v47  ;;  %v309_v56 = vsub.s32 4, %v6044_v5 }
  0x75   :  { %v585_v55 = vadd.s32 %v584_v20, %v575_v37  ;;  %v5610_v7 = vadd.s32 4294967169, %v651_v51  ;;  %v317_v25 = vadd.f32 -0.4999988, %v316_v19  ;;  %v463_v6 = vsub.s32 4, %v6089_v23 }
  0x76   :  { %v461_v34 = vxor.u32 2147483648, %v460_v35  ;;  %v324_v36 = vadd.f32 -0.16666654, %v323_v49  ;;  %v647_v33 = vand.u32 2147483647, %v6149_v21  ;;  %v6214_v60 = vadd.f32 %v132_v48, %v6204_v14 }
  0x77   :  { %v589_v18 = vadd.s32 1, %v585_v55  ;;  %v657_v42 = vadd.s32 1, %v5610_v7  ;;  %v310_v3 = vsel %vm187_vm14, %v309_v56, %v6044_v5  ;;  %v318_v59 = vmul.f32 %v317_v25, %v6153_v41 }
  0x78   :  { %v462_v52 = vsel %vm341_vm7, %v461_v34, %v460_v35  ;;  %v464_v8 = vsel %vm341_vm7, %v463_v6, %v6089_v23  ;;  %v325_v12 = vmul.f32 %v324_v36, %v6153_v41  ;;  %v6227_v26 = vsel %vm129_vm0, %v131_v57, %v130_v40  ;;  %v6246_v40 = vld [vmem:[#allocation2 + $0x158] sm:$0xff] }
  0x79   :  { %v6199_v53 = vsel %vm6178_vm6, %v5901_v39, %v462_v52  ;;  %v590_v58 = vsel %vm588_vm8, %v589_v18, %v585_v55  ;;  %vm658_vm9 = vcmp.gt.s32.totalorder %v657_v42, 0  ;;  %v654_v5 = vand.u32 8388607, %v647_v33 }
  0x7a   :  { %v6210_v45 = vmul.f32 %v6199_v53, %v6199_v53  ;;  %v591_v61 = vadd.s32 %v590_v58, %v586_v32  ;;  %v659_v10 = vsel %vm658_vm9, %v657_v42, 0  ;;  %v6236_v23 = vsel %vm6125_vm15, 0, %v310_v3 }
  0x7b   :  { %v661_v22 = vand.u32 31, %v659_v10  ;;  %v6240_v41 = vsel %vm6178_vm6, 0, %v464_v8  ;;  %v141_v57 = vsub.f32 %v6214_v60, %v5880_v0  ;;  %v6250_v35 = vadd.f32 1.0, %v318_v59  ;;  %v6448_v60 = vld [vmem:[#allocation2 + $0x68] sm:$0xff] }
  0x7c   :  { %v592_v4 = vadd.s32 536870912, %v591_v61  ;;  %v475_v28 = vmul.f32 -0.00019511016, %v6210_v45  ;;  %v6253_v37 = vand.u32 3, %v6236_v23  ;;  %v6256_v1 = vand.u32 3, %v6240_v41 }
  0x7d   :  { %v6244_v31 = vsub.s32 32, %v661_v22  ;;  %v326_v2 = vadd.f32 1.0, %v325_v12  ;;  %v468_v46 = vmul.f32 -0.001358992, %v6210_v45  ;;  %v1513_v19 = vrot.slane %v6232_v24, 1 }
  0x7e   :  { %v6242_v30 = vshrl.u32 %v592_v4, 30  ;;  %v476_v34 = vadd.f32 0.008332121, %v475_v28  ;;  %v655_v63 = vor.u32 8388608, %v654_v5  ;;  %v673_v20 = vshll.u32 %v8590_v15, %v661_v22 }
  0x7f   :  { %v1514_v49 = vrot.slane %v6246_v40, 1  ;;  %v664_v48 = vshll.u32 %v8594_v9, %v661_v22  ;;  %v665_v52 = vshrl.u32 %v8584_v11, %v6244_v31  ;;  %v674_v55 = vshrl.u32 %v8581_v17, %v6244_v31 }
  0x80   :  { %v594_v54 = vshll.u32 %v6242_v30, 30  ;;  %v667_v32 = vshll.u32 %v8584_v11, %v661_v22  ;;  %v668_v7 = vshrl.u32 %v8586_v13, %v6244_v31  ;;  %v670_v56 = vshll.u32 %v8586_v13, %v661_v22 }
  0x81   :  { %v671_v25 = vshrl.u32 %v8590_v15, %v6244_v31  ;;  %v469_v6 = vadd.f32 0.041655596, %v468_v46  ;;  %v6278_v36 = vshrl.u32 %v659_v10, 5  ;;  %v477_v42 = vmul.f32 %v476_v34, %v6210_v45 }
  0x82   :  { %v6263_v51 = vsub.s32 %v591_v61, %v594_v54  ;;  %v675_v58 = vor.u32 %v674_v55, %v673_v20  ;;  %v676_v61 = vshll.u32 %v8581_v17, %v661_v22  ;;  %v677_v3 = vshrl.u32 %v8579_v27, %v6244_v31  ;;  %v1502_v22 = vld [vmem:[#allocation2 + $0x50] sm:$0xff] }
  0x83   :  { %v666_v8 = vor.u32 %v665_v52, %v664_v48  ;;  %v6285_v12 = vshll.u32 %v655_v63, 8  ;;  %v1515_v10 = vsel %vm129_vm0, %v1513_v19, %v1514_v49  ;;  %v6292_v28 = vor.u32 %v668_v7, %v667_v32 }
  0x84   :  { %vm596_vm10 = vcmp.lt.s32.totalorder %v6263_v51, 0  ;;  %v597_v18 = vsub.s32 0, %v6263_v51  ;;  %v672_v5 = vor.u32 %v671_v25, %v670_v56  ;;  %v678_v46 = vor.u32 %v677_v3, %v676_v61  ;;  %v6320_v3 = vld [vmem:[#allocation2 + $0x60] sm:$0xff] }
  0x85   :  { %v470_v54 = vmul.f32 %v469_v6, %v6210_v45  ;;  %vm679_vm11 = vcmp.lt.s32.totalorder %v6278_v36, 1  ;;  %vm681_vm12 = vcmp.lt.s32.totalorder %v6278_v36, 3  ;;  %vm682_vm13 = vcmp.lt.s32.totalorder %v6278_v36, 4 }
  0x86   :  { %v598_v59 = vsel %vm596_vm10, %v597_v18, %v6263_v51  ;;  %v6299_v34 = vmul.f32 %v326_v2, %v6140_v44  ;;  %v478_v63 = vadd.f32 -0.16666654, %v477_v42  ;;  %v688_v48 = vsel %vm682_vm13, %v675_v58, 920167782 }
  0x87   :  { %v599_v4 = vclz %v598_v59  ;;  %v587_v52 = vadd.s32 %v6185_v47, %v6183_v16  ;;  %vm680_vm14 = vcmp.lt.s32.totalorder %v6278_v36, 2  ;;  %v696_v55 = vand.u32 65535, %v6285_v12 }
  0x88   :  { %v1520_v32 = vadd.f32 %v1515_v10, %v1502_v22  ;;  %v687_v7 = vsel %vm679_vm11, %v666_v8, %v6292_v28  ;;  %v689_v44 = vsel %vm681_vm12, %v672_v5, %v688_v48  ;;  %v692_v2 = vsel %vm682_vm13, %v678_v46, 1326507024 }
  0x89   :  { %v5608_v20 = vadd.s32 4294967294, %v599_v4  ;;  %v471_v56 = vadd.f32 -0.4999988, %v470_v54  ;;  %v691_v16 = vsel %vm679_vm11, %v6292_v28, %v672_v5  ;;  %v697_v47 = vshrl.u32 %v6285_v12, 16 }
  0x8a   :  { %v479_v6 = vmul.f32 %v478_v63, %v6210_v45  ;;  %v663_v59 = vshrl.u32 %v8594_v9, %v6244_v31  ;;  %v690_v10 = vsel %vm680_vm14, %v687_v7, %v689_v44  ;;  %v693_v4 = vsel %vm681_vm12, %v675_v58, %v692_v2 }
  0x8b   :  { %vm5609_vm15 = vcmp.lt.s32.totalorder %v5608_v20, 0  ;;  %v1524_v46 = vsub.f32 %v1520_v32, %v6320_v3  ;;  %v694_v63 = vsel %vm680_vm14, %v691_v16, %v693_v4  ;;  %vm495_vm1 = vcmp.lt.s32.totalorder %v5910_v50, 0 }
  0x8c   :  { %v602_v25 = vsel %vm5609_vm15, 0, %v5608_v20  ;;  %v6332_v20 = vmul.f32 %v471_v56, %v6210_v45  ;;  %v698_v31 = vand.u32 65535, %v694_v63  ;;  %v699_v48 = vshrl.u32 %v694_v63, 16 }
  0x8d   :  { %v603_v18 = vsub.s32 32, %v602_v25  ;;  %v604_v42 = vshll.u32 %v6263_v51, %v602_v25  ;;  %v607_v61 = vsub.s32 4294967266, %v602_v25  ;;  %v720_v51 = vand.u32 65535, %v690_v10 }
  0x8e   :  { %v721_v25 = vshrl.u32 %v690_v10, 16  ;;  %v480_v7 = vadd.f32 1.0, %v479_v6  ;;  %vm6337_vm2 = vcmp.le.f32.partialorder %v493_v29, 0.7853982  ;;  %v683_v2 = vsel %vm679_vm11, %v663_v59, %v666_v8 }
  0x8f   :  { %v605_v22 = vshrl.u32 %v587_v52, %v603_v18  ;;  %v608_v54 = vadd.s32 127, %v607_v61  ;;  %v724_v44 = vmul.u32 %v720_v51, %v697_v47  ;;  %v700_v45 = vmul.u32 %v698_v31, %v696_v55 }
  0x90   :  { %v701_v56 = vmul.u32 %v699_v48, %v696_v55  ;;  %v702_v16 = vmul.u32 %v698_v31, %v697_v47  ;;  %v722_v4 = vmul.u32 %v720_v51, %v696_v55  ;;  %v723_v10 = vmul.u32 %v721_v25, %v696_v55 }
  0x91   :  { %v606_v52 = vor.u32 %v605_v22, %v604_v42  ;;  %v609_v32 = vshll.u32 %v608_v54, 23  ;;  %v684_v6 = vsel %vm682_vm13, %v672_v5, 2102212464  ;;  %v703_v29 = vmul.u32 %v699_v48, %v697_v47 }
  0x92   :  { %v704_v63 = vshll.u32 %v701_v56, 16  ;;  %v706_v27 = vshll.u32 %v702_v16, 16  ;;  %vm334_vm3 = vcmp.eq.s32.totalorder %v6253_v37, 2  ;;  %v725_v22 = vmul.u32 %v721_v25, %v697_v47 }
  0x93   :  { %v610_v18 = vor.u32 4788187, %v609_v32  ;;  %v613_v61 = vcvt.s32.f32 %v606_v52  ;;  %v726_v54 = vshll.u32 %v723_v10, 16  ;;  %v728_v17 = vshll.u32 %v724_v44, 16 }
  0x94   :  { %v705_v8 = vshrl.u32 %v701_v56, 16  ;;  %vm708_vm4 = vc.u32 %v700_v45, %v704_v63  ;;  %v710_v59 = vadd.s32 %v704_v63, %v700_v45  ;;  %v727_v31 = vshrl.u32 %v723_v10, 16 }
  0x95   :  { %v611_v42 = vand.u32 2147483647, %v610_v18  ;;  %vm331_vm5 = vcmp.eq.s32.totalorder %v6253_v37, 0  ;;  %v709_v55 = vsel %vm708_vm4, 1, %v8588_v43  ;;  %vm730_vm6 = vc.u32 %v722_v4, %v726_v54 }
  0x96   :  { %v732_v5 = vadd.s32 %v726_v54, %v722_v4  ;;  %v711_v48 = vadd.s32 %v709_v55, %v703_v29  ;;  %vm712_vm7 = vc.u32 %v710_v59, %v706_v27  ;;  %v731_v52 = vsel %vm730_vm6, 1, %v8588_v43 }
  0x97   :  { %v614_v51 = vmul.f32 %v613_v61, %v611_v42  ;;  %v6350_v32 = vsub.f32 %v1524_v46, %v6232_v24  ;;  %v713_v25 = vsel %vm712_vm7, 1, %v8588_v43  ;;  %v733_v56 = vadd.s32 %v731_v52, %v725_v22 }
  0x98   :  { %vm734_vm8 = vc.u32 %v732_v5, %v728_v17  ;;  %v685_v45 = vsel %vm681_vm12, %v6292_v28, %v684_v6  ;;  %v707_v18 = vshrl.u32 %v702_v16, 16  ;;  %v715_v61 = vadd.s32 %v713_v25, %v711_v48 }
  0x99   :  { %v615_v47 = vxor.u32 2147483648, %v614_v51  ;;  %v735_v4 = vsel %vm734_vm8, 1, %v8588_v43  ;;  %vm330_vm9 = vcmp.lt.s32.totalorder %v6253_v37, 2  ;;  %v8598_v27 = vxor.u32 2147483648, %v6250_v35 }
  0x9a   :  { %vm485_vm10 = vcmp.eq.s32.totalorder %v6256_v1, 0  ;;  %vm488_vm11 = vcmp.eq.s32.totalorder %v6256_v1, 2  ;;  %v729_v10 = vshrl.u32 %v724_v44, 16  ;;  %v737_v29 = vadd.s32 %v735_v4, %v733_v56 }
  0x9b   :  { %v616_v46 = vsel %vm495_vm1, %v615_v47, %v614_v51  ;;  %v716_v16 = vadd.s32 %v715_v61, %v705_v8  ;;  %v6368_v6 = vadd.s32 %v732_v5, %v728_v17  ;;  %v1551_v63 = vand.u32 2139095040, %v6350_v32 }
  0x9c   :  { %v6366_v28 = vsel %vm6337_vm2, %v5910_v50, %v616_v46  ;;  %v8599_v42 = vxor.u32 2147483648, %v6299_v34  ;;  %v686_v54 = vsel %vm680_vm14, %v683_v2, %v685_v45  ;;  %v738_v44 = vadd.s32 %v737_v29, %v727_v31  ;;  %v1503_v29 = vld [vmem:[#allocation2 + $0x58] sm:$0xff] }
  0x9d   :  { %v621_v22 = vmul.f32 %v6366_v28, %v6366_v28  ;;  %v6377_v59 = vadd.f32 1.0, %v6332_v20  ;;  %v6380_v51 = vmul.f32 %v480_v7, %v6199_v53  ;;  %v6382_v8 = vadd.s32 %v716_v16, %v707_v18 }
  0x9e   :  { %v1552_v17 = vshrl.u32 %v1551_v63, 23  ;;  %vm328_vm12 = vweird.f32 %v5899_v38  ;;  %v739_v48 = vadd.s32 %v738_v44, %v729_v10  ;;  %v8583_v52 = vand.u32 2147483647, %v6350_v32 }
  0x9f   :  { %v622_v55 = vmul.f32 -0.001358992, %v621_v22  ;;  %v629_v5 = vmul.f32 -0.00019511016, %v621_v22  ;;  %v336_v36 = vsel %vm334_vm3, %v8598_v27, %v6299_v34  ;;  %v740_v20 = vmul.u32 %v6285_v12, %v686_v54 }
  0xa0   :  { %vm742_vm13 = vc.u32 %v6382_v8, %v6368_v6  ;;  %v5627_v53 = vadd.s32 4294967169, %v1552_v17  ;;  %v617_v7 = vsub.s32 4, %v6242_v30  ;;  %v743_v47 = vadd.s32 1, %v739_v48 }
  0xa1   :  { %v623_v2 = vadd.f32 0.041655596, %v622_v55  ;;  %v630_v31 = vadd.f32 0.008332121, %v629_v5  ;;  %v333_v25 = vsel %vm331_vm5, %v6250_v35, %v8599_v42  ;;  %v8593_v56 = vxor.u32 2147483648, %v6380_v51 }
  0xa2   :  { %v8592_v45 = vxor.u32 2147483648, %v6377_v59  ;;  %v1558_v12 = vadd.s32 1, %v5627_v53  ;;  %v744_v4 = vsel %vm742_vm13, %v743_v47, %v739_v48  ;;  %v1555_v46 = vand.u32 8388607, %v8583_v52 }
  0xa3   :  { %v624_v18 = vmul.f32 %v623_v2, %v621_v22  ;;  %v631_v61 = vmul.f32 %v630_v31, %v621_v22  ;;  %vm484_vm14 = vcmp.lt.s32.totalorder %v6256_v1, 2  ;;  %v745_v10 = vadd.s32 %v744_v4, %v740_v20  ;;  %v6427_v20 = vld [vmem:[#allocation2 + $0x160] sm:$0xff]  ;;  %v6437_v2 = vld [vmem:[#allocation2 + $0x168] sm:$0xff] }
  0xa4   :  { %v1519_v16 = vsel %vm129_vm0, %v1514_v49, %v1513_v19  ;;  %vm1559_vm15 = vcmp.gt.s32.totalorder %v1558_v12, 0  ;;  %v618_v63 = vsel %vm495_vm1, %v617_v7, %v6242_v30  ;;  %v337_v55 = vsel %vm330_vm9, %v333_v25, %v336_v36 }
  0xa5   :  { %v625_v54 = vadd.f32 -0.4999988, %v624_v18  ;;  %v632_v44 = vadd.f32 -0.16666654, %v631_v61  ;;  %v1560_v17 = vsel %vm1559_vm15, %v1558_v12, 0  ;;  %v487_v24 = vsel %vm485_vm10, %v6377_v59, %v8593_v56 }
  0xa6   :  { %v490_v19 = vsel %vm488_vm11, %v8592_v45, %v6380_v51  ;;  %v746_v49 = vadd.s32 536870912, %v745_v10  ;;  %v6425_v48 = vadd.f32 %v1519_v16, %v1503_v29  ;;  %v1556_v37 = vor.u32 8388608, %v1555_v46 }
  0xa7   :  { %v626_v30 = vmul.f32 %v625_v54, %v621_v22  ;;  %v633_v5 = vmul.f32 %v632_v44, %v621_v22  ;;  %v6433_v36 = vsub.f32 %v141_v57, %v6135_v62  ;;  %v620_v53 = vsel %vm6337_vm2, 0, %v618_v63 }
  0xa8   :  { %v747_v7 = vshrl.u32 %v746_v49, 30  ;;  %v1562_v31 = vand.u32 31, %v1560_v17  ;;  %vm482_vm1 = vweird.f32 %v5901_v39  ;;  %v491_v22 = vsel %vm484_vm14, %v487_v24, %v490_v19 }
  0xa9   :  { %v634_v47 = vadd.f32 1.0, %v633_v5  ;;  %v637_v25 = vand.u32 3, %v620_v53  ;;  %v6444_v12 = vsel %vm328_vm12, nan, %v337_v55  ;;  %v6446_v0 = vadd.f32 1.0, %v626_v30 }
  0xaa   :  { %v748_v62 = vshll.u32 %v747_v7, 30  ;;  %v6457_v61 = vshll.u32 %v1556_v37, 8  ;;  %v6461_v4 = vsel %vm482_vm1, nan, %v491_v22  ;;  %vm6465_vm2 = vcmp.le.f32.partialorder %v647_v33, 0.7853982 }
  0xab   :  { %v6452_v58 = vmul.f32 %v634_v47, %v6366_v28  ;;  %v1563_v28 = vsub.s32 32, %v1562_v31  ;;  %vm636_vm3 = vweird.f32 %v5910_v50  ;;  %vm638_vm4 = vcmp.lt.s32.totalorder %v637_v25, 2 }
  0xac   :  { %v6469_v29 = vsub.s32 %v745_v10, %v748_v62  ;;  %vm639_vm5 = vcmp.eq.s32.totalorder %v637_v25, 0  ;;  %vm649_vm6 = vcmp.lt.s32.totalorder %v6149_v21, 0  ;;  %v771_v16 = vsub.s32 4, %v747_v7 }
  0xad   :  { %v8597_v63 = vxor.u32 2147483648, %v6452_v58  ;;  %v8596_v54 = vxor.u32 2147483648, %v6446_v0  ;;  %vm642_vm8 = vcmp.eq.s32.totalorder %v637_v25, 2  ;;  %v741_v10 = vadd.s32 %v6368_v6, %v6382_v8 }
  0xae   :  { %vm750_vm7 = vcmp.lt.s32.totalorder %v6469_v29, 0  ;;  %v751_v33 = vsub.s32 0, %v6469_v29  ;;  %v1565_v44 = vshll.u32 %v8594_v9, %v1562_v31  ;;  %v6481_v55 = vand.u32 65535, %v6457_v61 }
  0xaf   :  { %v1566_v19 = vshrl.u32 %v8584_v11, %v1563_v28  ;;  %v1568_v49 = vshll.u32 %v8584_v11, %v1562_v31  ;;  %v1571_v30 = vshll.u32 %v8586_v13, %v1562_v31  ;;  %v772_v37 = vsel %vm649_vm6, %v771_v16, %v747_v7 }
  0xb0   :  { %v752_v24 = vsel %vm750_vm7, %v751_v33, %v6469_v29  ;;  %v1569_v22 = vshrl.u32 %v8586_v13, %v1563_v28  ;;  %v1572_v6 = vshrl.u32 %v8590_v15, %v1563_v28  ;;  %v641_v8 = vsel %vm639_vm5, %v6446_v0, %v8597_v63 }
  0xb1   :  { %v753_v5 = vclz %v752_v24  ;;  %v644_v47 = vsel %vm642_vm8, %v8596_v54, %v6452_v58  ;;  %v1574_v62 = vshll.u32 %v8590_v15, %v1562_v31  ;;  %v8636_v33 = vmov 920167782  }
  0xb2   :  { %v1575_v24 = vshrl.u32 %v8636_v33, %v1563_v28  ;;  %v6500_v11 = vshrl.u32 %v1560_v17, 5  ;;  %v1564_v7 = vshrl.u32 %v8594_v9, %v1563_v28  ;;  %v6504_v16 = vshrl.u32 %v6457_v61, 16 }
  0xb3   :  { %v5611_v52 = vadd.s32 4294967294, %v753_v5  ;;  %v6508_v13 = vsel %vm6465_vm2, 0, %v772_v37  ;;  %v949_v57 = vadd.s32 3, %v6236_v23  ;;  %v1259_v18 = vadd.s32 3, %v620_v53 }
  0xb4   :  { %v1567_v43 = vor.u32 %v1566_v19, %v1565_v44  ;;  %v645_v15 = vsel %vm638_vm4, %v641_v8, %v644_v47  ;;  %v1570_v1 = vor.u32 %v1569_v22, %v1568_v49  ;;  %v1573_v5 = vor.u32 %v1572_v6, %v1571_v30 }
  0xb5   :  { %vm5612_vm9 = vcmp.lt.s32.totalorder %v5611_v52, 0  ;;  %v950_v45 = vand.u32 3, %v949_v57  ;;  %v1576_v56 = vor.u32 %v1575_v24, %v1574_v62  ;;  %v1577_v9 = vshll.u32 %v8636_v33, %v1562_v31 }
  0xb6   :  { %v756_v17 = vsel %vm5612_vm9, 0, %v5611_v52  ;;  %v8637_v37 = vmov 1326507024   ;;  %v646_v23 = vsel %vm636_vm3, nan, %v645_v15  ;;  %v1260_v53 = vand.u32 3, %v1259_v18 }
  0xb7   :  { %v757_v54 = vsub.s32 32, %v756_v17  ;;  %v758_v63 = vshll.u32 %v6469_v29, %v756_v17  ;;  %v761_v27 = vsub.s32 4294967266, %v756_v17  ;;  %v1578_v42 = vshrl.u32 %v8637_v37, %v1563_v28 }
  0xb8   :  { %vm952_vm10 = vcmp.eq.s32.totalorder %v950_v45, 0  ;;  %vm955_vm11 = vcmp.eq.s32.totalorder %v950_v45, 2  ;;  %vm951_vm13 = vcmp.lt.s32.totalorder %v950_v45, 2  ;;  %v8638_v57 = vxor.u32 2147483648, %v6299_v34 }
  0xb9   :  { %v759_v25 = vshrl.u32 %v741_v10, %v757_v54  ;;  %v762_v52 = vadd.s32 127, %v761_v27  ;;  %v8639_v29 = vxor.u32 2147483648, %v6250_v35  ;;  %v1104_v15 = vadd.s32 3, %v6240_v41 }
  0xba   :  { %v954_v31 = vsel %vm952_vm10, %v6250_v35, %v8638_v57  ;;  %vm1580_vm14 = vcmp.lt.s32.totalorder %v6500_v11, 1  ;;  %vm1581_vm15 = vcmp.lt.s32.totalorder %v6500_v11, 2  ;;  %vm1582_vm4 = vcmp.lt.s32.totalorder %v6500_v11, 3 }
  0xbb   :  { %v957_v28 = vsel %vm955_vm11, %v8639_v29, %v6299_v34  ;;  %v760_v27 = vor.u32 %v759_v25, %v758_v63  ;;  %v763_v45 = vshll.u32 %v762_v52, 23  ;;  %vm1583_vm5 = vcmp.lt.s32.totalorder %v6500_v11, 4 }
  0xbc   :  { %v801_v18 = vadd.f32 %v646_v23, %v6444_v12  ;;  %v958_v35 = vsel %vm951_vm13, %v954_v31, %v957_v28  ;;  %v1579_v34 = vor.u32 %v1578_v42, %v1577_v9  ;;  %v6539_v41 = vsel %vm1580_vm14, %v1564_v7, %v1567_v43 }
  0xbd   :  { %v764_v54 = vor.u32 4788187, %v763_v45  ;;  %v767_v10 = vcvt.s32.f32 %v760_v27  ;;  %vm1261_vm7 = vcmp.lt.s32.totalorder %v1260_v53, 2  ;;  %v1585_v63 = vsel %vm1583_vm5, %v1573_v5, 2102212464 }
  0xbe   :  { %v1105_v44 = vand.u32 3, %v1104_v15  ;;  %vm1262_vm8 = vcmp.eq.s32.totalorder %v1260_v53, 0  ;;  %vm1265_vm9 = vcmp.eq.s32.totalorder %v1260_v53, 2  ;;  %v1589_v19 = vsel %vm1583_vm5, %v1576_v56, 920167782 }
  0xbf   :  { %v765_v9 = vand.u32 2147483647, %v764_v54  ;;  %v959_v42 = vsel %vm328_vm12, nan, %v958_v35  ;;  %v8640_v12 = vxor.u32 2147483648, %v6452_v58  ;;  %v8641_v30 = vxor.u32 2147483648, %v6446_v0 }
  0xc0   :  { %v803_v6 = vmul.f32 0.5, %v801_v18  ;;  %v1586_v47 = vsel %vm1582_vm4, %v1570_v1, %v1585_v63  ;;  %v1588_v62 = vsel %vm1580_vm14, %v1567_v43, %v1570_v1  ;;  %v6562_v7 = vstv %s6517_s0 }
  0xc1   :  { %v1264_v49 = vsel %vm1262_vm8, %v6446_v0, %v8640_v12  ;;  %v1267_v22 = vsel %vm1265_vm9, %v8641_v30, %v6452_v58  ;;  %v768_v24 = vmul.f32 %v767_v10, %v765_v9  ;;  %v1590_v17 = vsel %vm1582_vm4, %v1573_v5, %v1589_v19 }
  0xc2   :  { %v1268_v8 = vsel %vm1261_vm7, %v1264_v49, %v1267_v22  ;;  %vm1107_vm12 = vcmp.eq.s32.totalorder %v1105_v44, 0  ;;  %vm1110_vm10 = vcmp.eq.s32.totalorder %v1105_v44, 2  ;;  %v1593_v58 = vsel %vm1583_vm5, %v1579_v34, 1326507024 }
  0xc3   :  { %v1269_v38 = vsel %vm636_vm3, nan, %v1268_v8  ;;  %v769_v23 = vxor.u32 2147483648, %v768_v24  ;;  %v6569_v53 = vstv %s6522_s1  ;;  %v1592_v43 = vsel %vm1580_vm14, %v1570_v1, %v1573_v5 }
  0xc4   :  { %v1425_v0 = vadd.f32 %v1269_v38, %v959_v42  ;;  %8642 = vst [vmem:[#allocation14_spill] sm:$0xff] %v6569_v53  ;;  %v1594_v50 = vsel %vm1582_vm4, %v1576_v56, %v1593_v58  ;;  %vm1106_vm3 = vcmp.lt.s32.totalorder %v1105_v44, 2  ;;  %v1414_v25 = vadd.s32 3, %v6508_v13 }
  0xc5   :  { %v1430_v57 = vmul.f32 %v6562_v7, %v803_v6  ;;  %v770_v31 = vsel %vm649_vm6, %v769_v23, %v768_v24  ;;  %v8643_v29 = vxor.u32 2147483648, %v6380_v51  ;;  %v8644_v1 = vxor.u32 2147483648, %v6377_v59 }
  0xc6   :  { %v1427_v52 = vmul.f32 0.5, %v1425_v0  ;;  %v6587_v56 = vsel %vm1581_vm15, %v1588_v62, %v1590_v17  ;;  %v6594_v15 = vsel %vm6465_vm2, %v6149_v21, %v770_v31  ;;  %v6597_v27 = vand.u32 3, %v6508_v13 }
  0xc7   :  { %v1109_v28 = vsel %vm1107_vm12, %v6377_v59, %v8643_v29  ;;  %v1112_v5 = vsel %vm1110_vm10, %v8644_v1, %v6380_v51  ;;  %v1595_v59 = vsel %vm1581_vm15, %v1592_v43, %v1594_v50  ;;  %v775_v51 = vmul.f32 %v6594_v15, %v6594_v15 }
  0xc8   :  { %v1433_v45 = vmul.f32 %v6569_v53, %v1427_v52  ;;  %v6605_v18 = vstv %s6545_s25  ;;  %v6608_v35 = vstv %s6530_s23  ;;  %v6611_v34 = vstv %s6534_s24 }
  0xc9   :  { %8645 = vst [vmem:[#allocation15_spill] sm:$0xff] %v6605_v18  ;;  %v1113_v46 = vsel %vm1106_vm3, %v1109_v28, %v1112_v5  ;;  %v1599_v10 = vand.u32 65535, %v1595_v59  ;;  %v1622_v13 = vshrl.u32 %v6587_v56, 16  ;;  %v776_v63 = vmul.f32 -0.001358992, %v775_v51 }
  0xca   :  { %8646 = vst [vmem:[#allocation16_spill] sm:$0xff] %v6608_v35  ;;  %v1435_v54 = vadd.f32 %v1433_v45, %v1430_v57  ;;  %v783_v19 = vmul.f32 -0.00019511016, %v775_v51  ;;  %v6615_v9 = vand.u32 3, %v1414_v25  ;;  %v1600_v42 = vshrl.u32 %v1595_v59, 16 }
  0xcb   :  { %8647 = vst [vmem:[#allocation17_spill] sm:$0xff] %v6611_v34  ;;  %v1441_v49 = vmul.f32 %v6608_v35, %v803_v6  ;;  %v1444_v30 = vmul.f32 %v6611_v34, %v1427_v52  ;;  %v1621_v22 = vand.u32 65535, %v6587_v56  ;;  %v777_v44 = vadd.f32 0.041655596, %v776_v63 }
  0xcc   :  { %v6618_v12 = vadd.f32 %v6605_v18, %v1435_v54  ;;  %v784_v8 = vadd.f32 0.008332121, %v783_v19  ;;  %v8648_v62 = vsub.f32 %v6425_v48, %v6448_v60  ;;  %v6632_v38 = vsel %vm1581_vm15, %v6539_v41, %v1586_v47 }
  0xcd   :  { %vm796_vm2 = vcmp.eq.s32.totalorder %v6597_v27, 2  ;;  %v6637_v6 = vsel %vm482_vm1, nan, %v1113_v46  ;;  %v1601_v0 = vmul.u32 %v1599_v10, %v6481_v55  ;;  %v6642_v58 = vmul.u32 %v1622_v13, %v6481_v55 }
  0xce   :  { %v6627_v24 = vsub.f32 %v8648_v62, %v6246_v40  ;;  %v1451_v17 = vmul.f32 1.442695, %v6618_v12  ;;  %v778_v40 = vmul.f32 %v777_v44, %v775_v51  ;;  %v785_v48 = vmul.f32 %v784_v8, %v775_v51 }
  0xcf   :  { %v1602_v23 = vmul.u32 %v1600_v42, %v6481_v55  ;;  %v6646_v11 = vmul.u32 %v1599_v10, %v6504_v16  ;;  %vm793_vm6 = vcmp.eq.s32.totalorder %v6597_v27, 0  ;;  %vm1417_vm11 = vcmp.eq.s32.totalorder %v6615_v9, 0 }
  0xd0   :  { %v1446_v39 = vadd.f32 %v1444_v30, %v1441_v49  ;;  %v6651_v41 = vstv %s6589_s26  ;;  %5718 = vpow2.f32 %v1451_v17  ;;  %v6654_v47 = vmul.u32 %v1621_v22, %v6504_v16 }
  0xd1   :  { %8649 = vst [vmem:[#allocation18_spill] sm:$0xff] %v6651_v41  ;;  %v779_v43 = vadd.f32 -0.4999988, %v778_v40  ;;  %v786_v50 = vadd.f32 -0.16666654, %v785_v48  ;;  %vm792_vm1 = vcmp.lt.s32.totalorder %v6597_v27, 2  ;;  %v1604_v25 = vmul.u32 %v1600_v42, %v6504_v16 }
  0xd2   :  { %vm1416_vm13 = vcmp.lt.s32.totalorder %v6615_v9, 2  ;;  %v1605_v52 = vshll.u32 %v1602_v23, 16  ;;  %vm790_vm14 = vweird.f32 %v6149_v21  ;;  %vm1420_vm15 = vcmp.eq.s32.totalorder %v6615_v9, 2 }
  0xd3   :  { %v1607_v57 = vshll.u32 %v6646_v11, 16  ;;  %v1623_v31 = vmul.u32 %v1621_v22, %v6481_v55  ;;  %v1627_v29 = vshll.u32 %v6642_v58, 16  ;;  %v780_v28 = vmul.f32 %v779_v43, %v775_v51 }
  0xd4   :  { %v787_v1 = vmul.f32 %v786_v50, %v775_v51  ;;  %vm1609_vm4 = vc.u32 %v1601_v0, %v1605_v52  ;;  %v1611_v5 = vadd.s32 %v1605_v52, %v1601_v0  ;;  %v1449_v56 = vadd.f32 %v6651_v41, %v1446_v39 }
  0xd5   :  { %v1606_v45 = vshrl.u32 %v1602_v23, 16  ;;  %v8650_v59 = vmov 0   ;;  %v1629_v54 = vshll.u32 %v6654_v47, 16  ;;  %v781_v10 = vadd.f32 1.0, %v780_v28  ;;  %v6692_v28 = vld [vmem:[#allocation2 + $0x8] sm:$0xff] }
  0xd6   :  { %v1610_v46 = vsel %vm1609_vm4, 1, %v8650_v59  ;;  %v788_v63 = vadd.f32 1.0, %v787_v1  ;;  %vm1613_vm5 = vc.u32 %v1611_v5, %v1607_v57  ;;  %v5719_v42 = vpop.eup %5718  ;;  %v1626_v49 = vmul.u32 %v1622_v13, %v6504_v16 }
  0xd7   :  { %v1612_v19 = vadd.s32 %v1610_v46, %v1604_v25  ;;  %v1614_v55 = vsel %vm1613_vm5, 1, %v8650_v59  ;;  %vm1631_vm7 = vc.u32 %v1623_v31, %v1627_v29  ;;  %v1633_v51 = vadd.s32 %v1627_v29, %v1623_v31 }
  0xd8   :  { %v789_v30 = vmul.f32 %v788_v63, %v6594_v15  ;;  %v797_v22 = vxor.u32 2147483648, %v781_v10  ;;  %v1455_v44 = vmul.f32 %v5719_v42, %v6433_v36  ;;  %v1608_v62 = vshrl.u32 %v6646_v11, 16 }
  0xd9   :  { %v1616_v8 = vadd.s32 %v1614_v55, %v1612_v19  ;;  %v1628_v17 = vshrl.u32 %v6642_v58, 16  ;;  %v1632_v0 = vsel %vm1631_vm7, 1, %v8650_v59  ;;  %vm1635_vm8 = vc.u32 %v1633_v51, %v1629_v54 }
  0xda   :  { %v794_v40 = vxor.u32 2147483648, %v789_v30  ;;  %v798_v48 = vsel %vm796_vm2, %v797_v22, %v789_v30  ;;  %v1422_v16 = vsel %vm1420_vm15, %v797_v22, %v789_v30  ;;  %v1457_v13 = vadd.f32 %v1455_v44, %v1449_v56 }
  0xdb   :  { %v1617_v15 = vadd.s32 %v1616_v8, %v1606_v45  ;;  %v1634_v23 = vadd.s32 %v1632_v0, %v1626_v49  ;;  %v1636_v39 = vsel %vm1635_vm8, 1, %v8650_v59  ;;  %v1705_v43 = vand.u32 2139095040, %v6627_v24  ;;  %v5734_v8 = vld [vmem:[#allocation7 + $0x18] sm:$0xff] }
  0xdc   :  { %v795_v58 = vsel %vm793_vm6, %v781_v10, %v794_v40  ;;  %v1419_v11 = vsel %vm1417_vm11, %v781_v10, %v794_v40  ;;  %v1459_v50 = vsub.f32 %v1457_v13, %v6433_v36  ;;  %v1630_v25 = vshrl.u32 %v6654_v47, 16 }
  0xdd   :  { %v799_v52 = vsel %vm792_vm1, %v795_v58, %v798_v48  ;;  %v1423_v57 = vsel %vm1416_vm13, %v1419_v11, %v1422_v16  ;;  %v6690_v31 = vadd.s32 %v1633_v51, %v1629_v54  ;;  %v1638_v29 = vadd.s32 %v1636_v39, %v1634_v23 }
  0xde   :  { %v800_v1 = vsel %vm790_vm14, nan, %v799_v52  ;;  %v1424_v5 = vsel %vm790_vm14, nan, %v1423_v57  ;;  %v1461_v36 = vadd.f32 %v1459_v50, %v6204_v14  ;;  %v1706_v47 = vshrl.u32 %v1705_v43, 23 }
  0xdf   :  { %v802_v27 = vadd.f32 %v800_v1, %v6461_v4  ;;  %v1426_v56 = vadd.f32 %v1424_v5, %v6637_v6  ;;  %v6701_v9 = vadd.s32 %v1617_v15, %v1608_v62  ;;  %v1639_v45 = vadd.s32 %v1638_v29, %v1628_v17  ;;  %v1542_v1 = vld [vmem:[#allocation2 + $0x70] sm:$0xff] }
  0xe0   :  { %v1463_v46 = vadd.f32 3.1415927, %v1461_v36  ;;  %v5630_v54 = vadd.s32 4294967169, %v1706_v47  ;;  %v138_v10 = vadd.f32 %v6227_v26, %v6692_v28  ;;  %v8651_v55 = vrot.slane %v6437_v2, 1 }
  0xe1   :  { %v804_v63 = vmul.f32 0.5, %v802_v27  ;;  %v1428_v19 = vmul.f32 0.5, %v1426_v56  ;;  %v1640_v42 = vadd.s32 %v1639_v45, %v1630_v25  ;;  %v8652_v14 = vrot.slane %v6427_v20, 1 }
  0xe2   :  { %v1465_v21 = vmul.f32 0.15915494, %v1463_v46  ;;  %v1641_v6 = vmul.u32 %v6457_v61, %v6632_v38  ;;  %v1712_v49 = vadd.s32 1, %v5630_v54  ;;  %vm1643_vm9 = vc.u32 %v6701_v9, %v6690_v31 }
  0xe3   :  { %v1535_v4 = vsel %vm129_vm0, %v8652_v14, %v8651_v55  ;;  %v1431_v51 = vmul.f32 %v6562_v7, %v804_v63  ;;  %v1434_v30 = vmul.f32 %v6569_v53, %v1428_v19  ;;  %v8601_v26 = vand.u32 2147483647, %v6627_v24 }
  0xe4   :  { %v1467_v22 = vfloor.f32 %v1465_v21  ;;  %v1644_v44 = vadd.s32 1, %v1640_v42  ;;  %vm1713_vm12 = vcmp.gt.s32.totalorder %v1712_v49, 0  ;;  %v142_v62 = vsub.f32 %v138_v10, %v5734_v8 }
  0xe5   :  { %v1436_v17 = vadd.f32 %v1434_v30, %v1431_v51  ;;  %v1714_v0 = vsel %vm1713_vm12, %v1712_v49, 0  ;;  %v1540_v61 = vadd.f32 %v1535_v4, %v6320_v3  ;;  %v1442_v13 = vmul.f32 %v6608_v35, %v804_v63 }
  0xe6   :  { %v1469_v40 = vmul.f32 6.2831855, %v1467_v22  ;;  %v1645_v38 = vsel %vm1643_vm9, %v1644_v44, %v1640_v42  ;;  %v1716_v48 = vand.u32 31, %v1714_v0  ;;  %v1709_v23 = vand.u32 8388607, %v8601_v26  ;;  %v5735_v42 = vld [vmem:[#allocation2 + $0x108] sm:$0xff] }
  0xe7   :  { %v1439_v16 = vadd.f32 %v6605_v18, %v1436_v17  ;;  %v1646_v15 = vadd.s32 %v1645_v38, %v1641_v6  ;;  %v1445_v39 = vmul.f32 %v6611_v34, %v1428_v19  ;;  %v6723_v58 = vshrl.u32 %v1714_v0, 5 }
  0xe8   :  { %v1471_v43 = vsub.f32 %v1463_v46, %v1469_v40  ;;  %v6725_v11 = vsub.s32 32, %v1716_v48  ;;  %v8653_v52 = vmov 683565275   ;;  %v8654_v5 = vmov 2475754826  }
  0xe9   :  { %v1453_v50 = vmul.f32 1.442695, %v1439_v16  ;;  %v6728_v3 = vadd.f32 %v1439_v16, %v6618_v12  ;;  %v1647_v25 = vadd.s32 536870912, %v1646_v15  ;;  %v1719_v57 = vshll.u32 %v8653_v52, %v1716_v48 }
  0xea   :  { %v5625_v29 = vadd.f32 -3.1415927, %v1471_v43  ;;  %v1720_v36 = vshrl.u32 %v8654_v5, %v6725_v11  ;;  %v1722_v47 = vshll.u32 %v8654_v5, %v1716_v48  ;;  %v8655_v27 = vmov 2131351028  }
  0xeb   :  { %v1723_v56 = vshrl.u32 %v8655_v27, %v6725_v11  ;;  %5720 = vpow2.f32 %v1453_v50  ;;  %v6736_v45 = vshrl.u32 %v1647_v25, 30  ;;  %v1725_v46 = vshll.u32 %v8655_v27, %v1716_v48 }
  0xec   :  { %v8656_v12 = vmov 2102212464   ;;  %v1447_v10 = vadd.f32 %v1445_v39, %v1442_v13  ;;  %1475 = vst [vmem:[#allocation7] sm:$0xff] %v5625_v29  ;;  %v1729_v19 = vshrl.u32 %v8636_v33, %v6725_v11  ;;  %v144_v21 = vsub.f32 %v142_v62, %v5735_v42 }
  0xed   :  { %v1726_v54 = vshrl.u32 %v8656_v12, %v6725_v11  ;;  %v1728_v63 = vshll.u32 %v8656_v12, %v1716_v48  ;;  %v1544_v55 = vsub.f32 %v1540_v61, %v1542_v1  ;;  %v1649_v14 = vshll.u32 %v6736_v45, 30 }
  0xee   :  { %v6745_v4 = vor.u32 %v1720_v36, %v1719_v57  ;;  %v6747_v6 = vor.u32 %v1723_v56, %v1722_v47  ;;  %v1731_v51 = vshll.u32 %v8636_v33, %v1716_v48  ;;  %v1732_v30 = vshrl.u32 %v8637_v37, %v6725_v11 }
  0xef   :  { %v1730_v49 = vor.u32 %v1729_v19, %v1728_v63  ;;  %v1650_v22 = vsub.s32 %v1646_v15, %v1649_v14  ;;  %v1710_v44 = vor.u32 8388608, %v1709_v23  ;;  %v1727_v8 = vor.u32 %v1726_v54, %v1725_v46 }
  0xf0   :  { %vm1734_vm10 = vcmp.lt.s32.totalorder %v6723_v58, 1  ;;  %v1450_v62 = vadd.f32 %v6651_v41, %v1447_v10  ;;  %vm1736_vm3 = vcmp.lt.s32.totalorder %v6723_v58, 3  ;;  %vm1737_vm2 = vcmp.lt.s32.totalorder %v6723_v58, 4 }
  0xf1   :  { %v5721_v17 = vpop.eup %5720  ;;  %vm1651_vm6 = vcmp.lt.s32.totalorder %v1650_v22, 0  ;;  %v1652_v0 = vsub.s32 0, %v1650_v22  ;;  %vm1735_vm11 = vcmp.lt.s32.totalorder %v6723_v58, 2  ;;  %v1733_v61 = vor.u32 %v1732_v30, %v1731_v51 }
  0xf2   :  { %v1456_v40 = vmul.f32 %v5721_v17, %v144_v21  ;;  %v1742_v38 = vsel %vm1734_vm10, %v6745_v4, %v6747_v6  ;;  %v1743_v48 = vsel %vm1737_vm2, %v1730_v49, 920167782  ;;  %v6764_v16 = vsub.f32 %v1544_v55, %v6427_v20 }
  0xf3   :  { %v1653_v13 = vsel %vm1651_vm6, %v1652_v0, %v1650_v22  ;;  %v1744_v15 = vsel %vm1736_vm3, %v1727_v8, %v1743_v48  ;;  %v6768_v23 = vshll.u32 %v1710_v44, 8  ;;  %v1746_v29 = vsel %vm1734_vm10, %v6747_v6, %v1727_v8 }
  0xf4   :  { %v1458_v39 = vadd.f32 %v1456_v40, %v1450_v62  ;;  %v1654_v43 = vclz %v1653_v13  ;;  %v1745_v50 = vsel %vm1735_vm11, %v1742_v38, %v1744_v15  ;;  %v1747_v1 = vsel %vm1737_vm2, %v1733_v61, 1326507024 }
  0xf5   :  { %v1748_v36 = vsel %vm1736_vm3, %v1730_v49, %v1747_v1  ;;  %v1751_v47 = vand.u32 65535, %v6768_v23  ;;  %v1776_v56 = vshrl.u32 %v1745_v50, 16  ;;  %v1859_v46 = vand.u32 2139095040, %v6764_v16 }
  0xf6   :  { %v1460_v25 = vsub.f32 %v1458_v39, %v144_v21  ;;  %v5628_v57 = vadd.s32 4294967294, %v1654_v43  ;;  %v1642_v10 = vadd.s32 %v6690_v31, %v6701_v9  ;;  %v1749_v19 = vsel %vm1735_vm11, %v1746_v29, %v1748_v36 }
  0xf7   :  { %v1752_v42 = vshrl.u32 %v6768_v23, 16  ;;  %v1775_v21 = vand.u32 65535, %v1745_v50  ;;  %v1753_v30 = vand.u32 65535, %v1749_v19  ;;  %v1778_v44 = vmul.u32 %v1776_v56, %v1751_v47 }
  0xf8   :  { %v1462_v54 = vadd.f32 %v1460_v25, %v6692_v28  ;;  %vm5629_vm1 = vcmp.lt.s32.totalorder %v5628_v57, 0  ;;  %v1860_v62 = vshrl.u32 %v1859_v46, 23  ;;  %v1754_v40 = vshrl.u32 %v1749_v19, 16 }
  0xf9   :  { %v1657_v63 = vsel %vm5629_vm1, 0, %v5628_v57  ;;  %v1718_v31 = vshrl.u32 %v8653_v52, %v6725_v11  ;;  %v1755_v9 = vmul.u32 %v1753_v30, %v1751_v47  ;;  %v1757_v61 = vmul.u32 %v1753_v30, %v1752_v42 }
  0xfa   :  { %v1464_v55 = vadd.f32 3.1415927, %v1462_v54  ;;  %v1658_v14 = vsub.s32 32, %v1657_v63  ;;  %v1659_v49 = vshll.u32 %v1650_v22, %v1657_v63  ;;  %v1662_v51 = vsub.s32 4294967266, %v1657_v63 }
  0xfb   :  { %v1779_v38 = vmul.u32 %v1775_v21, %v1752_v42  ;;  %v1756_v39 = vmul.u32 %v1754_v40, %v1751_v47  ;;  %v1739_v22 = vsel %vm1737_vm2, %v1727_v8, 2102212464  ;;  %v1758_v43 = vmul.u32 %v1754_v40, %v1752_v42 }
  0xfc   :  { %v1466_v17 = vmul.f32 0.15915494, %v1464_v55  ;;  %v1660_v28 = vshrl.u32 %v1642_v10, %v1658_v14  ;;  %v1663_v0 = vadd.s32 127, %v1662_v51  ;;  %v1777_v50 = vmul.u32 %v1775_v21, %v1751_v47 }
  0xfd   :  { %v1781_v25 = vshll.u32 %v1778_v44, 16  ;;  %v1759_v1 = vshll.u32 %v1756_v39, 16  ;;  %v1761_v36 = vshll.u32 %v1757_v61, 16  ;;  %v1780_v54 = vmul.u32 %v1776_v56, %v1752_v42 }
  0xfe   :  { %v1468_v48 = vfloor.f32 %v1466_v17  ;;  %v1661_v13 = vor.u32 %v1660_v28, %v1659_v49  ;;  %v1664_v15 = vshll.u32 %v1663_v0, 23  ;;  %v1783_v11 = vshll.u32 %v1779_v38, 16 }
  0xff   :  { %v5633_v10 = vadd.s32 4294967169, %v1860_v62  ;;  %vm1763_vm13 = vc.u32 %v1755_v9, %v1759_v1  ;;  %v1765_v14 = vadd.s32 %v1759_v1, %v1755_v9  ;;  %v1762_v49 = vshrl.u32 %v1757_v61, 16  ;;  %v6815_v1 = vld [vmem:[#allocation2 + $0x140] sm:$0xff] }
 0x100   :  { %v1470_v57 = vmul.f32 6.2831855, %v1468_v48  ;;  %v1665_v29 = vor.u32 4788187, %v1664_v15  ;;  %v1668_v46 = vcvt.s32.f32 %v1661_v13  ;;  %v1764_v51 = vsel %vm1763_vm13, 1, %v8650_v59 }
 0x101   :  { %vm1785_vm14 = vc.u32 %v1777_v50, %v1781_v25  ;;  %v1787_v8 = vadd.s32 %v1781_v25, %v1777_v50  ;;  %v1760_v47 = vshrl.u32 %v1756_v39, 16  ;;  %v1766_v21 = vadd.s32 %v1764_v51, %v1758_v43 }
 0x102   :  { %v1472_v63 = vsub.f32 %v1464_v55, %v1470_v57  ;;  %v1666_v19 = vand.u32 2147483647, %v1665_v29  ;;  %vm1767_vm15 = vc.u32 %v1765_v14, %v1761_v36  ;;  %v1786_v56 = vsel %vm1785_vm14, 1, %v8650_v59 }
 0x103   :  { %v1768_v28 = vsel %vm1767_vm15, 1, %v8650_v59  ;;  %vm1789_vm4 = vc.u32 %v1787_v8, %v1783_v11  ;;  %v1782_v55 = vshrl.u32 %v1778_v44, 16  ;;  %v1788_v62 = vadd.s32 %v1786_v56, %v1780_v54 }
 0x104   :  { %v5626_v30 = vadd.f32 -3.1415927, %v1472_v63  ;;  %v1669_v17 = vmul.f32 %v1668_v46, %v1666_v19  ;;  %v1770_v42 = vadd.s32 %v1768_v28, %v1766_v21  ;;  %v1790_v0 = vsel %vm1789_vm4, 1, %v8650_v59 }
 0x105   :  { %v8657_v40 = vrot.slane %v6427_v20, 1  ;;  %v8658_v9 = vrot.slane %v6437_v2, 1  ;;  %v1738_v48 = vsel %vm1734_vm10, %v1718_v31, %v6745_v4  ;;  %v1740_v13 = vsel %vm1736_vm3, %v6747_v6, %v1739_v22 }
 0x106   :  { %1476 = vst [vmem:[#allocation7 + $0x8] sm:$0xff] %v5626_v30  ;;  %v1866_v15 = vadd.s32 1, %v5633_v10  ;;  %vm1550_vm5 = vcmp.lt.s32.totalorder %v6350_v32, 0  ;;  %v1771_v44 = vadd.s32 %v1770_v42, %v1760_v47  ;;  %v1784_v39 = vshrl.u32 %v1779_v38, 16  ;;  %v1543_v38 = vld [vmem:[#allocation2 + $0x78] sm:$0xff] }
 0x107   :  { %v1539_v61 = vsel %vm129_vm0, %v8658_v9, %v8657_v40  ;;  %v1792_v43 = vadd.s32 %v1790_v0, %v1788_v62  ;;  %v1670_v50 = vxor.u32 2147483648, %v1669_v17  ;;  %v6807_v20 = vadd.s32 %v1787_v8, %v1783_v11  ;;  %v1490_v11 = vld [vmem:[#allocation2 + $0x148] sm:$0xff] }
 0x108   :  { %v8600_v25 = vand.u32 2147483647, %v6764_v16  ;;  %vm1867_vm7 = vcmp.gt.s32.totalorder %v1866_v15, 0  ;;  %v1741_v57 = vsel %vm1735_vm11, %v1738_v48, %v1740_v13  ;;  %v6812_v4 = vadd.s32 %v1771_v44, %v1762_v49 }
 0x109   :  { %v1793_v31 = vadd.s32 %v1792_v43, %v1782_v55  ;;  %v1868_v29 = vsel %vm1867_vm7, %v1866_v15, 0  ;;  %v1541_v6 = vadd.f32 %v1539_v61, %v6448_v60  ;;  %v8659_v36 = vand.u32 2147483647, %v6350_v32  ;;  %v1486_v43 = vld [vmem:[#allocation2 + $0x40] sm:$0xff] }
 0x10a   :  { %v1870_v22 = vand.u32 31, %v1868_v29  ;;  %v1671_v58 = vsel %vm1550_vm5, %v1670_v50, %v1669_v17  ;;  %v1795_v10 = vmul.u32 %v6768_v23, %v1741_v57  ;;  %vm1797_vm9 = vc.u32 %v6812_v4, %v6807_v20 }
 0x10b   :  { %vm6819_vm8 = vcmp.le.f32.partialorder %v8659_v36, 0.7853982  ;;  %v1794_v54 = vadd.s32 %v1793_v31, %v1784_v39  ;;  %v1863_v19 = vand.u32 8388607, %v8600_v25  ;;  %v1493_v51 = vrot.slane %v6815_v1, 1 }
 0x10c   :  { %v6828_v60 = vsub.s32 32, %v1870_v22  ;;  %v1873_v14 = vshll.u32 %v8653_v52, %v1870_v22  ;;  %v1876_v49 = vshll.u32 %v8654_v5, %v1870_v22  ;;  %v1545_v8 = vsub.f32 %v1541_v6, %v1543_v38  ;;  %v1487_v6 = vld [vmem:[#allocation2 + $0x48] sm:$0xff] }
 0x10d   :  { %v1798_v63 = vadd.s32 1, %v1794_v54  ;;  %v1494_v47 = vrot.slane %v1490_v11, 1  ;;  %v6842_v21 = vsel %vm6819_vm8, %v6350_v32, %v1671_v58  ;;  %v6844_v28 = vshrl.u32 %v1868_v29, 5 }
 0x10e   :  { %v1874_v30 = vshrl.u32 %v8654_v5, %v6828_v60  ;;  %v1877_v23 = vshrl.u32 %v8655_v27, %v6828_v60  ;;  %v1879_v42 = vshll.u32 %v8655_v27, %v1870_v22  ;;  %v1880_v55 = vshrl.u32 %v8656_v12, %v6828_v60 }
 0x10f   :  { %v1799_v17 = vsel %vm1797_vm9, %v1798_v63, %v1794_v54  ;;  %v1882_v62 = vshll.u32 %v8656_v12, %v1870_v22  ;;  %v1864_v0 = vor.u32 8388608, %v1863_v19  ;;  %v1883_v48 = vshrl.u32 %v8636_v33, %v6828_v60 }
 0x110   :  { %v1800_v56 = vadd.s32 %v1799_v17, %v1795_v10  ;;  %v1875_v40 = vor.u32 %v1874_v30, %v1873_v14  ;;  %v6850_v9 = vor.u32 %v1877_v23, %v1876_v49  ;;  %v1885_v13 = vshll.u32 %v8636_v33, %v1870_v22 }
 0x111   :  { %v1886_v15 = vshrl.u32 %v8637_v37, %v6828_v60  ;;  %v6858_v44 = vsub.f32 %v1545_v8, %v6437_v2  ;;  %v6862_v39 = vmul.f32 %v6842_v21, %v6842_v21  ;;  %vm1888_vm12 = vcmp.lt.s32.totalorder %v6844_v28, 1 }
 0x112   :  { %v1801_v61 = vadd.s32 536870912, %v1800_v56  ;;  %v1495_v50 = vsel %vm129_vm0, %v1493_v51, %v1494_v47  ;;  %v1881_v31 = vor.u32 %v1880_v55, %v1879_v42  ;;  %v1884_v29 = vor.u32 %v1883_v48, %v1882_v62 }
 0x113   :  { %v1499_v22 = vsel %vm129_vm0, %v1494_v47, %v1493_v51  ;;  %vm1890_vm10 = vcmp.lt.s32.totalorder %v6844_v28, 3  ;;  %vm1891_vm3 = vcmp.lt.s32.totalorder %v6844_v28, 4  ;;  %v6871_v2 = vshll.u32 %v1864_v0, 8 }
 0x114   :  { %v6866_v57 = vshrl.u32 %v1801_v61, 30  ;;  %v1887_v36 = vor.u32 %v1886_v15, %v1885_v13  ;;  %vm1889_vm2 = vcmp.lt.s32.totalorder %v6844_v28, 2  ;;  %v1896_v54 = vsel %vm1888_vm12, %v1875_v40, %v6850_v9 }
 0x115   :  { %v6878_v11 = vadd.f32 %v1495_v50, %v1486_v43  ;;  %v1677_v58 = vmul.f32 -0.001358992, %v6862_v39  ;;  %v1684_v10 = vmul.f32 -0.00019511016, %v6862_v39  ;;  %v1897_v63 = vsel %vm1891_vm3, %v1884_v29, 920167782 }
 0x116   :  { %v1803_v38 = vshll.u32 %v6866_v57, 30  ;;  %v6885_v14 = vadd.f32 %v1499_v22, %v1487_v6  ;;  %v1898_v51 = vsel %vm1890_vm10, %v1881_v31, %v1897_v63  ;;  %v1905_v30 = vand.u32 65535, %v6871_v2 }
 0x117   :  { %v1899_v8 = vsel %vm1889_vm2, %v1896_v54, %v1898_v51  ;;  %v1906_v23 = vshrl.u32 %v6871_v2, 16  ;;  %v2013_v47 = vand.u32 2139095040, %v6858_v44  ;;  %v1900_v42 = vsel %vm1888_vm12, %v6850_v9, %v1881_v31 }
 0x118   :  { %8662 = vst [vmem:[#allocation19_spill] sm:$0xff] %v6885_v14  ;;  %v1804_v49 = vsub.s32 %v1800_v56, %v1803_v38  ;;  %v1901_v56 = vsel %vm1891_vm3, %v1887_v36, 1326507024  ;;  %v1678_v55 = vadd.f32 0.041655596, %v1677_v58  ;;  %v1930_v61 = vshrl.u32 %v1899_v8, 16 }
 0x119   :  { %v1685_v62 = vadd.f32 0.008332121, %v1684_v10  ;;  %v1902_v0 = vsel %vm1890_vm10, %v1884_v29, %v1901_v56  ;;  %v1872_v13 = vshrl.u32 %v8653_v52, %v6828_v60  ;;  %v1929_v43 = vand.u32 65535, %v1899_v8 }
 0x11a   :  { %vm1805_vm6 = vcmp.lt.s32.totalorder %v1804_v49, 0  ;;  %v1806_v17 = vsub.s32 0, %v1804_v49  ;;  %v1903_v15 = vsel %vm1889_vm2, %v1900_v42, %v1902_v0  ;;  %v1796_v36 = vadd.s32 %v6807_v20, %v6812_v4 }
 0x11b   :  { %v1907_v22 = vand.u32 65535, %v1903_v15  ;;  %v1908_v38 = vshrl.u32 %v1903_v15, 16  ;;  %v1893_v29 = vsel %vm1891_vm3, %v1881_v31, 2102212464  ;;  %v1932_v54 = vmul.u32 %v1930_v61, %v1905_v30 }
 0x11c   :  { %v1807_v48 = vsel %vm1805_vm6, %v1806_v17, %v1804_v49  ;;  %v2014_v58 = vshrl.u32 %v2013_v47, 23  ;;  %v1679_v10 = vmul.f32 %v1678_v55, %v6862_v39  ;;  %v1686_v8 = vmul.f32 %v1685_v62, %v6862_v39 }
 0x11d   :  { %v1808_v6 = vclz %v1807_v48  ;;  %v1910_v63 = vmul.u32 %v1908_v38, %v1905_v30  ;;  %v1911_v51 = vmul.u32 %v1907_v22, %v1906_v23  ;;  %v1892_v17 = vsel %vm1888_vm12, %v1872_v13, %v1875_v40 }
 0x11e   :  { %v1909_v42 = vmul.u32 %v1907_v22, %v1905_v30  ;;  %v1933_v56 = vmul.u32 %v1929_v43, %v1906_v23  ;;  %v1894_v20 = vsel %vm1890_vm10, %v6850_v9, %v1893_v29  ;;  %v1931_v31 = vmul.u32 %v1929_v43, %v1905_v30 }
 0x11f   :  { %v5631_v60 = vadd.s32 4294967294, %v1808_v6  ;;  %v1913_v4 = vshll.u32 %v1910_v63, 16  ;;  %v1912_v0 = vmul.u32 %v1908_v38, %v1906_v23  ;;  %v1915_v55 = vshll.u32 %v1911_v51, 16 }
 0x120   :  { %v1935_v48 = vshll.u32 %v1932_v54, 16  ;;  %v1934_v62 = vmul.u32 %v1930_v61, %v1906_v23  ;;  %v1936_v40 = vshrl.u32 %v1932_v54, 16  ;;  %v1937_v13 = vshll.u32 %v1933_v56, 16 }
 0x121   :  { %vm5632_vm11 = vcmp.lt.s32.totalorder %v5631_v60, 0  ;;  %vm1917_vm1 = vc.u32 %v1909_v42, %v1913_v4  ;;  %v1919_v26 = vadd.s32 %v1913_v4, %v1909_v42  ;;  %v1914_v19 = vshrl.u32 %v1910_v63, 16 }
 0x122   :  { %v1811_v47 = vsel %vm5632_vm11, 0, %v5631_v60  ;;  %v1918_v41 = vsel %vm1917_vm1, 1, %v8650_v59  ;;  %vm1939_vm14 = vc.u32 %v1931_v31, %v1935_v48  ;;  %v1941_v30 = vadd.s32 %v1935_v48, %v1931_v31  ;;  %v5736_v31 = vld [vmem:[#allocation2 + $0x50] sm:$0xff] }
 0x123   :  { %v1812_v15 = vsub.s32 32, %v1811_v47  ;;  %v1813_v6 = vshll.u32 %v1804_v49, %v1811_v47  ;;  %v1816_v25 = vsub.s32 4294967266, %v1811_v47  ;;  %v1920_v9 = vadd.s32 %v1918_v41, %v1912_v0 }
 0x124   :  { %vm1921_vm13 = vc.u32 %v1919_v26, %v1915_v55  ;;  %v1940_v49 = vsel %vm1939_vm14, 1, %v8650_v59  ;;  %v1916_v23 = vshrl.u32 %v1911_v51, 16  ;;  %vm1943_vm15 = vc.u32 %v1941_v30, %v1937_v13 }
 0x125   :  { %v1814_v22 = vshrl.u32 %v1796_v36, %v1812_v15  ;;  %v1817_v50 = vadd.s32 127, %v1816_v25  ;;  %v1922_v29 = vsel %vm1921_vm13, 1, %v8650_v59  ;;  %v1942_v60 = vadd.s32 %v1940_v49, %v1934_v62 }
 0x126   :  { %v1924_v61 = vadd.s32 %v1922_v29, %v1920_v9  ;;  %v1944_v25 = vsel %vm1943_vm15, 1, %v8650_v59  ;;  %v5636_v63 = vadd.s32 4294967169, %v2014_v58  ;;  %v1680_v42 = vadd.f32 -0.4999988, %v1679_v10 }
 0x127   :  { %v1815_v43 = vor.u32 %v1814_v22, %v1813_v6  ;;  %v1818_v38 = vshll.u32 %v1817_v50, 23  ;;  %v1938_v26 = vshrl.u32 %v1933_v56, 16  ;;  %v1946_v4 = vadd.s32 %v1944_v25, %v1942_v60 }
 0x128   :  { %v1925_v41 = vadd.s32 %v1924_v61, %v1914_v19  ;;  %v1504_v50 = vsub.f32 %v6878_v11, %v5736_v31  ;;  %v6922_v0 = vadd.s32 %v1941_v30, %v1937_v13  ;;  %v2020_v55 = vadd.s32 1, %v5636_v63 }
 0x129   :  { %v1819_v54 = vor.u32 4788187, %v1818_v38  ;;  %v1822_v36 = vcvt.s32.f32 %v1815_v43  ;;  %v1687_v51 = vadd.f32 -0.16666654, %v1686_v8  ;;  %v1895_v48 = vsel %vm1889_vm2, %v1892_v17, %v1894_v20  ;;  %v6962_v38 = vld [vmem:[#allocation2 + $0x58] sm:$0xff] }
 0x12a   :  { %v6926_v15 = vadd.s32 %v1925_v41, %v1916_v23  ;;  %v1947_v6 = vadd.s32 %v1946_v4, %v1936_v40  ;;  %v8663_v58 = vrot.slane %v6728_v3, 4  ;;  %v8664_v10 = vsub.s32 4, %v6736_v45  ;;  %8668 = vst [vmem:[#allocation20_spill] sm:$0xff] %v6962_v38 }
 0x12b   :  { %v1820_v47 = vand.u32 2147483647, %v1819_v54  ;;  %vm2021_vm4 = vcmp.gt.s32.totalorder %v2020_v55, 0  ;;  %v1681_v8 = vmul.f32 %v1680_v42, %v6862_v39  ;;  %vm1704_vm7 = vcmp.lt.s32.totalorder %v6627_v24, 0 }
 0x12c   :  { %v6931_v19 = vadd.f32 %v8663_v58, %v6728_v3  ;;  %v1673_v11 = vsel %vm1550_vm5, %v8664_v10, %v6736_v45  ;;  %v1948_v28 = vadd.s32 %v1947_v6, %v1938_v26  ;;  %v2022_v17 = vsel %vm2021_vm4, %v2020_v55, 0 }
 0x12d   :  { %v1823_v56 = vmul.f32 %v1822_v36, %v1820_v47  ;;  %v1949_v62 = vmul.u32 %v6871_v2, %v1895_v48  ;;  %vm1951_vm9 = vc.u32 %v6926_v15, %v6922_v0  ;;  %v2024_v3 = vand.u32 31, %v2022_v17 }
 0x12e   :  { %v6945_v40 = vsel %vm6819_vm8, 0, %v1673_v11  ;;  %v1688_v45 = vmul.f32 %v1687_v51, %v6862_v39  ;;  %v1952_v13 = vadd.s32 1, %v1948_v28  ;;  %v8605_v22 = vand.u32 2147483647, %v6858_v44 }
 0x12f   :  { %v1824_v20 = vxor.u32 2147483648, %v1823_v56  ;;  %v6950_v9 = vand.u32 3, %v6945_v40  ;;  %v8665_v30 = vand.u32 2147483647, %v6627_v24  ;;  %v6960_v46 = vsub.s32 32, %v2024_v3 }
 0x130   :  { %v1953_v29 = vsel %vm1951_vm9, %v1952_v13, %v1948_v28  ;;  %v6968_v23 = vsub.f32 %v1504_v50, %v6815_v1  ;;  %v6970_v61 = vadd.f32 1.0, %v1681_v8  ;;  %v1689_v54 = vadd.f32 1.0, %v1688_v45  ;;  %v7015_v13 = vld [vmem:[#allocation2 + $0x198] sm:$0xff] }
 0x131   :  { %vm6954_vm5 = vcmp.le.f32.partialorder %v8665_v30, 0.7853982  ;;  %v1825_v43 = vsel %vm1704_vm7, %v1824_v20, %v1823_v56  ;;  %v1954_v60 = vadd.s32 %v1953_v29, %v1949_v62  ;;  %v2017_v25 = vand.u32 8388607, %v8605_v22  ;;  %v7010_v62 = vld [vmem:[#allocation2 + $0x190] sm:$0xff] }
 0x132   :  { %8669 = vst [vmem:[#allocation21_spill] sm:$0xff] %v6968_v23  ;;  %v6975_v36 = vsel %vm6954_vm5, %v6627_v24, %v1825_v43  ;;  %v2036_v63 = vshll.u32 %v8656_v12, %v2024_v3  ;;  %vm1697_vm8 = vcmp.eq.s32.totalorder %v6950_v9, 2  ;;  %v6981_v41 = vshrl.u32 %v2022_v17, 5 }
 0x133   :  { %v1955_v42 = vadd.s32 536870912, %v1954_v60  ;;  %v2030_v1 = vshll.u32 %v8654_v5, %v2024_v3  ;;  %v2037_v26 = vshrl.u32 %v8636_v33, %v6960_v46  ;;  %v2031_v4 = vshrl.u32 %v8655_v27, %v6960_v46 }
 0x134   :  { %v2033_v31 = vshll.u32 %v8655_v27, %v2024_v3  ;;  %v2034_v50 = vshrl.u32 %v8656_v12, %v6960_v46  ;;  %v2039_v47 = vshll.u32 %v8636_v33, %v2024_v3  ;;  %v6994_v55 = vmul.f32 %v6975_v36, %v6975_v36 }
 0x135   :  { %v6996_v51 = vshrl.u32 %v1955_v42, 30  ;;  %v2027_v48 = vshll.u32 %v8653_v52, %v2024_v3  ;;  %v2028_v6 = vshrl.u32 %v8654_v5, %v6960_v46  ;;  %v7002_v58 = vmul.f32 %v1689_v54, %v6842_v21 }
 0x136   :  { %v1826_v10 = vsub.s32 4, %v6866_v57  ;;  %v2038_v11 = vor.u32 %v2037_v26, %v2036_v63  ;;  %v2040_v56 = vshrl.u32 %v8637_v37, %v6960_v46  ;;  %v8604_v8 = vxor.u32 2147483648, %v6970_v61 }
 0x137   :  { %v1831_v28 = vmul.f32 -0.001358992, %v6994_v55  ;;  %v1957_v17 = vshll.u32 %v6996_v51, 30  ;;  %v2018_v20 = vor.u32 8388608, %v2017_v25  ;;  %v7012_v3 = vor.u32 %v2031_v4, %v2030_v1 }
 0x138   :  { %v2035_v45 = vor.u32 %v2034_v50, %v2033_v31  ;;  %v2041_v21 = vor.u32 %v2040_v56, %v2039_v47  ;;  %vm2045_vm12 = vcmp.lt.s32.totalorder %v6981_v41, 4  ;;  %v1838_v30 = vmul.f32 -0.00019511016, %v6994_v55 }
 0x139   :  { %v7018_v43 = vsub.s32 %v1954_v60, %v1957_v17  ;;  %v2029_v29 = vor.u32 %v2028_v6, %v2027_v48  ;;  %vm2042_vm10 = vcmp.lt.s32.totalorder %v6981_v41, 1  ;;  %v7024_v54 = vsel %vm1704_vm7, %v1826_v10, %v6866_v57 }
 0x13a   :  { %vm2044_vm3 = vcmp.lt.s32.totalorder %v6981_v41, 3  ;;  %v2051_v25 = vsel %vm2045_vm12, %v2038_v11, 920167782  ;;  %v2871_v63 = vrot.slane %v7010_v62, 1  ;;  %v7032_v42 = vshll.u32 %v2018_v20, 8 }
 0x13b   :  { %vm1959_vm2 = vcmp.lt.s32.totalorder %v7018_v43, 0  ;;  %v1960_v60 = vsub.s32 0, %v7018_v43  ;;  %v2872_v1 = vrot.slane %v7015_v13, 1  ;;  %v1832_v26 = vadd.f32 0.041655596, %v1831_v28 }
 0x13c   :  { %vm2043_vm6 = vcmp.lt.s32.totalorder %v6981_v41, 2  ;;  %v2054_v57 = vsel %vm2042_vm10, %v7012_v3, %v2035_v45  ;;  %v2055_v4 = vsel %vm2045_vm12, %v2041_v21, 1326507024  ;;  %v1839_v31 = vadd.f32 0.008332121, %v1838_v30  ;;  %v2860_v30 = vld [vmem:[#allocation2 + $0x90] sm:$0xff] }
 0x13d   :  { %v1961_v50 = vsel %vm1959_vm2, %v1960_v60, %v7018_v43  ;;  %v2050_v47 = vsel %vm2042_vm10, %v2029_v29, %v7012_v3  ;;  %v2052_v48 = vsel %vm2044_vm3, %v2035_v45, %v2051_v25  ;;  %v7053_v10 = vsel %vm1697_vm8, %v8604_v8, %v7002_v58 }
 0x13e   :  { %v1962_v56 = vclz %v1961_v50  ;;  %v2056_v28 = vsel %vm2044_vm3, %v2038_v11, %v2055_v4  ;;  %v2059_v20 = vand.u32 65535, %v7032_v42  ;;  %v2060_v21 = vshrl.u32 %v7032_v42, 16 }
 0x13f   :  { %v2057_v17 = vsel %vm2043_vm6, %v2054_v57, %v2056_v28  ;;  %v2873_v25 = vsel %vm129_vm0, %v2871_v63, %v2872_v1  ;;  %v2053_v39 = vsel %vm2043_vm6, %v2050_v47, %v2052_v48  ;;  %v1833_v50 = vmul.f32 %v1832_v26, %v6994_v55 }
 0x140   :  { %v5634_v60 = vadd.s32 4294967294, %v1962_v56  ;;  %v2061_v8 = vand.u32 65535, %v2057_v17  ;;  %v2062_v22 = vshrl.u32 %v2057_v17, 16  ;;  %v1840_v11 = vmul.f32 %v1839_v31, %v6994_v55 }
 0x141   :  { %v2026_v57 = vshrl.u32 %v8653_v52, %v6960_v46  ;;  %v2877_v4 = vsel %vm129_vm0, %v2872_v1, %v2871_v63  ;;  %v1950_v28 = vadd.s32 %v6922_v0, %v6926_v15  ;;  %v2083_v49 = vand.u32 65535, %v2053_v39 }
 0x142   :  { %vm5635_vm11 = vcmp.lt.s32.totalorder %v5634_v60, 0  ;;  %v2878_v56 = vadd.f32 %v2873_v25, %v2860_v30  ;;  %v2064_v38 = vmul.u32 %v2062_v22, %v2059_v20  ;;  %v2065_v47 = vmul.u32 %v2061_v8, %v2060_v21 }
 0x143   :  { %v1965_v6 = vsel %vm5635_vm11, 0, %v5634_v60  ;;  %v2084_v48 = vshrl.u32 %v2053_v39, 16  ;;  %v2063_v31 = vmul.u32 %v2061_v8, %v2059_v20  ;;  %v1834_v23 = vadd.f32 -0.4999988, %v1833_v50 }
 0x144   :  { %v1966_v17 = vsub.s32 32, %v1965_v6  ;;  %v1967_v26 = vshll.u32 %v7018_v43, %v1965_v6  ;;  %v1970_v14 = vsub.s32 4294967266, %v1965_v6  ;;  %v1841_v34 = vadd.f32 -0.16666654, %v1840_v11 }
 0x145   :  { %v2046_v46 = vsel %vm2042_vm10, %v2026_v57, %v2029_v29  ;;  %v2047_v0 = vsel %vm2045_vm12, %v2035_v45, 2102212464  ;;  %v2066_v1 = vmul.u32 %v2062_v22, %v2060_v21  ;;  %v2067_v30 = vshll.u32 %v2064_v38, 16 }
 0x146   :  { %v1968_v15 = vshrl.u32 %v1950_v28, %v1966_v17  ;;  %v1971_v63 = vadd.s32 127, %v1970_v14  ;;  %vm1694_vm1 = vcmp.eq.s32.totalorder %v6950_v9, 0  ;;  %vm1858_vm13 = vcmp.lt.s32.totalorder %v6764_v16, 0 }
 0x147   :  { %v2069_v39 = vshll.u32 %v2065_v47, 16  ;;  %v2085_v43 = vmul.u32 %v2083_v49, %v2059_v20  ;;  %v2086_v6 = vmul.u32 %v2084_v48, %v2059_v20  ;;  %v2087_v8 = vmul.u32 %v2083_v49, %v2060_v21 }
 0x148   :  { %v8670_v25 = vand.u32 2147483647, %v6764_v16  ;;  %v1969_v29 = vor.u32 %v1968_v15, %v1967_v26  ;;  %v1972_v45 = vshll.u32 %v1971_v63, 23  ;;  %vm2071_vm15 = vc.u32 %v2063_v31, %v2067_v30  ;;  %v7088_v63 = vld [vmem:[#allocation2 + $0xa0] sm:$0xff] }
 0x149   :  { %v2073_v14 = vadd.s32 %v2067_v30, %v2063_v31  ;;  %v2068_v22 = vshrl.u32 %v2064_v38, 16  ;;  %v2072_v50 = vsel %vm2071_vm15, 1, %v8650_v59  ;;  %v2088_v11 = vmul.u32 %v2084_v48, %v2060_v21  ;;  %v2861_v38 = vld [vmem:[#allocation2 + $0x98] sm:$0xff] }
 0x14a   :  { %vm7080_vm14 = vcmp.le.f32.partialorder %v8670_v25, 0.7853982  ;;  %v2089_v57 = vshll.u32 %v2086_v6, 16  ;;  %v1973_v28 = vor.u32 4788187, %v1972_v45  ;;  %v1976_v17 = vcvt.s32.f32 %v1969_v29 }
 0x14b   :  { %v2074_v35 = vadd.s32 %v2072_v50, %v2066_v1  ;;  %vm2075_vm4 = vc.u32 %v2073_v14, %v2069_v39  ;;  %v1842_v49 = vmul.f32 %v1841_v34, %v6994_v55  ;;  %v2091_v25 = vshll.u32 %v2087_v8, 16 }
 0x14c   :  { %v2076_v20 = vsel %vm2075_vm4, 1, %v8650_v59  ;;  %vm2093_vm7 = vc.u32 %v2085_v43, %v2089_v57  ;;  %v1974_v18 = vand.u32 2147483647, %v1973_v28  ;;  %v2095_v31 = vadd.s32 %v2089_v57, %v2085_v43 }
 0x14d   :  { %v2078_v26 = vadd.s32 %v2076_v20, %v2074_v35  ;;  %v2094_v15 = vsel %vm2093_vm7, 1, %v8650_v59  ;;  %v2048_v21 = vsel %vm2044_vm3, %v7012_v3, %v2047_v0  ;;  %v2070_v48 = vshrl.u32 %v2065_v47, 16 }
 0x14e   :  { %v2096_v1 = vadd.s32 %v2094_v15, %v2088_v11  ;;  %v2882_v34 = vsub.f32 %v2878_v56, %v7088_v63  ;;  %v1977_v30 = vmul.f32 %v1976_v17, %v1974_v18  ;;  %v2090_v29 = vshrl.u32 %v2086_v6, 16 }
 0x14f   :  { %v2079_v39 = vadd.s32 %v2078_v26, %v2068_v22  ;;  %vm2097_vm9 = vc.u32 %v2095_v31, %v2091_v25  ;;  %v1835_v35 = vmul.f32 %v1834_v23, %v6994_v55  ;;  %v2879_v43 = vadd.f32 %v2877_v4, %v2861_v38 }
 0x150   :  { %v2098_v45 = vsel %vm2097_vm9, 1, %v8650_v59  ;;  %v7097_v14 = vsub.f32 %v2882_v34, %v7010_v62  ;;  %vm1693_vm8 = vcmp.lt.s32.totalorder %v6950_v9, 2  ;;  %v1843_v50 = vadd.f32 1.0, %v1842_v49  ;;  %v7129_v49 = vld [vmem:[#allocation2 + $0xa8] sm:$0xff] }
 0x151   :  { %v1978_v3 = vxor.u32 2147483648, %v1977_v30  ;;  %v2092_v47 = vshrl.u32 %v2087_v8, 16  ;;  %v2100_v0 = vadd.s32 %v2098_v45, %v2096_v1  ;;  %v2049_v18 = vsel %vm2043_vm6, %v2046_v46, %v2048_v21 }
 0x152   :  { %v7102_v56 = vadd.s32 %v2079_v39, %v2070_v48  ;;  %v7104_v6 = vadd.s32 %v2095_v31, %v2091_v25  ;;  %v2909_v23 = vand.u32 2139095040, %v7097_v14  ;;  %v8673_v55 = vxor.u32 2147483648, %v7002_v58 }
 0x153   :  { %v7115_v4 = vsel %vm6954_vm5, 0, %v7024_v54  ;;  %v1979_v41 = vsel %vm1858_vm13, %v1978_v3, %v1977_v30  ;;  %v2101_v46 = vadd.s32 %v2100_v0, %v2090_v29  ;;  %v7119_v8 = vadd.f32 1.0, %v1835_v35 }
 0x154   :  { %v1696_v62 = vsel %vm1694_vm1, %v6970_v61, %v8673_v55  ;;  %v1846_v22 = vand.u32 3, %v7115_v4  ;;  %v1982_v11 = vsel %vm7080_vm14, %v6764_v16, %v1979_v41  ;;  %v2910_v57 = vshrl.u32 %v2909_v23, 23 }
 0x155   :  { %v7126_v28 = vmul.f32 %v1843_v50, %v6975_v36  ;;  %v1984_v17 = vmul.f32 %v1982_v11, %v1982_v11  ;;  %v2102_v2 = vadd.s32 %v2101_v46, %v2092_v47  ;;  %v2103_v54 = vmul.u32 %v7032_v42, %v2049_v18 }
 0x156   :  { %vm2105_vm5 = vc.u32 %v7102_v56, %v7104_v6  ;;  %v2883_v20 = vsub.f32 %v2879_v43, %v7129_v49  ;;  %v8615_v25 = vand.u32 2147483647, %v7097_v14  ;;  %v5653_v26 = vadd.s32 4294967169, %v2910_v57 }
 0x157   :  { %v1980_v15 = vsub.s32 4, %v6996_v51  ;;  %v1985_v31 = vmul.f32 -0.001358992, %v1984_v17  ;;  %v1992_v38 = vmul.f32 -0.00019511016, %v1984_v17  ;;  %v2106_v36 = vadd.s32 1, %v2102_v2 }
 0x158   :  { %vm1848_vm12 = vcmp.eq.s32.totalorder %v1846_v22, 0  ;;  %vm1851_vm10 = vcmp.eq.s32.totalorder %v1846_v22, 2  ;;  %v8616_v21 = vxor.u32 2147483648, %v7119_v8  ;;  %v2916_v42 = vadd.s32 1, %v5653_v26 }
 0x159   :  { %v8617_v48 = vxor.u32 2147483648, %v7126_v28  ;;  %v1986_v1 = vadd.f32 0.041655596, %v1985_v31  ;;  %v1993_v34 = vadd.f32 0.008332121, %v1992_v38  ;;  %v2107_v30 = vsel %vm2105_vm5, %v2106_v36, %v2102_v2 }
 0x15a   :  { %v2108_v39 = vadd.s32 %v2107_v30, %v2103_v54  ;;  %v7139_v29 = vsub.f32 %v2883_v20, %v7015_v13  ;;  %v2913_v35 = vand.u32 8388607, %v8615_v25  ;;  %vm2917_vm3 = vcmp.gt.s32.totalorder %v2916_v42, 0 }
 0x15b   :  { %vm1691_vm2 = vweird.f32 %v6350_v32  ;;  %v1981_v45 = vsel %vm1858_vm13, %v1980_v15, %v6996_v51  ;;  %v1987_v43 = vmul.f32 %v1986_v1, %v1984_v17  ;;  %v1994_v50 = vmul.f32 %v1993_v34, %v1984_v17 }
 0x15c   :  { %v1700_v3 = vsel %vm1693_vm8, %v1696_v62, %v7053_v10  ;;  %vm1847_vm6 = vcmp.lt.s32.totalorder %v1846_v22, 2  ;;  %v2109_v47 = vadd.s32 536870912, %v2108_v39  ;;  %v2918_v13 = vsel %vm2917_vm3, %v2916_v42, 0  ;;  %v7160_v10 = vld [vmem:[#allocation2 + $0x1a0] sm:$0xff] }
 0x15d   :  { %v1850_v0 = vsel %vm1848_vm12, %v7119_v8, %v8617_v48  ;;  %v1853_v18 = vsel %vm1851_vm10, %v8616_v21, %v7126_v28  ;;  %v1988_v51 = vadd.f32 -0.4999988, %v1987_v43  ;;  %v1995_v23 = vadd.f32 -0.16666654, %v1994_v50 }
 0x15e   :  { %v1983_v55 = vsel %vm7080_vm14, 0, %v1981_v45  ;;  %v2110_v9 = vshrl.u32 %v2109_v47, 30  ;;  %v2914_v62 = vor.u32 8388608, %v2913_v35  ;;  %v3063_v41 = vand.u32 2139095040, %v7139_v29 }
 0x15f   :  { %v1989_v46 = vmul.f32 %v1988_v51, %v1984_v17  ;;  %v1996_v57 = vmul.f32 %v1995_v23, %v1984_v17  ;;  %v2000_v2 = vand.u32 3, %v1983_v55  ;;  %v7163_v54 = vand.u32 31, %v2918_v13 }
 0x160   :  { %v8674_v20 = vrot.slane %v6931_v19, 2  ;;  %vm1845_vm11 = vweird.f32 %v6627_v24  ;;  %v1854_v60 = vsel %vm1847_vm6, %v1850_v0, %v1853_v18  ;;  %v2111_v15 = vshll.u32 %v2110_v9, 30 }
 0x161   :  { %v7174_v31 = vsel %vm1691_vm2, nan, %v1700_v3  ;;  %v7176_v38 = vadd.f32 1.0, %v1989_v46  ;;  %v1997_v17 = vadd.f32 1.0, %v1996_v57  ;;  %vm2012_vm1 = vcmp.lt.s32.totalorder %v6858_v44, 0 }
 0x162   :  { %v7168_v26 = vadd.f32 %v8674_v20, %v6931_v19  ;;  %v2112_v42 = vsub.s32 %v2108_v39, %v2111_v15  ;;  %v7180_v1 = vshll.u32 %v2914_v62, 8  ;;  %v3064_v19 = vshrl.u32 %v3063_v41, 23 }
 0x163   :  { %v7184_v22 = vsel %vm1845_vm11, nan, %v1854_v60  ;;  %v7186_v34 = vmul.f32 %v1997_v17, %v1982_v11  ;;  %vm1999_vm13 = vweird.f32 %v6764_v16  ;;  %vm2001_vm14 = vcmp.lt.s32.totalorder %v2000_v2, 2 }
 0x164   :  { %v8675_v30 = vand.u32 2147483647, %v6858_v44  ;;  %v2921_v39 = vsub.s32 32, %v7163_v54  ;;  %vm2002_vm4 = vcmp.eq.s32.totalorder %v2000_v2, 0  ;;  %v8618_v45 = vxor.u32 2147483648, %v7176_v38 }
 0x165   :  { %vm2113_vm7 = vcmp.lt.s32.totalorder %v2112_v42, 0  ;;  %v2114_v43 = vsub.s32 0, %v2112_v42  ;;  %v2003_v50 = vxor.u32 2147483648, %v7186_v34  ;;  %vm2005_vm9 = vcmp.eq.s32.totalorder %v2000_v2, 2 }
 0x166   :  { %vm7191_vm15 = vcmp.le.f32.partialorder %v8675_v30, 0.7853982  ;;  %v2104_v11 = vadd.s32 %v7104_v6, %v7102_v56  ;;  %v2134_v3 = vsub.s32 4, %v2110_v9  ;;  %v7200_v0 = vshrl.u32 %v2918_v13, 5 }
 0x167   :  { %v2115_v47 = vsel %vm2113_vm7, %v2114_v43, %v2112_v42  ;;  %v7203_v18 = vand.u32 65535, %v7180_v1  ;;  %v7205_v51 = vadd.s32 4294967169, %v3064_v19  ;;  %v2923_v62 = vshll.u32 %v8653_v52, %v7163_v54 }
 0x168   :  { %v2116_v23 = vclz %v2115_v47  ;;  %v2924_v41 = vshrl.u32 %v8654_v5, %v2921_v39  ;;  %v7211_v46 = vshrl.u32 %v7180_v1, 16  ;;  %v2004_v56 = vsel %vm2002_vm4, %v7176_v38, %v2003_v50 }
 0x169   :  { %v2007_v6 = vsel %vm2005_vm9, %v8618_v45, %v7186_v34  ;;  %v2926_v13 = vshll.u32 %v8654_v5, %v7163_v54  ;;  %v2135_v60 = vsel %vm2012_vm1, %v2134_v3, %v2110_v9  ;;  %v2927_v15 = vshrl.u32 %v8655_v27, %v2921_v39 }
 0x16a   :  { %v5637_v20 = vadd.s32 4294967294, %v2116_v23  ;;  %v2929_v17 = vshll.u32 %v8655_v27, %v7163_v54  ;;  %v2312_v19 = vadd.s32 3, %v6945_v40  ;;  %v2622_v30 = vadd.s32 3, %v1983_v55 }
 0x16b   :  { %v2922_v43 = vshrl.u32 %v8653_v52, %v2921_v39  ;;  %v2932_v47 = vshll.u32 %v8656_v12, %v7163_v54  ;;  %v2008_v25 = vsel %vm2001_vm14, %v2004_v56, %v2007_v6  ;;  %v2925_v23 = vor.u32 %v2924_v41, %v2923_v62 }
 0x16c   :  { %vm5638_vm8 = vcmp.lt.s32.totalorder %v5637_v20, 0  ;;  %v2930_v36 = vshrl.u32 %v8656_v12, %v2921_v39  ;;  %v7236_v3 = vsel %vm7191_vm15, 0, %v2135_v60  ;;  %v2313_v57 = vand.u32 3, %v2312_v19 }
 0x16d   :  { %v2119_v9 = vsel %vm5638_vm8, 0, %v5637_v20  ;;  %v2933_v40 = vshrl.u32 %v8636_v33, %v2921_v39  ;;  %v2928_v45 = vor.u32 %v2927_v15, %v2926_v13  ;;  %v2009_v2 = vsel %vm1999_vm13, nan, %v2008_v25 }
 0x16e   :  { %v2120_v55 = vsub.s32 32, %v2119_v9  ;;  %v2121_v21 = vshll.u32 %v2112_v42, %v2119_v9  ;;  %v2124_v48 = vsub.s32 4294967266, %v2119_v9  ;;  %vm2315_vm5 = vcmp.eq.s32.totalorder %v2313_v57, 0 }
 0x16f   :  { %vm2318_vm12 = vcmp.eq.s32.totalorder %v2313_v57, 2  ;;  %v2623_v62 = vand.u32 3, %v2622_v30  ;;  %vm2314_vm10 = vcmp.lt.s32.totalorder %v2313_v57, 2  ;;  %v8678_v6 = vxor.u32 2147483648, %v7002_v58 }
 0x170   :  { %v2122_v41 = vshrl.u32 %v2104_v11, %v2120_v55  ;;  %v2125_v56 = vadd.s32 127, %v2124_v48  ;;  %v8679_v60 = vxor.u32 2147483648, %v6970_v61  ;;  %v2931_v42 = vor.u32 %v2930_v36, %v2929_v17 }
 0x171   :  { %v2317_v20 = vsel %vm2315_vm5, %v6970_v61, %v8678_v6  ;;  %v2935_v13 = vshll.u32 %v8636_v33, %v7163_v54  ;;  %v2936_v25 = vshrl.u32 %v8637_v37, %v2921_v39  ;;  %v2934_v30 = vor.u32 %v2933_v40, %v2932_v47 }
 0x172   :  { %v2320_v19 = vsel %vm2318_vm12, %v8679_v60, %v7002_v58  ;;  %v2123_v15 = vor.u32 %v2122_v41, %v2121_v21  ;;  %v2126_v9 = vshll.u32 %v2125_v56, 23  ;;  %vm2938_vm3 = vcmp.lt.s32.totalorder %v7200_v0, 1 }
 0x173   :  { %v2164_v48 = vadd.f32 %v2009_v2, %v7174_v31  ;;  %v2321_v11 = vsel %vm2314_vm10, %v2317_v20, %v2320_v19  ;;  %vm2939_vm6 = vcmp.lt.s32.totalorder %v7200_v0, 2  ;;  %vm2941_vm14 = vcmp.lt.s32.totalorder %v7200_v0, 4 }
 0x174   :  { %v2127_v61 = vor.u32 4788187, %v2126_v9  ;;  %v2130_v58 = vcvt.s32.f32 %v2123_v15  ;;  %v2467_v36 = vadd.s32 3, %v7115_v4  ;;  %vm2624_vm4 = vcmp.lt.s32.totalorder %v2623_v62, 2 }
 0x175   :  { %vm2625_vm7 = vcmp.eq.s32.totalorder %v2623_v62, 0  ;;  %vm2628_vm9 = vcmp.eq.s32.totalorder %v2623_v62, 2  ;;  %v2937_v54 = vor.u32 %v2936_v25, %v2935_v13  ;;  %vm2940_vm8 = vcmp.lt.s32.totalorder %v7200_v0, 3 }
 0x176   :  { %v2128_v21 = vand.u32 2147483647, %v2127_v61  ;;  %v2322_v39 = vsel %vm1691_vm2, nan, %v2321_v11  ;;  %v2627_v31 = vsel %vm2625_vm7, %v7176_v38, %v2003_v50  ;;  %v8680_v57 = vxor.u32 2147483648, %v7176_v38 }
 0x177   :  { %v2166_v47 = vmul.f32 0.5, %v2164_v48  ;;  %v2943_v40 = vsel %vm2941_vm14, %v2931_v42, 2102212464  ;;  %v2947_v55 = vsel %vm2941_vm14, %v2934_v30, 920167782  ;;  %v2468_v62 = vand.u32 3, %v2467_v36 }
 0x178   :  { %v2630_v17 = vsel %vm2628_vm9, %v8680_v57, %v7186_v34  ;;  %v2131_v2 = vmul.f32 %v2130_v58, %v2128_v21  ;;  %v2950_v50 = vsel %vm2938_vm3, %v2928_v45, %v2931_v42  ;;  %v2942_v38 = vsel %vm2938_vm3, %v2922_v43, %v2925_v23 }
 0x179   :  { %v2631_v4 = vsel %vm2624_vm4, %v2627_v31, %v2630_v17  ;;  %v2946_v34 = vsel %vm2938_vm3, %v2925_v23, %v2928_v45  ;;  %v2951_v56 = vsel %vm2941_vm14, %v2937_v54, 1326507024  ;;  %v2944_v20 = vsel %vm2940_vm8, %v2928_v45, %v2943_v40  ;;  %v8684_v40 = vld [vmem:[#allocation16_spill] sm:$0xff] }
 0x17a   :  { %v2632_v32 = vsel %vm1999_vm13, nan, %v2631_v4  ;;  %v2132_v6 = vxor.u32 2147483648, %v2131_v2  ;;  %v2948_v16 = vsel %vm2940_vm8, %v2931_v42, %v2947_v55  ;;  %v2952_v60 = vsel %vm2940_vm8, %v2934_v30, %v2951_v56  ;;  %v8683_v4 = vld [vmem:[#allocation15_spill] sm:$0xff] }
 0x17b   :  { %v2788_v41 = vadd.f32 %v2632_v32, %v2322_v39  ;;  %v2777_v19 = vadd.s32 3, %v7236_v3  ;;  %v2792_v43 = vmul.f32 %v2166_v47, %v6562_v7  ;;  %v2953_v23 = vsel %vm2939_vm6, %v2950_v50, %v2952_v60 }
 0x17c   :  { %v2133_v25 = vsel %vm2012_vm1, %v2132_v6, %v2131_v2  ;;  %vm2470_vm2 = vcmp.eq.s32.totalorder %v2468_v62, 0  ;;  %vm2473_vm13 = vcmp.eq.s32.totalorder %v2468_v62, 2  ;;  %v2958_v45 = vshrl.u32 %v2953_v23, 16  ;;  %v8685_v2 = vld [vmem:[#allocation17_spill] sm:$0xff] }
 0x17d   :  { %v2790_v13 = vmul.f32 0.5, %v2788_v41  ;;  %v7293_v42 = vsel %vm7191_vm15, %v6858_v44, %v2133_v25  ;;  %v2949_v9 = vsel %vm2939_vm6, %v2946_v34, %v2948_v16  ;;  %v2957_v30 = vand.u32 65535, %v2953_v23 }
 0x17e   :  { %v2138_v48 = vmul.f32 %v7293_v42, %v7293_v42  ;;  %v7301_v11 = vand.u32 3, %v7236_v3  ;;  %vm2469_vm1 = vcmp.lt.s32.totalorder %v2468_v62, 2  ;;  %v7305_v61 = vsel %vm2939_vm6, %v2942_v38, %v2944_v20 }
 0x17f   :  { %v2794_v15 = vmul.f32 %v2790_v13, %v6569_v53  ;;  %v8681_v35 = vxor.u32 2147483648, %v7126_v28  ;;  %v8682_v36 = vxor.u32 2147483648, %v7119_v8  ;;  %v7313_v21 = vand.u32 3, %v2777_v19 }
 0x180   :  { %v2139_v31 = vmul.f32 -0.001358992, %v2138_v48  ;;  %v2146_v57 = vmul.f32 -0.00019511016, %v2138_v48  ;;  %v2960_v3 = vmul.u32 %v2958_v45, %v7203_v18  ;;  %v2980_v17 = vshrl.u32 %v2949_v9, 16 }
 0x181   :  { %v2472_v58 = vsel %vm2470_vm2, %v7119_v8, %v8681_v35  ;;  %v2475_v54 = vsel %vm2473_vm13, %v8682_v36, %v7126_v28  ;;  %v2796_v39 = vadd.f32 %v2794_v15, %v2792_v43  ;;  %v2800_v55 = vmul.f32 %v2166_v47, %v8684_v40 }
 0x182   :  { %v2802_v32 = vmul.f32 %v2790_v13, %v8685_v2  ;;  %v7322_v50 = vmul.u32 %v2957_v30, %v7211_v46  ;;  %v2140_v8 = vadd.f32 0.041655596, %v2139_v31  ;;  %v2147_v28 = vadd.f32 0.008332121, %v2146_v57 }
 0x183   :  { %v7317_v0 = vadd.f32 %v2796_v39, %v8683_v4  ;;  %v2959_v41 = vmul.u32 %v2957_v30, %v7203_v18  ;;  %v2979_v38 = vand.u32 65535, %v2949_v9  ;;  %vm2159_vm15 = vcmp.eq.s32.totalorder %v7301_v11, 2 }
 0x184   :  { %v2476_v34 = vsel %vm2469_vm1, %v2472_v58, %v2475_v54  ;;  %v2962_v6 = vmul.u32 %v2958_v45, %v7211_v46  ;;  %v2141_v20 = vmul.f32 %v2140_v8, %v2138_v48  ;;  %v2148_v47 = vmul.f32 %v2147_v28, %v2138_v48  ;;  %v8686_v54 = vld [vmem:[#allocation18_spill] sm:$0xff] }
 0x185   :  { %v2808_v56 = vmul.f32 1.442695, %v7317_v0  ;;  %v2963_v16 = vshll.u32 %v2960_v3, 16  ;;  %v7330_v60 = vmul.u32 %v2980_v17, %v7203_v18  ;;  %vm2156_vm5 = vcmp.eq.s32.totalorder %v7301_v11, 0 }
 0x186   :  { %vm2780_vm12 = vcmp.eq.s32.totalorder %v7313_v21, 0  ;;  %vm2783_vm10 = vcmp.eq.s32.totalorder %v7313_v21, 2  ;;  %v2804_v19 = vadd.f32 %v2802_v32, %v2800_v55  ;;  %v2965_v62 = vshll.u32 %v7322_v50, 16 }
 0x187   :  { %5722 = vpow2.f32 %v2808_v56  ;;  %v2142_v13 = vadd.f32 -0.4999988, %v2141_v20  ;;  %v2149_v43 = vadd.f32 -0.16666654, %v2148_v47  ;;  %vm2155_vm3 = vcmp.lt.s32.totalorder %v7301_v11, 2  ;;  %v8687_v56 = vld [vmem:[#allocation21_spill] sm:$0xff] }
 0x188   :  { %vm2779_vm6 = vcmp.lt.s32.totalorder %v7313_v21, 2  ;;  %vm2967_vm14 = vc.u32 %v2959_v41, %v2963_v16  ;;  %v2981_v23 = vmul.u32 %v2979_v38, %v7203_v18  ;;  %vm2153_vm4 = vweird.f32 %v6858_v44 }
 0x189   :  { %v2968_v25 = vsel %vm2967_vm14, 1, %v8650_v59  ;;  %v2969_v45 = vadd.s32 %v2963_v16, %v2959_v41  ;;  %v2983_v15 = vmul.u32 %v2979_v38, %v7211_v46  ;;  %v2984_v9 = vmul.u32 %v2980_v17, %v7211_v46 }
 0x18a   :  { %v2143_v30 = vmul.f32 %v2142_v13, %v2138_v48  ;;  %v2150_v35 = vmul.f32 %v2149_v43, %v2138_v48  ;;  %v2970_v58 = vadd.s32 %v2968_v25, %v2962_v6  ;;  %v2985_v36 = vshll.u32 %v7330_v60, 16 }
 0x18b   :  { %v2806_v39 = vadd.f32 %v2804_v19, %v8686_v54  ;;  %v2964_v31 = vshrl.u32 %v2960_v3, 16  ;;  %vm2971_vm7 = vc.u32 %v2969_v45, %v2965_v62  ;;  %v2987_v57 = vshll.u32 %v2983_v15, 16  ;;  %v7364_v45 = vld [vmem:[#allocation2 + $0x1a8] sm:$0xff] }
 0x18c   :  { %v2144_v18 = vadd.f32 1.0, %v2143_v30  ;;  %v2151_v55 = vadd.f32 1.0, %v2150_v35  ;;  %v2972_v32 = vsel %vm2971_vm7, 1, %v8650_v59  ;;  %vm2989_vm9 = vc.u32 %v2981_v23, %v2985_v36 }
 0x18d   :  { %v5723_v8 = vpop.eup %5722  ;;  %v2966_v28 = vshrl.u32 %v7322_v50, 16  ;;  %v2974_v41 = vadd.s32 %v2972_v32, %v2970_v58  ;;  %v2990_v46 = vsel %vm2989_vm9, 1, %v8650_v59  ;;  %v2991_v48 = vadd.s32 %v2985_v36, %v2981_v23  ;;  %v5738_v36 = vld [vmem:[#allocation2 + $0x40] sm:$0xff] }
 0x18e   :  { %v2152_v17 = vmul.f32 %v2151_v55, %v7293_v42  ;;  %v2160_v38 = vxor.u32 2147483648, %v2144_v18  ;;  %v2812_v6 = vmul.f32 %v5723_v8, %v8687_v56  ;;  %v2992_v3 = vadd.s32 %v2990_v46, %v2984_v9 }
 0x18f   :  { %v2975_v20 = vadd.s32 %v2974_v41, %v2964_v31  ;;  %v2986_v47 = vshrl.u32 %v7330_v60, 16  ;;  %vm2993_vm8 = vc.u32 %v2991_v48, %v2987_v57  ;;  %v3070_v16 = vadd.s32 1, %v7205_v51 }
 0x190   :  { %v2157_v19 = vxor.u32 2147483648, %v2152_v17  ;;  %v2161_v50 = vsel %vm2159_vm15, %v2160_v38, %v2152_v17  ;;  %v2785_v62 = vsel %vm2783_vm10, %v2160_v38, %v2152_v17  ;;  %v2814_v13 = vadd.f32 %v2812_v6, %v2806_v39 }
 0x191   :  { %v2477_v42 = vsel %vm1845_vm11, nan, %v2476_v34  ;;  %v2988_v43 = vshrl.u32 %v2983_v15, 16  ;;  %v2994_v23 = vsel %vm2993_vm8, 1, %v8650_v59  ;;  %vm3071_vm2 = vcmp.gt.s32.totalorder %v3070_v16, 0 }
 0x192   :  { %v2158_v60 = vsel %vm2156_vm5, %v2144_v18, %v2157_v19  ;;  %v2782_v51 = vsel %vm2780_vm12, %v2144_v18, %v2157_v19  ;;  %v2816_v25 = vsub.f32 %v2814_v13, %v8687_v56  ;;  %v2996_v9 = vadd.s32 %v2994_v23, %v2992_v3 }
 0x193   :  { %v2162_v30 = vsel %vm2155_vm3, %v2158_v60, %v2161_v50  ;;  %v2786_v24 = vsel %vm2779_vm6, %v2782_v51, %v2785_v62  ;;  %v7370_v34 = vadd.s32 %v2975_v20, %v2966_v28  ;;  %v7372_v15 = vadd.s32 %v2991_v48, %v2987_v57  ;;  %v8690_v20 = vld [vmem:[#allocation20_spill] sm:$0xff] }
 0x194   :  { %v2163_v35 = vsel %vm2153_vm4, nan, %v2162_v30  ;;  %v2787_v58 = vsel %vm2153_vm4, nan, %v2786_v24  ;;  %v2818_v39 = vadd.f32 %v5738_v36, %v2816_v25  ;;  %v2997_v31 = vadd.s32 %v2996_v9, %v2986_v47 }
 0x195   :  { %v2165_v18 = vadd.f32 %v2163_v35, %v7184_v22  ;;  %v2789_v11 = vadd.f32 %v2787_v58, %v2477_v42  ;;  %v2892_v55 = vrot.slane %v7364_v45, 1  ;;  %v3072_v21 = vsel %vm3071_vm2, %v3070_v16, 0 }
 0x196   :  { %v2820_v32 = vadd.f32 3.1415927, %v2818_v39  ;;  %v2998_v8 = vadd.s32 %v2997_v31, %v2988_v43  ;;  %v2999_v57 = vmul.u32 %v7180_v1, %v7305_v61  ;;  %v3074_v28 = vand.u32 31, %v3072_v21  ;;  %v5739_v1 = vld [vmem:[#allocation2 + $0x148] sm:$0xff] }
 0x197   :  { %v2167_v41 = vmul.f32 0.5, %v2165_v18  ;;  %v2791_v46 = vmul.f32 0.5, %v2789_v11  ;;  %vm3001_vm11 = vc.u32 %v7370_v34, %v7372_v15  ;;  %v8688_v44 = vand.u32 2147483647, %v7139_v29  ;;  %v8689_v61 = vld [vmem:[#allocation19_spill] sm:$0xff] }
 0x198   :  { %v2822_v22 = vmul.f32 0.15915494, %v2820_v32  ;;  %v3002_v17 = vadd.s32 1, %v2998_v8  ;;  %v7389_v6 = vsub.s32 32, %v3074_v28  ;;  %v1482_v3 = vrot.slane %v7168_v26, 1 }
 0x199   :  { %v3067_v48 = vand.u32 8388607, %v8688_v44  ;;  %v2793_v38 = vmul.f32 %v2167_v41, %v6562_v7  ;;  %v2795_v56 = vmul.f32 %v2791_v46, %v6569_v53  ;;  %v8691_v47 = vsub.f32 %v8689_v61, %v8690_v20 }
 0x19a   :  { %v2824_v19 = vfloor.f32 %v2822_v22  ;;  %v3003_v50 = vsel %vm3001_vm11, %v3002_v17, %v2998_v8  ;;  %v8692_v13 = vrot.slane %v7160_v10, 1  ;;  %v2801_v60 = vmul.f32 %v2167_v41, %v8684_v40 }
 0x19b   :  { %v7395_v16 = vsub.f32 %v8691_v47, %v5739_v1  ;;  %v2797_v62 = vadd.f32 %v2795_v56, %v2793_v38  ;;  %v3004_v43 = vadd.s32 %v3003_v50, %v2999_v57  ;;  %v3068_v23 = vor.u32 8388608, %v3067_v48 }
 0x19c   :  { %v2893_v42 = vsel %vm129_vm0, %v8692_v13, %v2892_v55  ;;  %v2803_v51 = vmul.f32 %v2791_v46, %v8685_v2  ;;  %v2826_v25 = vmul.f32 6.2831855, %v2824_v19  ;;  %v3077_v9 = vshll.u32 %v8653_v52, %v3074_v28 }
 0x19d   :  { %v2799_v30 = vadd.f32 %v2797_v62, %v8683_v4  ;;  %v3005_v24 = vadd.s32 536870912, %v3004_v43  ;;  %v3078_v35 = vshrl.u32 %v8654_v5, %v7389_v6  ;;  %v3080_v58 = vshll.u32 %v8654_v5, %v3074_v28 }
 0x19e   :  { %v2828_v36 = vsub.f32 %v2820_v32, %v2826_v25  ;;  %v3081_v39 = vshrl.u32 %v8655_v27, %v7389_v6  ;;  %v3083_v31 = vshll.u32 %v8655_v27, %v3074_v28  ;;  %v3086_v18 = vshll.u32 %v8656_v12, %v3074_v28 }
 0x19f   :  { %v2810_v11 = vmul.f32 1.442695, %v2799_v30  ;;  %v2835_v8 = vadd.f32 %v2799_v30, %v7317_v0  ;;  %v7414_v57 = vshrl.u32 %v3005_v24, 30  ;;  %v3084_v41 = vshrl.u32 %v8656_v12, %v7389_v6 }
 0x1a0   :  { %v5651_v46 = vadd.f32 -3.1415927, %v2828_v36  ;;  %v7418_v44 = vshrl.u32 %v3072_v21, 5  ;;  %v3087_v32 = vshrl.u32 %v8636_v33, %v7389_v6  ;;  %v3089_v48 = vshll.u32 %v8636_v33, %v3074_v28 }
 0x1a1   :  { %5724 = vpow2.f32 %v2810_v11  ;;  %v2836_v22 = vrot.slane %v2835_v8, 4  ;;  %v2898_v17 = vadd.f32 %v2893_v42, %v7088_v63  ;;  %v3007_v38 = vshll.u32 %v7414_v57, 30 }
 0x1a2   :  { %v2805_v0 = vadd.f32 %v2803_v51, %v2801_v60  ;;  %2833 = vst [vmem:[#allocation7 + $0x40] sm:$0xff] %v5651_v46  ;;  %v3079_v56 = vor.u32 %v3078_v35, %v3077_v9  ;;  %v3088_v1 = vor.u32 %v3087_v32, %v3086_v18  ;;  %v3090_v61 = vshrl.u32 %v8637_v37, %v7389_v6 }
 0x1a3   :  { %v2837_v21 = vadd.f32 %v2836_v22, %v2835_v8  ;;  %v7427_v20 = vsub.s32 %v3004_v43, %v3007_v38  ;;  %v3082_v47 = vor.u32 %v3081_v39, %v3080_v58  ;;  %v3085_v19 = vor.u32 %v3084_v41, %v3083_v31  ;;  %v2900_v43 = vld [vmem:[#allocation2 + $0xb0] sm:$0xff] }
 0x1a4   :  { %v3091_v50 = vor.u32 %v3090_v61, %v3089_v48  ;;  %vm3092_vm13 = vcmp.lt.s32.totalorder %v7418_v44, 1  ;;  %vm3095_vm1 = vcmp.lt.s32.totalorder %v7418_v44, 4  ;;  %v7431_v63 = vshll.u32 %v3068_v23, 8 }
 0x1a5   :  { %v2838_v28 = vrot.slane %v2837_v21, 2  ;;  %vm3009_vm15 = vcmp.lt.s32.totalorder %v7427_v20, 0  ;;  %v3010_v62 = vsub.s32 0, %v7427_v20  ;;  %vm3094_vm5 = vcmp.lt.s32.totalorder %v7418_v44, 3 }
 0x1a6   :  { %v1483_v13 = vadd.f32 %v1482_v3, %v7168_v26  ;;  %v2807_v42 = vadd.f32 %v2805_v0, %v8686_v54  ;;  %vm3093_vm12 = vcmp.lt.s32.totalorder %v7418_v44, 2  ;;  %v3101_v60 = vsel %vm3095_vm1, %v3088_v1, 920167782 }
 0x1a7   :  { %v5725_v51 = vpop.eup %5724  ;;  %v2839_v23 = vadd.f32 %v2838_v28, %v2837_v21  ;;  %v3011_v25 = vsel %vm3009_vm15, %v3010_v62, %v7427_v20  ;;  %v3100_v9 = vsel %vm3092_vm13, %v3079_v56, %v3082_v47  ;;  %v3104_v30 = vsel %vm3092_vm13, %v3082_v47, %v3085_v19 }
 0x1a8   :  { %v2813_v26 = vmul.f32 %v5725_v51, %v7395_v16  ;;  %v3012_v3 = vclz %v3011_v25  ;;  %v3102_v24 = vsel %vm3094_vm5, %v3085_v19, %v3101_v60  ;;  %v3105_v35 = vsel %vm3095_vm1, %v3091_v50, 1326507024  ;;  %v5740_v50 = vld [vmem:[#allocation2 + $0x48] sm:$0xff] }
 0x1a9   :  { %v2840_v58 = vrot.slane %v2839_v23, 1  ;;  %v2902_v36 = vsub.f32 %v2898_v17, %v2900_v43  ;;  %v3106_v39 = vsel %vm3094_vm5, %v3088_v1, %v3105_v35  ;;  %v3109_v31 = vand.u32 65535, %v7431_v63 }
 0x1aa   :  { %v2815_v18 = vadd.f32 %v2813_v26, %v2807_v42  ;;  %v5654_v11 = vadd.s32 4294967294, %v3012_v3  ;;  %v3107_v8 = vsel %vm3093_vm12, %v3104_v30, %v3106_v39  ;;  %v3110_v41 = vshrl.u32 %v7431_v63, 16 }
 0x1ab   :  { %v2841_v46 = vadd.f32 %v2840_v58, %v2839_v23  ;;  %v3103_v32 = vsel %vm3093_vm12, %v3100_v9, %v3102_v24  ;;  %v3111_v48 = vand.u32 65535, %v3107_v8  ;;  %v3112_v22 = vshrl.u32 %v3107_v8, 16 }
 0x1ac   :  { %v2817_v17 = vsub.f32 %v2815_v18, %v7395_v16  ;;  %vm5655_vm10 = vcmp.lt.s32.totalorder %v5654_v11, 0  ;;  %v3076_v38 = vshrl.u32 %v8653_v52, %v7389_v6  ;;  %v3097_v61 = vsel %vm3095_vm1, %v3085_v19, 2102212464 }
 0x1ad   :  { %v7462_v0 = vadd.f32 %v2841_v46, %v1483_v13  ;;  %v3015_v1 = vsel %vm5655_vm10, 0, %v5654_v11  ;;  %v3114_v21 = vmul.u32 %v3112_v22, %v3109_v31  ;;  %v3133_v42 = vand.u32 65535, %v3103_v32 }
 0x1ae   :  { %v2819_v28 = vadd.f32 %v5740_v50, %v2817_v17  ;;  %v3020_v62 = vsub.s32 4294967266, %v3015_v1  ;;  %v3134_v43 = vshrl.u32 %v3103_v32, 16  ;;  %v7467_v60 = vsub.f32 %v2902_v36, %v7160_v10 }
 0x1af   :  { %8693 = vst [vmem:[#allocation21_spill] sm:$0xff] %v7462_v0  ;;  %v3113_v16 = vmul.u32 %v3111_v48, %v3109_v31  ;;  %v3115_v51 = vmul.u32 %v3111_v48, %v3110_v41  ;;  %v3000_v6 = vadd.s32 %v7372_v15, %v7370_v34  ;;  %v3016_v13 = vsub.s32 32, %v3015_v1 }
 0x1b0   :  { %v2821_v23 = vadd.f32 3.1415927, %v2819_v28  ;;  %v3096_v25 = vsel %vm3092_vm13, %v3076_v38, %v3079_v56  ;;  %v3098_v19 = vsel %vm3094_vm5, %v3082_v47, %v3097_v61  ;;  %v3116_v9 = vmul.u32 %v3112_v22, %v3110_v41 }
 0x1b1   :  { %v3117_v30 = vshll.u32 %v3114_v21, 16  ;;  %v3119_v26 = vshll.u32 %v3115_v51, 16  ;;  %v3021_v24 = vadd.s32 127, %v3020_v62  ;;  %v3135_v35 = vmul.u32 %v3133_v42, %v3109_v31 }
 0x1b2   :  { %v2823_v3 = vmul.f32 0.15915494, %v2821_v23  ;;  %v3136_v58 = vmul.u32 %v3134_v43, %v3109_v31  ;;  %v3017_v36 = vshll.u32 %v7427_v20, %v3015_v1  ;;  %v3137_v18 = vmul.u32 %v3133_v42, %v3110_v41 }
 0x1b3   :  { %vm3121_vm3 = vc.u32 %v3113_v16, %v3117_v30  ;;  %v3123_v39 = vadd.s32 %v3117_v30, %v3113_v16  ;;  %v3018_v15 = vshrl.u32 %v3000_v6, %v3016_v13  ;;  %v3118_v11 = vshrl.u32 %v3114_v21, 16 }
 0x1b4   :  { %v2825_v34 = vfloor.f32 %v2823_v3  ;;  %v3122_v56 = vsel %vm3121_vm3, 1, %v8650_v59  ;;  %v3138_v47 = vmul.u32 %v3134_v43, %v3110_v41  ;;  %v3139_v46 = vshll.u32 %v3136_v58, 16 }
 0x1b5   :  { %v3124_v8 = vadd.s32 %v3122_v56, %v3116_v9  ;;  %vm3125_vm6 = vc.u32 %v3123_v39, %v3119_v26  ;;  %v3022_v48 = vshll.u32 %v3021_v24, 23  ;;  %v3141_v17 = vshll.u32 %v3137_v18, 16 }
 0x1b6   :  { %v2827_v32 = vmul.f32 6.2831855, %v2825_v34  ;;  %v3126_v22 = vsel %vm3125_vm6, 1, %v8650_v59  ;;  %v3120_v31 = vshrl.u32 %v3115_v51, 16  ;;  %vm3143_vm14 = vc.u32 %v3135_v35, %v3139_v46  ;;  %v2901_v34 = vld [vmem:[#allocation2 + $0xb8] sm:$0xff] }
 0x1b7   :  { %v3128_v38 = vadd.s32 %v3126_v22, %v3124_v8  ;;  %v3145_v20 = vadd.s32 %v3139_v46, %v3135_v35  ;;  %v3019_v61 = vor.u32 %v3018_v15, %v3017_v36  ;;  %v3144_v50 = vsel %vm3143_vm14, 1, %v8650_v59 }
 0x1b8   :  { %v2829_v1 = vsub.f32 %v2821_v23, %v2827_v32  ;;  %v3217_v21 = vand.u32 2139095040, %v7467_v60  ;;  %v3140_v62 = vshrl.u32 %v3136_v58, 16  ;;  %v3146_v42 = vadd.s32 %v3144_v50, %v3138_v47 }
 0x1b9   :  { %v3129_v28 = vadd.s32 %v3128_v38, %v3118_v11  ;;  %vm3147_vm4 = vc.u32 %v3145_v20, %v3141_v17  ;;  %v3023_v43 = vor.u32 4788187, %v3022_v48  ;;  %v8694_v51 = vrot.slane %v7160_v10, 1 }
 0x1ba   :  { %v5652_v41 = vadd.f32 -3.1415927, %v2829_v1  ;;  %v3148_v16 = vsel %vm3147_vm4, 1, %v8650_v59  ;;  %v3218_v6 = vshrl.u32 %v3217_v21, 23  ;;  %v3142_v13 = vshrl.u32 %v3137_v18, 16 }
 0x1bb   :  { %v2897_v23 = vsel %vm129_vm0, %v2892_v55, %v8694_v51  ;;  %v3150_v9 = vadd.s32 %v3148_v16, %v3146_v42  ;;  %v7486_v30 = vadd.s32 %v3129_v28, %v3120_v31  ;;  %v7488_v26 = vadd.s32 %v3145_v20, %v3141_v17  ;;  %v7515_v28 = vld [vmem:[#allocation2 + $0x180] sm:$0xff] }
 0x1bc   :  { %2834 = vst [vmem:[#allocation7 + $0x48] sm:$0xff] %v5652_v41  ;;  %v5659_v3 = vadd.s32 4294967169, %v3218_v6  ;;  %v3099_v24 = vsel %vm3093_vm12, %v3096_v25, %v3098_v19  ;;  %v2899_v58 = vadd.f32 %v2897_v23, %v7129_v49  ;;  %v3024_v36 = vand.u32 2147483647, %v3023_v43 }
 0x1bd   :  { %v3151_v35 = vadd.s32 %v3150_v9, %v3140_v62  ;;  %v3026_v10 = vcvt.s32.f32 %v3019_v61  ;;  %v3153_v55 = vmul.u32 %v7431_v63, %v3099_v24  ;;  %vm3155_vm7 = vc.u32 %v7486_v30, %v7488_v26  ;;  %v7517_v62 = vld [vmem:[#allocation2 + $0x188] sm:$0xff] }
 0x1be   :  { %v3224_v39 = vadd.s32 1, %v5659_v3  ;;  %v2903_v56 = vsub.f32 %v2899_v58, %v2901_v34  ;;  %v8619_v49 = vand.u32 2147483647, %v7467_v60  ;;  %vm2908_vm8 = vcmp.lt.s32.totalorder %v7097_v14, 0 }
 0x1bf   :  { %v3152_v15 = vadd.s32 %v3151_v35, %v3142_v13  ;;  %v3027_v8 = vmul.f32 %v3026_v10, %v3024_v36  ;;  %v8695_v42 = vand.u32 2147483647, %v7097_v14  ;;  %v2851_v58 = vrot.slane %v7515_v28, 1 }
 0x1c0   :  { %vm3225_vm9 = vcmp.gt.s32.totalorder %v3224_v39, 0  ;;  %v7498_v46 = vsub.f32 %v2903_v56, %v7364_v45  ;;  %v3221_v20 = vand.u32 8388607, %v8619_v49  ;;  %v2852_v36 = vrot.slane %v7517_v62, 1 }
 0x1c1   :  { %v3156_v18 = vadd.s32 1, %v3152_v15  ;;  %v3226_v11 = vsel %vm3225_vm9, %v3224_v39, 0  ;;  %v3028_v63 = vxor.u32 2147483648, %v3027_v8  ;;  %vm7521_vm2 = vcmp.le.f32.partialorder %v8695_v42, 0.7853982 }
 0x1c2   :  { %v3228_v44 = vand.u32 31, %v3226_v11  ;;  %v7509_v1 = vshrl.u32 %v3226_v11, 5  ;;  %v3371_v6 = vand.u32 2139095040, %v7498_v46  ;;  %v3222_v24 = vor.u32 8388608, %v3221_v20 }
 0x1c3   :  { %v3157_v25 = vsel %vm3155_vm7, %v3156_v18, %v3152_v15  ;;  %v3029_v43 = vsel %vm2908_vm8, %v3028_v63, %v3027_v8  ;;  %v3030_v11 = vsub.s32 4, %v7414_v57  ;;  %vm3062_vm10 = vcmp.lt.s32.totalorder %v7139_v29, 0 }
 0x1c4   :  { %v3158_v19 = vadd.s32 %v3157_v25, %v3153_v55  ;;  %v3229_v47 = vsub.s32 32, %v3228_v44  ;;  %v3231_v48 = vshll.u32 %v8653_v52, %v3228_v44  ;;  %v3234_v17 = vshll.u32 %v8654_v5, %v3228_v44 }
 0x1c5   :  { %v3240_v45 = vshll.u32 %v8656_v12, %v3228_v44  ;;  %v3237_v61 = vshll.u32 %v8655_v27, %v3228_v44  ;;  %v3243_v13 = vshll.u32 %v8636_v33, %v3228_v44  ;;  %vm3246_vm11 = vcmp.lt.s32.totalorder %v7509_v1, 1 }
 0x1c6   :  { %v3159_v32 = vadd.s32 536870912, %v3158_v19  ;;  %v3232_v22 = vshrl.u32 %v8654_v5, %v3229_v47  ;;  %v3235_v31 = vshrl.u32 %v8655_v27, %v3229_v47  ;;  %v3238_v50 = vshrl.u32 %v8656_v12, %v3229_v47 }
 0x1c7   :  { %v3241_v21 = vshrl.u32 %v8636_v33, %v3229_v47  ;;  %v3244_v9 = vshrl.u32 %v8637_v37, %v3229_v47  ;;  %v7537_v10 = vsel %vm7521_vm2, %v7097_v14, %v3029_v43  ;;  %vm3248_vm1 = vcmp.lt.s32.totalorder %v7509_v1, 3 }
 0x1c8   :  { %v7505_v38 = vshrl.u32 %v3159_v32, 30  ;;  %v3233_v51 = vor.u32 %v3232_v22, %v3231_v48  ;;  %v3236_v23 = vor.u32 %v3235_v31, %v3234_v17  ;;  %v3239_v39 = vor.u32 %v3238_v50, %v3237_v61 }
 0x1c9   :  { %v3242_v35 = vor.u32 %v3241_v21, %v3240_v45  ;;  %v3245_v15 = vor.u32 %v3244_v9, %v3243_v13  ;;  %vm3247_vm15 = vcmp.lt.s32.totalorder %v7509_v1, 2  ;;  %vm3249_vm5 = vcmp.lt.s32.totalorder %v7509_v1, 4 }
 0x1ca   :  { %v3161_v16 = vshll.u32 %v7505_v38, 30  ;;  %v3254_v55 = vsel %vm3246_vm11, %v3233_v51, %v3236_v23  ;;  %v3372_v18 = vshrl.u32 %v3371_v6, 23  ;;  %v7547_v44 = vshll.u32 %v3222_v24, 8 }
 0x1cb   :  { %v3255_v8 = vsel %vm3249_vm5, %v3242_v35, 920167782  ;;  %v7551_v25 = vmul.f32 %v7537_v10, %v7537_v10  ;;  %v3258_v32 = vsel %vm3246_vm11, %v3236_v23, %v3239_v39  ;;  %v3154_v48 = vadd.s32 %v7488_v26, %v7486_v30 }
 0x1cc   :  { %v3162_v3 = vsub.s32 %v3158_v19, %v3161_v16  ;;  %v3256_v63 = vsel %vm3248_vm1, %v3239_v39, %v3255_v8  ;;  %v3259_v17 = vsel %vm3249_vm5, %v3245_v15, 1326507024  ;;  %v8620_v31 = vand.u32 2147483647, %v7498_v46 }
 0x1cd   :  { %v3257_v22 = vsel %vm3247_vm15, %v3254_v55, %v3256_v63  ;;  %v7565_v20 = vmul.f32 -0.001358992, %v7551_v25  ;;  %v3260_v61 = vsel %vm3248_vm1, %v3242_v35, %v3259_v17  ;;  %v5662_v50 = vadd.s32 4294967169, %v3372_v18 }
 0x1ce   :  { %vm3163_vm13 = vcmp.lt.s32.totalorder %v3162_v3, 0  ;;  %v3164_v34 = vsub.s32 0, %v3162_v3  ;;  %v3230_v21 = vshrl.u32 %v8653_v52, %v3229_v47  ;;  %v3261_v30 = vsel %vm3247_vm15, %v3258_v32, %v3260_v61 }
 0x1cf   :  { %v3263_v26 = vand.u32 65535, %v7547_v44  ;;  %v3288_v42 = vshrl.u32 %v3257_v22, 16  ;;  %v3042_v43 = vmul.f32 -0.00019511016, %v7551_v25  ;;  %v3264_v16 = vshrl.u32 %v7547_v44, 16 }
 0x1d0   :  { %v3165_v56 = vsel %vm3163_vm13, %v3164_v34, %v3162_v3  ;;  %v3265_v6 = vand.u32 65535, %v3261_v30  ;;  %v3251_v9 = vsel %vm3249_vm5, %v3239_v39, 2102212464  ;;  %v3266_v24 = vshrl.u32 %v3261_v30, 16 }
 0x1d1   :  { %v3166_v19 = vclz %v3165_v56  ;;  %v3287_v35 = vand.u32 65535, %v3257_v22  ;;  %v3378_v55 = vadd.s32 1, %v5662_v50  ;;  %v3250_v18 = vsel %vm3246_vm11, %v3230_v21, %v3233_v51 }
 0x1d2   :  { %v3267_v56 = vmul.u32 %v3265_v6, %v3263_v26  ;;  %v3268_v8 = vmul.u32 %v3266_v24, %v3263_v26  ;;  %v3252_v17 = vsel %vm3248_vm1, %v3236_v23, %v3251_v9  ;;  %v3270_v61 = vmul.u32 %v3266_v24, %v3264_v16 }
 0x1d3   :  { %v5657_v45 = vadd.s32 4294967294, %v3166_v19  ;;  %v3290_v19 = vmul.u32 %v3288_v42, %v3263_v26  ;;  %v3289_v30 = vmul.u32 %v3287_v35, %v3263_v26  ;;  %v3291_v22 = vmul.u32 %v3287_v35, %v3264_v16 }
 0x1d4   :  { %v3271_v39 = vshll.u32 %v3268_v8, 16  ;;  %vm3379_vm3 = vcmp.gt.s32.totalorder %v3378_v55, 0  ;;  %v3292_v21 = vmul.u32 %v3288_v42, %v3264_v16 }
 0x1d5   :  { %vm5658_vm12 = vcmp.lt.s32.totalorder %v5657_v45, 0  ;;  %v3293_v49 = vshll.u32 %v3290_v19, 16  ;;  %v3295_v23 = vshll.u32 %v3291_v22, 16 }
 0x1d6   :  { %v3169_v13 = vsel %vm5658_vm12, 0, %v5657_v45  ;;  %v3269_v45 = vmul.u32 %v3265_v6, %v3264_v16  ;;  %vm3275_vm6 = vc.u32 %v3267_v56, %v3271_v39  ;;  %v3277_v51 = vadd.s32 %v3271_v39, %v3267_v56 }
 0x1d7   :  { %v3170_v34 = vsub.s32 32, %v3169_v13  ;;  %v3171_v47 = vshll.u32 %v3162_v3, %v3169_v13  ;;  %v3174_v15 = vsub.s32 4294967266, %v3169_v13  ;;  %v3272_v6 = vshrl.u32 %v3268_v8, 16 }
 0x1d8   :  { %v3273_v13 = vshll.u32 %v3269_v45, 16  ;;  %vm3297_vm4 = vc.u32 %v3289_v30, %v3293_v49  ;;  %v3274_v16 = vshrl.u32 %v3269_v45, 16  ;;  %v3380_v8 = vsel %vm3379_vm3, %v3378_v55, 0 }
 0x1d9   :  { %v3172_v63 = vshrl.u32 %v3154_v48, %v3170_v34  ;;  %v3175_v32 = vadd.s32 127, %v3174_v15  ;;  %v3276_v15 = vsel %vm3275_vm6, 1, %v8650_v59  ;;  %v3298_v35 = vsel %vm3297_vm4, 1, %v8650_v59 }
 0x1da   :  { %v3278_v9 = vadd.s32 %v3276_v15, %v3270_v61  ;;  %vm3279_vm14 = vc.u32 %v3277_v51, %v3273_v13  ;;  %v3294_v39 = vshrl.u32 %v3290_v19, 16  ;;  %v3382_v13 = vand.u32 31, %v3380_v8 }
 0x1db   :  { %v3173_v3 = vor.u32 %v3172_v63, %v3171_v47  ;;  %v3176_v50 = vshll.u32 %v3175_v32, 23  ;;  %v3280_v24 = vsel %vm3279_vm14, 1, %v8650_v59  ;;  %v3299_v47 = vadd.s32 %v3293_v49, %v3289_v30 }
 0x1dc   :  { %v8698_v63 = vand.u32 2147483647, %v7139_v29  ;;  %v3282_v56 = vadd.s32 %v3280_v24, %v3278_v9  ;;  %v3300_v32 = vadd.s32 %v3298_v35, %v3292_v21  ;;  %v3253_v49 = vsel %vm3247_vm15, %v3250_v18, %v3252_v17 }
 0x1dd   :  { %v3177_v48 = vor.u32 4788187, %v3176_v50  ;;  %v3180_v34 = vcvt.s32.f32 %v3173_v3  ;;  %vm3301_vm9 = vc.u32 %v3299_v47, %v3295_v23  ;;  %v3375_v3 = vand.u32 8388607, %v8620_v31 }
 0x1de   :  { %vm7587_vm7 = vcmp.le.f32.partialorder %v8698_v63, 0.7853982  ;;  %v3283_v30 = vadd.s32 %v3282_v56, %v3272_v6  ;;  %v3302_v50 = vsel %vm3301_vm9, 1, %v8650_v59  ;;  %v7597_v45 = vadd.s32 %v3299_v47, %v3295_v23 }
 0x1df   :  { %v3178_v26 = vand.u32 2147483647, %v3177_v48  ;;  %v3296_v48 = vshrl.u32 %v3291_v22, 16  ;;  %v3304_v21 = vadd.s32 %v3302_v50, %v3300_v32  ;;  %v3036_v55 = vadd.f32 0.041655596, %v7565_v20 }
 0x1e0   :  { %v7600_v19 = vadd.s32 %v3283_v30, %v3274_v16  ;;  %v7602_v15 = vsub.s32 32, %v3382_v13  ;;  %v3307_v1 = vmul.u32 %v7547_v44, %v3253_v49  ;;  %v7605_v18 = vshrl.u32 %v3380_v8, 5 }
 0x1e1   :  { %v3181_v61 = vmul.f32 %v3180_v34, %v3178_v26  ;;  %v3043_v34 = vadd.f32 0.008332121, %v3042_v43  ;;  %v3305_v9 = vadd.s32 %v3304_v21, %v3294_v39  ;;  %v3385_v17 = vshll.u32 %v8653_v52, %v3382_v13 }
 0x1e2   :  { %v3388_v23 = vshll.u32 %v8654_v5, %v3382_v13  ;;  %v3391_v6 = vshll.u32 %v8655_v27, %v3382_v13  ;;  %v3394_v20 = vshll.u32 %v8656_v12, %v3382_v13  ;;  %vm3309_vm11 = vc.u32 %v7600_v19, %v7597_v45 }
 0x1e3   :  { %v3182_v51 = vxor.u32 2147483648, %v3181_v61  ;;  %v3306_v43 = vadd.s32 %v3305_v9, %v3296_v48  ;;  %v3386_v44 = vshrl.u32 %v8654_v5, %v7602_v15  ;;  %v3389_v26 = vshrl.u32 %v8655_v27, %v7602_v15 }
 0x1e4   :  { %v3392_v24 = vshrl.u32 %v8656_v12, %v7602_v15  ;;  %v3395_v35 = vshrl.u32 %v8636_v33, %v7602_v15  ;;  %v3397_v47 = vshll.u32 %v8636_v33, %v3382_v13  ;;  %v3398_v63 = vshrl.u32 %v8637_v37, %v7602_v15 }
 0x1e5   :  { %v3183_v22 = vsel %vm3062_vm10, %v3182_v51, %v3181_v61  ;;  %v3031_v16 = vsel %vm2908_vm8, %v3030_v11, %v7414_v57  ;;  %v3044_v56 = vmul.f32 %v3043_v34, %v7551_v25  ;;  %v3310_v32 = vadd.s32 1, %v3306_v43 }
 0x1e6   :  { %v3376_v8 = vor.u32 8388608, %v3375_v3  ;;  %v3037_v61 = vmul.f32 %v3036_v55, %v7551_v25  ;;  %v7633_v39 = vor.u32 %v3386_v44, %v3385_v17  ;;  %v7635_v49 = vor.u32 %v3389_v26, %v3388_v23 }
 0x1e7   :  { %v3396_v30 = vor.u32 %v3395_v35, %v3394_v20  ;;  %v7640_v50 = vsel %vm7587_vm7, %v7139_v29, %v3183_v22  ;;  %v3311_v57 = vsel %vm3309_vm11, %v3310_v32, %v3306_v43  ;;  %v7645_v11 = vor.u32 %v3392_v24, %v3391_v6  ;;  %v7701_v24 = vld [vmem:[#allocation2 + $0x1d0] sm:$0xff]  ;;  %v7703_v35 = vld [vmem:[#allocation2 + $0x1d8] sm:$0xff] }
 0x1e8   :  { %vm3400_vm8 = vcmp.lt.s32.totalorder %v7605_v18, 1  ;;  %v3312_v3 = vadd.s32 %v3311_v57, %v3307_v1  ;;  %v3399_v13 = vor.u32 %v3398_v63, %v3397_v47  ;;  %vm3402_vm13 = vcmp.lt.s32.totalorder %v7605_v18, 3 }
 0x1e9   :  { %vm3403_vm1 = vcmp.lt.s32.totalorder %v7605_v18, 4  ;;  %v7655_v51 = vsel %vm129_vm0, %v2851_v58, %v2852_v36  ;;  %v3045_v48 = vadd.f32 -0.16666654, %v3044_v56  ;;  %vm3401_vm15 = vcmp.lt.s32.totalorder %v7605_v18, 2 }
 0x1ea   :  { %v7658_v21 = vshll.u32 %v3376_v8, 8  ;;  %v7665_v55 = vsel %vm129_vm0, %v2852_v36, %v2851_v58  ;;  %v3313_v34 = vadd.s32 536870912, %v3312_v3  ;;  %v3408_v9 = vsel %vm3400_vm8, %v7633_v39, %v7635_v49 }
 0x1eb   :  { %v3409_v1 = vsel %vm3403_vm1, %v3396_v30, 920167782  ;;  %v7675_v17 = vsel %vm7521_vm2, 0, %v3031_v16  ;;  %v3038_v22 = vadd.f32 -0.4999988, %v3037_v61  ;;  %v7679_v62 = vmul.f32 %v7640_v50, %v7640_v50 }
 0x1ec   :  { %v3410_v58 = vsel %vm3402_vm13, %v7645_v11, %v3409_v1  ;;  %v7684_v36 = vshrl.u32 %v3313_v34, 30  ;;  %v3412_v41 = vsel %vm3400_vm8, %v7635_v49, %v7645_v11  ;;  %v3413_v6 = vsel %vm3403_vm1, %v3399_v13, 1326507024 }
 0x1ed   :  { %v3411_v23 = vsel %vm3401_vm15, %v3408_v9, %v3410_v58  ;;  %v3046_v20 = vmul.f32 %v3045_v48, %v7551_v25  ;;  %v7696_v43 = vand.u32 3, %v7675_v17  ;;  %v3414_v44 = vsel %vm3402_vm13, %v3396_v30, %v3413_v6 }
 0x1ee   :  { %v3417_v26 = vand.u32 65535, %v7658_v21  ;;  %v3315_v47 = vshll.u32 %v7684_v36, 30  ;;  %v3415_v63 = vsel %vm3401_vm15, %v3412_v41, %v3414_v44  ;;  %v3418_v16 = vshrl.u32 %v7658_v21, 16 }
 0x1ef   :  { %v3442_v56 = vshrl.u32 %v3411_v23, 16  ;;  %v3189_v32 = vmul.f32 -0.001358992, %v7679_v62  ;;  %v3196_v8 = vmul.f32 -0.00019511016, %v7679_v62  ;;  %v3419_v61 = vand.u32 65535, %v3415_v63 }
 0x1f0   :  { %v3420_v30 = vshrl.u32 %v3415_v63, 16  ;;  %v7712_v57 = vmul.f32 %v3038_v22, %v7551_v25  ;;  %v3316_v13 = vsub.s32 %v3312_v3, %v3315_v47  ;;  %v3384_v9 = vshrl.u32 %v8653_v52, %v7602_v15 }
 0x1f1   :  { %v3421_v1 = vmul.u32 %v3419_v61, %v3417_v26  ;;  %v3441_v58 = vand.u32 65535, %v3411_v23  ;;  %v7718_v41 = vmul.u32 %v3442_v56, %v3417_v26  ;;  %v3423_v31 = vmul.u32 %v3419_v61, %v3418_v16 }
 0x1f2   :  { %vm3317_vm2 = vcmp.lt.s32.totalorder %v3316_v13, 0  ;;  %v3318_v6 = vsub.s32 0, %v3316_v13  ;;  %v3422_v44 = vmul.u32 %v3420_v30, %v3417_v26  ;;  %v7720_v63 = vadd.f32 1.0, %v3046_v20 }
 0x1f3   :  { %v3190_v3 = vadd.f32 0.041655596, %v3189_v32  ;;  %v3197_v22 = vadd.f32 0.008332121, %v3196_v8  ;;  %v3424_v48 = vmul.u32 %v3420_v30, %v3418_v16  ;;  %v3427_v0 = vshll.u32 %v3423_v31, 16 }
 0x1f4   :  { %v3319_v47 = vsel %vm3317_vm2, %v3318_v6, %v3316_v13  ;;  %v3425_v34 = vshll.u32 %v3422_v44, 16  ;;  %v3308_v15 = vadd.s32 %v7597_v45, %v7600_v19  ;;  %v3404_v54 = vsel %vm3400_vm8, %v3384_v9, %v7633_v39 }
 0x1f5   :  { %v3320_v23 = vclz %v3319_v47  ;;  %v3445_v4 = vmul.u32 %v3441_v58, %v3418_v16  ;;  %v3443_v61 = vmul.u32 %v3441_v58, %v3417_v26  ;;  %v3447_v25 = vshll.u32 %v7718_v41, 16 }
 0x1f6   :  { %vm3429_vm5 = vc.u32 %v3421_v1, %v3425_v34  ;;  %v3431_v20 = vadd.s32 %v3425_v34, %v3421_v1  ;;  %v3191_v32 = vmul.f32 %v3190_v3, %v7679_v62  ;;  %v3198_v8 = vmul.f32 %v3197_v22, %v7679_v62 }
 0x1f7   :  { %v5660_v30 = vadd.s32 4294967294, %v3320_v23  ;;  %v3430_v6 = vsel %vm3429_vm5, 1, %v8650_v59  ;;  %v3405_v45 = vsel %vm3403_vm1, %v7645_v11, 2102212464  ;;  %v3426_v19 = vshrl.u32 %v3422_v44, 16 }
 0x1f8   :  { %v3432_v47 = vadd.s32 %v3430_v6, %v3424_v48  ;;  %vm3433_vm12 = vc.u32 %v3431_v20, %v3427_v0  ;;  %v3446_v26 = vmul.u32 %v3442_v56, %v3418_v16  ;;  %v3449_v34 = vshll.u32 %v3445_v4, 16  ;;  %v4218_v16 = vld [vmem:[#allocation2 + $0xd0] sm:$0xff] }
 0x1f9   :  { %vm5661_vm3 = vcmp.lt.s32.totalorder %v5660_v30, 0  ;;  %v3434_v39 = vsel %vm3433_vm12, 1, %v8650_v59  ;;  %vm3451_vm6 = vc.u32 %v3443_v61, %v3447_v25  ;;  %v3453_v58 = vadd.s32 %v3447_v25, %v3443_v61 }
 0x1fa   :  { %v3323_v9 = vsel %vm5661_vm3, 0, %v5660_v30  ;;  %v3436_v1 = vadd.s32 %v3434_v39, %v3432_v47  ;;  %v3199_v3 = vadd.f32 -0.16666654, %v3198_v8  ;;  %v3428_v40 = vshrl.u32 %v3423_v31, 16  ;;  %v7742_v8 = vld [vmem:[#allocation2 + $0x80] sm:$0xff] }
 0x1fb   :  { %v3324_v22 = vsub.s32 32, %v3323_v9  ;;  %v3325_v23 = vshll.u32 %v3316_v13, %v3323_v9  ;;  %v3328_v2 = vsub.s32 4294967266, %v3323_v9  ;;  %v3448_v11 = vshrl.u32 %v7718_v41, 16  ;;  %v7756_v9 = vld [vmem:[#allocation2 + $0xe0] sm:$0xff] }
 0x1fc   :  { %v3437_v53 = vadd.s32 %v3436_v1, %v3426_v19  ;;  %v3452_v48 = vsel %vm3451_vm6, 1, %v8650_v59  ;;  %vm3455_vm14 = vc.u32 %v3453_v58, %v3449_v34  ;;  %v3192_v56 = vadd.f32 -0.4999988, %v3191_v32 }
 0x1fd   :  { %v3326_v0 = vshrl.u32 %v3308_v15, %v3324_v22  ;;  %v3329_v44 = vadd.s32 127, %v3328_v2  ;;  %v3454_v20 = vadd.s32 %v3452_v48, %v3446_v26  ;;  %v3406_v25 = vsel %vm3402_vm13, %v7635_v49, %v3405_v45 }
 0x1fe   :  { %v3450_v61 = vshrl.u32 %v3445_v4, 16  ;;  %v3456_v13 = vsel %vm3455_vm14, 1, %v8650_v59  ;;  %v8701_v6 = vrot.slane %v7703_v35, 1  ;;  %v8702_v2 = vrot.slane %v7701_v24, 1 }
 0x1ff   :  { %v3327_v31 = vor.u32 %v3326_v0, %v3325_v23  ;;  %v3330_v30 = vshll.u32 %v3329_v44, 23  ;;  %v3458_v41 = vadd.s32 %v3456_v13, %v3454_v20  ;;  %v3200_v32 = vmul.f32 %v3199_v3, %v7679_v62 }
 0x200   :  { %v4231_v15 = vsel %vm129_vm0, %v8702_v2, %v8701_v6  ;;  %v7750_v19 = vadd.s32 %v3437_v53, %v3428_v40  ;;  %v7752_v47 = vadd.s32 %v3453_v58, %v3449_v34  ;;  %v3407_v39 = vsel %vm3401_vm15, %v3404_v54, %v3406_v25 }
 0x201   :  { %v4236_v4 = vadd.f32 %v4231_v15, %v4218_v16  ;;  %v3331_v49 = vor.u32 4788187, %v3330_v30  ;;  %v3334_v45 = vcvt.s32.f32 %v3327_v31  ;;  %v3459_v26 = vadd.s32 %v3458_v41, %v3448_v11  ;;  %v5741_v30 = vld [vmem:[#allocation2 + $0x90] sm:$0xff] }
 0x202   :  { %v7760_v1 = vadd.f32 %v7655_v51, %v7742_v8  ;;  %v7763_v22 = vadd.f32 1.0, %v7712_v57  ;;  %v7767_v53 = vmul.f32 %v7720_v63, %v7537_v10  ;;  %v8703_v18 = vsub.s32 4, %v7505_v38 }
 0x203   :  { %v4240_v40 = vsub.f32 %v4236_v4, %v7756_v9  ;;  %v3193_v34 = vmul.f32 %v3192_v56, %v7679_v62  ;;  %v3332_v58 = vand.u32 2147483647, %v3331_v49  ;;  %v3460_v51 = vadd.s32 %v3459_v26, %v3450_v61 }
 0x204   :  { %v3185_v54 = vsel %vm3062_vm10, %v8703_v18, %v7505_v38  ;;  %v3201_v3 = vadd.f32 1.0, %v3200_v32  ;;  %v3461_v57 = vmul.u32 %v7658_v21, %v3407_v39  ;;  %vm3463_vm4 = vc.u32 %v7750_v19, %v7752_v47  ;;  %v7784_v38 = vld [vmem:[#allocation2 + $0x88] sm:$0xff] }
 0x205   :  { %v7780_v10 = vsub.f32 %v4240_v40, %v7701_v24  ;;  %vm3052_vm9 = vcmp.eq.s32.totalorder %v7696_v43, 0  ;;  %vm3055_vm11 = vcmp.eq.s32.totalorder %v7696_v43, 2  ;;  %v3335_v63 = vmul.f32 %v3334_v45, %v3332_v58 }
 0x206   :  { %v3464_v23 = vadd.s32 1, %v3460_v51  ;;  %v3056_v62 = vxor.u32 2147483648, %v7763_v22  ;;  %v8704_v11 = vand.u32 2147483647, %v7467_v60  ;;  %vm3216_vm8 = vcmp.lt.s32.totalorder %v7467_v60, 0 }
 0x207   :  { %v4267_v48 = vand.u32 2139095040, %v7780_v10  ;;  %v3053_v0 = vxor.u32 2147483648, %v7767_v53  ;;  %v7798_v44 = vsel %vm7587_vm7, 0, %v3185_v54  ;;  %v3336_v20 = vxor.u32 2147483648, %v3335_v63 }
 0x208   :  { %vm7789_vm10 = vcmp.le.f32.partialorder %v8704_v11, 0.7853982  ;;  %v3465_v16 = vsel %vm3463_vm4, %v3464_v23, %v3460_v51  ;;  %v7800_v56 = vadd.f32 1.0, %v3193_v34  ;;  %v7803_v25 = vmul.f32 %v3201_v3, %v7640_v50  ;;  %v4219_v3 = vld [vmem:[#allocation2 + $0xd8] sm:$0xff] }
 0x209   :  { %v3466_v61 = vadd.s32 %v3465_v16, %v3461_v57  ;;  %v4268_v13 = vshrl.u32 %v4267_v48, 23  ;;  %v7807_v31 = vadd.f32 %v7665_v55, %v7784_v38  ;;  %v2862_v41 = vsub.f32 %v7760_v1, %v5741_v30 }
 0x20a   :  { %v3204_v42 = vand.u32 3, %v7798_v44  ;;  %v3337_v6 = vsel %vm3216_vm8, %v3336_v20, %v3335_v63  ;;  %v3338_v2 = vsub.s32 4, %v7684_v36  ;;  %vm3051_vm7 = vcmp.lt.s32.totalorder %v7696_v43, 2 }
 0x20b   :  { %v3340_v50 = vsel %vm7789_vm10, %v7467_v60, %v3337_v6  ;;  %v3467_v15 = vadd.s32 536870912, %v3466_v61  ;;  %v5679_v32 = vadd.s32 4294967169, %v4268_v13  ;;  %v3054_v55 = vsel %vm3052_vm9, %v7763_v22, %v3053_v0 }
 0x20c   :  { %v3057_v4 = vsel %vm3055_vm11, %v3056_v62, %v7767_v53  ;;  %v3342_v49 = vmul.f32 %v3340_v50, %v3340_v50  ;;  %v3207_v45 = vxor.u32 2147483648, %v7803_v25  ;;  %v3210_v39 = vxor.u32 2147483648, %v7800_v56 }
 0x20d   :  { %v7830_v26 = vshrl.u32 %v3467_v15, 30  ;;  %v4274_v1 = vadd.s32 1, %v5679_v32  ;;  %vm3206_vm13 = vcmp.eq.s32.totalorder %v3204_v42, 0  ;;  %vm3209_vm1 = vcmp.eq.s32.totalorder %v3204_v42, 2 }
 0x20e   :  { %v3343_v40 = vmul.f32 -0.001358992, %v3342_v49  ;;  %v3350_v18 = vmul.f32 -0.00019511016, %v3342_v49  ;;  %vm3049_vm15 = vweird.f32 %v7097_v14  ;;  %v3058_v54 = vsel %vm3051_vm7, %v3054_v55, %v3057_v4 }
 0x20f   :  { %v3339_v43 = vsel %vm3216_vm8, %v3338_v2, %v7684_v36  ;;  %v3469_v34 = vshll.u32 %v7830_v26, 30  ;;  %vm3205_vm2 = vcmp.lt.s32.totalorder %v3204_v42, 2  ;;  %v8707_v57 = vrot.slane %v7701_v24, 1 }
 0x210   :  { %v3344_v58 = vadd.f32 0.041655596, %v3343_v40  ;;  %v3351_v51 = vadd.f32 0.008332121, %v3350_v18  ;;  %v8708_v63 = vrot.slane %v7703_v35, 1  ;;  %v3208_v11 = vsel %vm3206_vm13, %v7800_v56, %v3207_v45 }
 0x211   :  { %v3211_v36 = vsel %vm3209_vm1, %v3210_v39, %v7803_v25  ;;  %v7848_v48 = vsub.s32 %v3466_v61, %v3469_v34  ;;  %vm4275_vm5 = vcmp.gt.s32.totalorder %v4274_v1, 0  ;;  %vm3203_vm12 = vweird.f32 %v7139_v29  ;;  %v7869_v34 = vld [vmem:[#allocation2 + $0xe8] sm:$0xff] }
 0x212   :  { %v4235_v23 = vsel %vm129_vm0, %v8708_v63, %v8707_v57  ;;  %v7853_v24 = vsel %vm7789_vm10, 0, %v3339_v43  ;;  %v3345_v20 = vmul.f32 %v3344_v58, %v3342_v49  ;;  %v3352_v16 = vmul.f32 %v3351_v51, %v3342_v49 }
 0x213   :  { %vm3471_vm3 = vcmp.lt.s32.totalorder %v7848_v48, 0  ;;  %v3472_v13 = vsub.s32 0, %v7848_v48  ;;  %v4237_v30 = vadd.f32 %v4235_v23, %v4219_v3  ;;  %v8627_v6 = vand.u32 2147483647, %v7780_v10 }
 0x214   :  { %v3212_v2 = vsel %vm3205_vm2, %v3208_v11, %v3211_v36  ;;  %v3346_v61 = vadd.f32 -0.4999988, %v3345_v20  ;;  %v3353_v15 = vadd.f32 -0.16666654, %v3352_v16  ;;  %v4276_v32 = vsel %vm4275_vm5, %v4274_v1, 0 }
 0x215   :  { %v7860_v55 = vsub.f32 %v2862_v41, %v7515_v28  ;;  %v7864_v21 = vsel %vm3049_vm15, nan, %v3058_v54  ;;  %v3358_v4 = vand.u32 3, %v7853_v24  ;;  %v3473_v40 = vsel %vm3471_vm3, %v3472_v13, %v7848_v48 }
 0x216   :  { %v3347_v18 = vmul.f32 %v3346_v61, %v3342_v49  ;;  %v3354_v43 = vmul.f32 %v3353_v15, %v3342_v49  ;;  %vm3370_vm6 = vcmp.lt.s32.totalorder %v7498_v46, 0  ;;  %v3474_v42 = vclz %v3473_v40 }
 0x217   :  { %v7873_v1 = vsel %vm3203_vm12, nan, %v3212_v2  ;;  %v4241_v28 = vsub.f32 %v4237_v30, %v7869_v34  ;;  %v7878_v41 = vand.u32 8388607, %v8627_v6  ;;  %v4278_v54 = vand.u32 31, %v4276_v32 }
 0x218   :  { %v7880_v58 = vadd.f32 1.0, %v3347_v18  ;;  %v3355_v51 = vadd.f32 1.0, %v3354_v43  ;;  %vm3357_vm14 = vweird.f32 %v7467_v60  ;;  %v5663_v49 = vadd.s32 4294967294, %v3474_v42 }
 0x219   :  { %v3492_v3 = vsub.s32 4, %v7830_v26  ;;  %vm3359_vm4 = vcmp.lt.s32.totalorder %v3358_v4, 2  ;;  %vm3360_vm9 = vcmp.eq.s32.totalorder %v3358_v4, 0  ;;  %vm3363_vm11 = vcmp.eq.s32.totalorder %v3358_v4, 2 }
 0x21a   :  { %v3462_v57 = vadd.s32 %v7752_v47, %v7750_v19  ;;  %v7886_v63 = vmul.f32 %v3355_v51, %v3340_v50  ;;  %v3364_v23 = vxor.u32 2147483648, %v7880_v58  ;;  %vm5664_vm10 = vcmp.lt.s32.totalorder %v5663_v49, 0 }
 0x21b   :  { %v3670_v11 = vadd.s32 3, %v7675_v17  ;;  %v8709_v36 = vand.u32 2147483647, %v7498_v46  ;;  %v3477_v16 = vsel %vm5664_vm10, 0, %v5663_v49  ;;  %v7897_v13 = vsub.f32 %v4241_v28, %v7703_v35 }
 0x21c   :  { %v7900_v19 = vsub.s32 32, %v4278_v54  ;;  %v3361_v47 = vxor.u32 2147483648, %v7886_v63  ;;  %v3478_v50 = vsub.s32 32, %v3477_v16  ;;  %v3479_v2 = vshll.u32 %v7848_v48, %v3477_v16 }
 0x21d   :  { %vm7892_vm8 = vcmp.le.f32.partialorder %v8709_v36, 0.7853982  ;;  %v3493_v17 = vsel %vm3370_vm6, %v3492_v3, %v7830_v26  ;;  %v3365_v61 = vsel %vm3363_vm11, %v3364_v23, %v7886_v63  ;;  %v3482_v15 = vsub.s32 4294967266, %v3477_v16 }
 0x21e   :  { %v3671_v35 = vand.u32 3, %v3670_v11  ;;  %v4281_v40 = vshll.u32 %v8653_v52, %v4278_v54  ;;  %v3362_v18 = vsel %vm3360_vm9, %v7880_v58, %v3361_v47  ;;  %v3480_v43 = vshrl.u32 %v3462_v57, %v3478_v50 }
 0x21f   :  { %v4284_v42 = vshll.u32 %v8654_v5, %v4278_v54  ;;  %v4287_v48 = vshll.u32 %v8655_v27, %v4278_v54  ;;  %v3483_v28 = vadd.s32 127, %v3482_v15  ;;  %v3825_v26 = vadd.s32 3, %v7798_v44 }
 0x220   :  { %vm3673_vm7 = vcmp.eq.s32.totalorder %v3671_v35, 0  ;;  %v4282_v51 = vshrl.u32 %v8654_v5, %v7900_v19  ;;  %v3366_v49 = vsel %vm3359_vm4, %v3362_v18, %v3365_v61  ;;  %v3481_v3 = vor.u32 %v3480_v43, %v3479_v2 }
 0x221   :  { %vm3676_vm13 = vcmp.eq.s32.totalorder %v3671_v35, 2  ;;  %v4285_v11 = vshrl.u32 %v8655_v27, %v7900_v19  ;;  %v3484_v36 = vshll.u32 %v3483_v28, 23  ;;  %v4288_v57 = vshrl.u32 %v8656_v12, %v7900_v19 }
 0x222   :  { %v4290_v16 = vshll.u32 %v8656_v12, %v4278_v54  ;;  %v4291_v50 = vshrl.u32 %v8636_v33, %v7900_v19  ;;  %vm3672_vm1 = vcmp.lt.s32.totalorder %v3671_v35, 2  ;;  %v3675_v44 = vsel %vm3673_vm7, %v7763_v22, %v3053_v0 }
 0x223   :  { %v3678_v4 = vsel %vm3676_vm13, %v3056_v62, %v7767_v53  ;;  %v7932_v2 = vshrl.u32 %v4276_v32, 5  ;;  %v3367_v61 = vsel %vm3357_vm14, nan, %v3366_v49  ;;  %v3485_v15 = vor.u32 4788187, %v3484_v36 }
 0x224   :  { %v3488_v18 = vcvt.s32.f32 %v3481_v3  ;;  %v3826_v43 = vand.u32 3, %v3825_v26  ;;  %v3495_v28 = vsel %vm7892_vm8, 0, %v3493_v17  ;;  %v3980_v35 = vadd.s32 3, %v7853_v24 }
 0x225   :  { %v7939_v6 = vor.u32 %v4282_v51, %v4281_v40  ;;  %v7941_v0 = vor.u32 %v4285_v11, %v4284_v42  ;;  %v3486_v30 = vand.u32 2147483647, %v3485_v15  ;;  %v3679_v22 = vsel %vm3672_vm1, %v3675_v44, %v3678_v4 }
 0x226   :  { %v7943_v53 = vor.u32 %v4288_v57, %v4287_v48  ;;  %v4292_v62 = vor.u32 %v4291_v50, %v4290_v16  ;;  %v3522_v32 = vadd.f32 %v3367_v61, %v7864_v21  ;;  %v3981_v49 = vand.u32 3, %v3980_v35  ;;  %v8713_v61 = vld [vmem:[#allocation14_spill] sm:$0xff] }
 0x227   :  { %v4293_v3 = vshll.u32 %v8636_v33, %v4278_v54  ;;  %v4294_v26 = vshrl.u32 %v8637_v37, %v7900_v19  ;;  %v3489_v17 = vmul.f32 %v3488_v18, %v3486_v30  ;;  %vm3827_vm2 = vcmp.lt.s32.totalorder %v3826_v43, 2 }
 0x228   :  { %vm3828_vm5 = vcmp.eq.s32.totalorder %v3826_v43, 0  ;;  %vm3831_vm3 = vcmp.eq.s32.totalorder %v3826_v43, 2  ;;  %v3680_v24 = vsel %vm3049_vm15, nan, %v3679_v22  ;;  %vm3982_vm4 = vcmp.lt.s32.totalorder %v3981_v49, 2 }
 0x229   :  { %vm3983_vm9 = vcmp.eq.s32.totalorder %v3981_v49, 0  ;;  %vm3986_vm11 = vcmp.eq.s32.totalorder %v3981_v49, 2  ;;  %v3490_v40 = vxor.u32 2147483648, %v3489_v17  ;;  %vm4299_vm10 = vcmp.lt.s32.totalorder %v7932_v2, 4  ;;  %v8714_v49 = vld [vmem:[#allocation16_spill] sm:$0xff] }
 0x22a   :  { %v3985_v42 = vsel %vm3983_vm9, %v7880_v58, %v3361_v47  ;;  %v3988_v21 = vsel %vm3986_vm11, %v3364_v23, %v7886_v63  ;;  %v3524_v54 = vmul.f32 0.5, %v3522_v32  ;;  %v3830_v30 = vsel %vm3828_vm5, %v7800_v56, %v3207_v45 }
 0x22b   :  { %v3833_v14 = vsel %vm3831_vm3, %v3210_v39, %v7803_v25  ;;  %v3989_v48 = vsel %vm3982_vm4, %v3985_v42, %v3988_v21  ;;  %v3491_v51 = vsel %vm3370_vm6, %v3490_v40, %v3489_v17  ;;  %v4295_v58 = vor.u32 %v4294_v26, %v4293_v3  ;;  %v8715_v40 = vld [vmem:[#allocation17_spill] sm:$0xff] }
 0x22c   :  { %v3990_v47 = vsel %vm3357_vm14, nan, %v3989_v48  ;;  %vm4296_vm15 = vcmp.lt.s32.totalorder %v7932_v2, 1  ;;  %v7970_v63 = vsel %vm7892_vm8, %v7498_v46, %v3491_v51  ;;  %vm4298_vm7 = vcmp.lt.s32.totalorder %v7932_v2, 3 }
 0x22d   :  { %v4146_v45 = vadd.f32 %v3990_v47, %v3680_v24  ;;  %v4305_v56 = vsel %vm4299_vm10, %v4292_v62, 920167782  ;;  %v3496_v25 = vmul.f32 %v7970_v63, %v7970_v63  ;;  %v3834_v60 = vsel %vm3827_vm2, %v3830_v30, %v3833_v14  ;;  %v8716_v30 = vld [vmem:[#allocation15_spill] sm:$0xff] }
 0x22e   :  { %v4135_v39 = vadd.s32 3, %v3495_v28  ;;  %v8712_v23 = vor.u32 8388608, %v7878_v41  ;;  %v7982_v36 = vand.u32 3, %v3495_v28  ;;  %v4150_v57 = vmul.f32 %v3524_v54, %v6562_v7 }
 0x22f   :  { %v4148_v20 = vmul.f32 0.5, %v4146_v45  ;;  %vm4297_vm6 = vcmp.lt.s32.totalorder %v7932_v2, 2  ;;  %v3497_v16 = vmul.f32 -0.001358992, %v3496_v25  ;;  %v3504_v50 = vmul.f32 -0.00019511016, %v3496_v25 }
 0x230   :  { %v7980_v11 = vshll.u32 %v8712_v23, 8  ;;  %v4304_v44 = vsel %vm4296_vm15, %v7939_v6, %v7941_v0  ;;  %v4306_v41 = vsel %vm4298_vm7, %v7943_v53, %v4305_v56  ;;  %v7995_v4 = vsel %vm3203_vm12, nan, %v3834_v60 }
 0x231   :  { %v4152_v15 = vmul.f32 %v4148_v20, %v8713_v61  ;;  %v4280_v18 = vshrl.u32 %v8653_v52, %v7900_v19  ;;  %v4309_v43 = vsel %vm4299_vm10, %v4295_v58, 1326507024  ;;  %v3498_v28 = vadd.f32 0.041655596, %v3497_v16 }
 0x232   :  { %v3505_v35 = vadd.f32 0.008332121, %v3504_v50  ;;  %v8002_v22 = vand.u32 3, %v4135_v39  ;;  %v4308_v32 = vsel %vm4296_vm15, %v7941_v0, %v7943_v53  ;;  %vm3517_vm12 = vcmp.eq.s32.totalorder %v7982_v36, 2 }
 0x233   :  { %v4154_v29 = vadd.f32 %v4152_v15, %v4150_v57  ;;  %v4158_v3 = vmul.f32 %v3524_v54, %v8714_v49  ;;  %v4307_v19 = vsel %vm4297_vm6, %v4304_v44, %v4306_v41  ;;  %v4310_v26 = vsel %vm4298_vm7, %v4292_v62, %v4309_v43 }
 0x234   :  { %v3499_v17 = vmul.f32 %v3498_v28, %v3496_v25  ;;  %v3506_v24 = vmul.f32 %v3505_v35, %v3496_v25  ;;  %v4160_v42 = vmul.f32 %v4148_v20, %v8715_v40  ;;  %v4314_v21 = vshrl.u32 %v7980_v11, 16 }
 0x235   :  { %vm3514_vm14 = vcmp.eq.s32.totalorder %v7982_v36, 0  ;;  %v8018_v14 = vadd.f32 %v4154_v29, %v8716_v30  ;;  %v8023_v54 = vsel %vm4296_vm15, %v4280_v18, %v7939_v6  ;;  %v4311_v48 = vsel %vm4297_vm6, %v4308_v32, %v4310_v26 }
 0x236   :  { %v4313_v62 = vand.u32 65535, %v7980_v11  ;;  %v3500_v51 = vadd.f32 -0.4999988, %v3499_v17  ;;  %v3507_v47 = vadd.f32 -0.16666654, %v3506_v24  ;;  %vm3513_vm8 = vcmp.lt.s32.totalorder %v7982_v36, 2 }
 0x237   :  { %vm4137_vm13 = vcmp.lt.s32.totalorder %v8002_v22, 2  ;;  %vm4138_vm1 = vcmp.eq.s32.totalorder %v8002_v22, 0  ;;  %v4315_v58 = vand.u32 65535, %v4311_v48  ;;  %vm3511_vm2 = vweird.f32 %v7498_v46 }
 0x238   :  { %v4166_v45 = vmul.f32 1.442695, %v8018_v14  ;;  %v4316_v6 = vshrl.u32 %v4311_v48, 16  ;;  %v4337_v56 = vand.u32 65535, %v4307_v19  ;;  %v4338_v60 = vshrl.u32 %v4307_v19, 16 }
 0x239   :  { %v3501_v39 = vmul.f32 %v3500_v51, %v3496_v25  ;;  %v3508_v23 = vmul.f32 %v3507_v47, %v3496_v25  ;;  %v4162_v20 = vadd.f32 %v4160_v42, %v4158_v3  ;;  %v8033_v57 = vmul.u32 %v4315_v58, %v4314_v21  ;;  %v8717_v3 = vld [vmem:[#allocation18_spill] sm:$0xff] }
 0x23a   :  { %vm4141_vm5 = vcmp.eq.s32.totalorder %v8002_v22, 2  ;;  %5726 = vpow2.f32 %v4166_v45  ;;  %v4317_v16 = vmul.u32 %v4315_v58, %v4313_v62  ;;  %v4318_v50 = vmul.u32 %v4316_v6, %v4313_v62 }
 0x23b   :  { %v3502_v44 = vadd.f32 1.0, %v3501_v39  ;;  %v3509_v41 = vadd.f32 1.0, %v3508_v23  ;;  %v4301_v15 = vsel %vm4299_vm10, %v7943_v53, 2102212464  ;;  %v4320_v18 = vmul.u32 %v4316_v6, %v4314_v21 }
 0x23c   :  { %v4321_v43 = vshll.u32 %v4318_v50, 16  ;;  %v4323_v28 = vshll.u32 %v8033_v57, 16  ;;  %v8040_v35 = vmul.u32 %v4338_v60, %v4313_v62  ;;  %v8042_v25 = vmul.u32 %v4337_v56, %v4314_v21 }
 0x23d   :  { %v3510_v32 = vmul.f32 %v3509_v41, %v7970_v63  ;;  %v3518_v29 = vxor.u32 2147483648, %v3502_v44  ;;  %v4164_v19 = vadd.f32 %v4162_v20, %v8717_v3  ;;  %v4339_v26 = vmul.u32 %v4337_v56, %v4313_v62 }
 0x23e   :  { %v4322_v17 = vshrl.u32 %v4318_v50, 16  ;;  %vm4325_vm3 = vc.u32 %v4317_v16, %v4321_v43  ;;  %v4327_v24 = vadd.s32 %v4321_v43, %v4317_v16  ;;  %v4343_v42 = vshll.u32 %v8040_v35, 16 }
 0x23f   :  { %v3515_v53 = vxor.u32 2147483648, %v3510_v32  ;;  %v3519_v48 = vsel %vm3517_vm12, %v3518_v29, %v3510_v32  ;;  %v4143_v51 = vsel %vm4141_vm5, %v3518_v29, %v3510_v32  ;;  %v4326_v47 = vsel %vm4325_vm3, 1, %v8650_v59  ;;  %v8074_v32 = vld [vmem:[#allocation2 + $0x1e0] sm:$0xff]  ;;  %v8076_v29 = vld [vmem:[#allocation2 + $0x1e8] sm:$0xff] }
 0x240   :  { %v5727_v58 = vpop.eup %5726  ;;  %v4328_v63 = vadd.s32 %v4326_v47, %v4320_v18  ;;  %vm4329_vm4 = vc.u32 %v4327_v24, %v4323_v28  ;;  %v4342_v45 = vmul.u32 %v4338_v60, %v4314_v21  ;;  %v4345_v62 = vshll.u32 %v8042_v25, 16 }
 0x241   :  { %v3516_v6 = vsel %vm3514_vm14, %v3502_v44, %v3515_v53  ;;  %v4140_v56 = vsel %vm4138_vm1, %v3502_v44, %v3515_v53  ;;  %v4170_v39 = vmul.f32 %v5727_v58, %v7860_v55  ;;  %v4330_v23 = vsel %vm4329_vm4, 1, %v8650_v59 }
 0x242   :  { %v3520_v20 = vsel %vm3513_vm8, %v3516_v6, %v3519_v48  ;;  %v4144_v16 = vsel %vm4137_vm13, %v4140_v56, %v4143_v51  ;;  %v4332_v50 = vadd.s32 %v4330_v23, %v4328_v63  ;;  %vm4347_vm9 = vc.u32 %v4339_v26, %v4343_v42 }
 0x243   :  { %v3521_v21 = vsel %vm3511_vm2, nan, %v3520_v20  ;;  %v4145_v60 = vsel %vm3511_vm2, nan, %v4144_v16  ;;  %v4172_v41 = vadd.f32 %v4170_v39, %v4164_v19  ;;  %v4348_v44 = vsel %vm4347_vm9, 1, %v8650_v59  ;;  %v5742_v16 = vld [vmem:[#allocation2 + $0x98] sm:$0xff] }
 0x244   :  { %v3523_v18 = vadd.f32 %v3521_v21, %v7873_v1  ;;  %v4147_v43 = vadd.f32 %v4145_v60, %v7995_v4  ;;  %v4302_v36 = vsel %vm4298_vm7, %v7941_v0, %v4301_v15  ;;  %v4349_v22 = vadd.s32 %v4343_v42, %v4339_v26 }
 0x245   :  { %v4174_v28 = vsub.f32 %v4172_v41, %v7860_v55  ;;  %v4324_v46 = vshrl.u32 %v8033_v57, 16  ;;  %v4350_v19 = vadd.s32 %v4348_v44, %v4342_v45  ;;  %v4421_v24 = vand.u32 2139095040, %v7897_v13 }
 0x246   :  { %v3525_v53 = vmul.f32 0.5, %v3523_v18  ;;  %v4149_v1 = vmul.f32 0.5, %v4147_v43  ;;  %v4333_v48 = vadd.s32 %v4332_v50, %v4322_v17  ;;  %vm4351_vm11 = vc.u32 %v4349_v22, %v4345_v62 }
 0x247   :  { %v4176_v4 = vadd.f32 %v4174_v28, %v7742_v8  ;;  %v4344_v0 = vshrl.u32 %v8040_v35, 16  ;;  %v4352_v15 = vsel %vm4351_vm11, 1, %v8650_v59  ;;  %v4422_v55 = vshrl.u32 %v4421_v24, 23 }
 0x248   :  { %v4151_v26 = vmul.f32 %v3525_v53, %v6562_v7  ;;  %v4153_v42 = vmul.f32 %v4149_v1, %v8713_v61  ;;  %v4249_v57 = vrot.slane %v8074_v32, 1  ;;  %v4250_v51 = vrot.slane %v8076_v29, 1 }
 0x249   :  { %v4178_v47 = vadd.f32 3.1415927, %v4176_v4  ;;  %v4303_v17 = vsel %vm4297_vm6, %v8023_v54, %v4302_v36  ;;  %v4346_v8 = vshrl.u32 %v8042_v25, 16  ;;  %v4354_v58 = vadd.s32 %v4352_v15, %v4350_v19  ;;  %v5743_v19 = vld [vmem:[#allocation2 + $0x188] sm:$0xff] }
 0x24a   :  { %v4155_v35 = vadd.f32 %v4153_v42, %v4151_v26  ;;  %v8091_v63 = vadd.s32 %v4333_v48, %v4324_v46  ;;  %v8093_v45 = vadd.s32 %v4349_v22, %v4345_v62  ;;  %v5682_v6 = vadd.s32 4294967169, %v4422_v55 }
 0x24b   :  { %v4159_v56 = vmul.f32 %v3525_v53, %v8714_v49  ;;  %v4161_v39 = vmul.f32 %v4149_v1, %v8715_v40  ;;  %v4180_v23 = vmul.f32 0.15915494, %v4178_v47  ;;  %v4355_v20 = vadd.s32 %v4354_v58, %v4344_v0 }
 0x24c   :  { %v2863_v50 = vsub.f32 %v7807_v31, %v5742_v16  ;;  %v4157_v2 = vadd.f32 %v4155_v35, %v8716_v30  ;;  %v4251_v54 = vsel %vm129_vm0, %v4249_v57, %v4250_v51  ;;  %v4428_v25 = vadd.s32 1, %v5682_v6 }
 0x24d   :  { %v4182_v62 = vfloor.f32 %v4180_v23  ;;  %v4356_v21 = vadd.s32 %v4355_v20, %v4346_v8  ;;  %v4357_v60 = vmul.u32 %v7980_v11, %v4303_v17  ;;  %v4418_v41 = vand.u32 2147483647, %v7897_v13  ;;  %v4258_v8 = vld [vmem:[#allocation2 + $0xf0] sm:$0xff] }
 0x24e   :  { %v4168_v44 = vmul.f32 1.442695, %v4157_v2  ;;  %v4193_v18 = vadd.f32 %v4157_v2, %v8018_v14  ;;  %vm4359_vm10 = vc.u32 %v8091_v63, %v8093_v45  ;;  %vm4429_vm15 = vcmp.gt.s32.totalorder %v4428_v25, 0 }
 0x24f   :  { %v4163_v31 = vadd.f32 %v4161_v39, %v4159_v56  ;;  %v4184_v43 = vmul.f32 6.2831855, %v4182_v62  ;;  %v4360_v36 = vadd.s32 1, %v4356_v21  ;;  %v4430_v22 = vsel %vm4429_vm15, %v4428_v25, 0 }
 0x250   :  { %5728 = vpow2.f32 %v4168_v44  ;;  %v4194_v28 = vrot.slane %v4193_v18, 4  ;;  %v4432_v46 = vand.u32 31, %v4430_v22  ;;  %v2865_v24 = vsub.f32 %v2863_v50, %v5743_v19  ;;  %v8718_v19 = vld [vmem:[#allocation21_spill] sm:$0xff] }
 0x251   :  { %v4186_v53 = vsub.f32 %v4178_v47, %v4184_v43  ;;  %v4256_v11 = vadd.f32 %v4251_v54, %v7756_v9  ;;  %v4361_v1 = vsel %vm4359_vm10, %v4360_v36, %v4356_v21  ;;  %v4425_v14 = vand.u32 8388607, %v4418_v41 }
 0x252   :  { %v4195_v48 = vadd.f32 %v4194_v28, %v4193_v18  ;;  %v4362_v4 = vadd.s32 %v4361_v1, %v4357_v60  ;;  %v8112_v0 = vsub.s32 32, %v4432_v46  ;;  %v4165_v15 = vadd.f32 %v4163_v31, %v8717_v3 }
 0x253   :  { %v5677_v55 = vadd.f32 -3.1415927, %v4186_v53  ;;  %v4435_v26 = vshll.u32 %v8653_v52, %v4432_v46  ;;  %v4438_v42 = vshll.u32 %v8654_v5, %v4432_v46  ;;  %v4441_v58 = vshll.u32 %v8655_v27, %v4432_v46 }
 0x254   :  { %v4196_v17 = vrot.slane %v4195_v48, 2  ;;  %v4363_v47 = vadd.s32 536870912, %v4362_v4  ;;  %v4436_v9 = vshrl.u32 %v8654_v5, %v8112_v0  ;;  %v4439_v35 = vshrl.u32 %v8655_v27, %v8112_v0 }
 0x255   :  { %4191 = vst [vmem:[#allocation7 + $0x80] sm:$0xff] %v5677_v55  ;;  %v4442_v6 = vshrl.u32 %v8656_v12, %v8112_v0  ;;  %v4444_v56 = vshll.u32 %v8656_v12, %v4432_v46  ;;  %v4445_v39 = vshrl.u32 %v8636_v33, %v8112_v0  ;;  %v8127_v16 = vshrl.u32 %v4430_v22, 5 }
 0x256   :  { %v5729_v23 = vpop.eup %5728  ;;  %v4197_v20 = vadd.f32 %v4196_v17, %v4195_v48  ;;  %v4447_v50 = vshll.u32 %v8636_v33, %v4432_v46  ;;  %v4448_v2 = vshrl.u32 %v8637_v37, %v8112_v0  ;;  %v4260_v25 = vsub.f32 %v4256_v11, %v4258_v8 }
 0x257   :  { %v4171_v54 = vmul.f32 %v5729_v23, %v2865_v24  ;;  %v8132_v21 = vshrl.u32 %v4363_v47, 30  ;;  %v4426_v60 = vor.u32 8388608, %v4425_v14  ;;  %v8134_v44 = vor.u32 %v4436_v9, %v4435_v26 }
 0x258   :  { %v4198_v62 = vrot.slane %v4197_v20, 1  ;;  %v8136_v31 = vor.u32 %v4439_v35, %v4438_v42  ;;  %v4443_v43 = vor.u32 %v4442_v6, %v4441_v58  ;;  %v4446_v36 = vor.u32 %v4445_v39, %v4444_v56 }
 0x259   :  { %v4173_v18 = vadd.f32 %v4171_v54, %v4165_v15  ;;  %v4449_v28 = vor.u32 %v4448_v2, %v4447_v50  ;;  %vm4450_vm7 = vcmp.lt.s32.totalorder %v8127_v16, 1  ;;  %vm4453_vm6 = vcmp.lt.s32.totalorder %v8127_v16, 4 }
 0x25a   :  { %v4199_v22 = vadd.f32 %v4198_v62, %v4197_v20  ;;  %vm4452_vm12 = vcmp.lt.s32.totalorder %v8127_v16, 3  ;;  %v4365_v11 = vshll.u32 %v8132_v21, 30  ;;  %vm4451_vm14 = vcmp.lt.s32.totalorder %v8127_v16, 2 }
 0x25b   :  { %v4175_v46 = vsub.f32 %v4173_v18, %v2865_v24  ;;  %v8146_v1 = vshll.u32 %v4426_v60, 8  ;;  %v8150_v14 = vsub.f32 %v4260_v25, %v8074_v32  ;;  %v4458_v24 = vsel %vm4450_vm7, %v8134_v44, %v8136_v31 }
 0x25c   :  { %v8142_v53 = vadd.f32 %v4199_v22, %v8718_v19  ;;  %v4459_v15 = vsel %vm4453_vm6, %v4446_v36, 920167782  ;;  %v4462_v26 = vsel %vm4450_vm7, %v8136_v31, %v4443_v43  ;;  %v8169_v47 = vsub.s32 %v4362_v4, %v4365_v11 }
 0x25d   :  { %v4177_v48 = vadd.f32 %v4175_v46, %v7784_v38  ;;  %v4460_v55 = vsel %vm4452_vm12, %v4443_v43, %v4459_v15  ;;  %v4463_v38 = vsel %vm4453_vm6, %v4449_v28, 1326507024  ;;  %v4467_v58 = vand.u32 65535, %v8146_v1 }
 0x25e   :  { %v4461_v17 = vsel %vm4451_vm14, %v4458_v24, %v4460_v55  ;;  %v4464_v8 = vsel %vm4452_vm12, %v4446_v36, %v4463_v38  ;;  %v4468_v35 = vshrl.u32 %v8146_v1, 16  ;;  %v4575_v39 = vand.u32 2139095040, %v8150_v14 }
 0x25f   :  { %v4179_v42 = vadd.f32 3.1415927, %v4177_v48  ;;  %v4465_v9 = vsel %vm4451_vm14, %v4462_v26, %v4464_v8  ;;  %v4492_v20 = vshrl.u32 %v4461_v17, 16  ;;  %v4491_v2 = vand.u32 65535, %v4461_v17 }
 0x260   :  { %v4469_v56 = vand.u32 65535, %v4465_v9  ;;  %v4470_v23 = vshrl.u32 %v4465_v9, 16  ;;  %v4368_v54 = vsub.s32 0, %v8169_v47  ;;  %vm4367_vm8 = vcmp.lt.s32.totalorder %v8169_v47, 0 }
 0x261   :  { %v4181_v6 = vmul.f32 0.15915494, %v4179_v42  ;;  %v4576_v18 = vshrl.u32 %v4575_v39, 23  ;;  %v4494_v36 = vmul.u32 %v4492_v20, %v4467_v58  ;;  %v4495_v19 = vmul.u32 %v4491_v2, %v4468_v35 }
 0x262   :  { %v4472_v25 = vmul.u32 %v4470_v23, %v4467_v58  ;;  %v4473_v4 = vmul.u32 %v4469_v56, %v4468_v35  ;;  %v4471_v60 = vmul.u32 %v4469_v56, %v4467_v58  ;;  %v4474_v28 = vmul.u32 %v4470_v23, %v4468_v35 }
 0x263   :  { %v4183_v50 = vfloor.f32 %v4181_v6  ;;  %v4369_v11 = vsel %vm4367_vm8, %v4368_v54, %v8169_v47  ;;  %v4493_v24 = vmul.u32 %v4491_v2, %v4467_v58  ;;  %v4434_v55 = vshrl.u32 %v8653_v52, %v8112_v0 }
 0x264   :  { %v4475_v46 = vshll.u32 %v4472_v25, 16  ;;  %v4477_v48 = vshll.u32 %v4473_v4, 16  ;;  %v5685_v26 = vadd.s32 4294967169, %v4576_v18  ;;  %v4496_v8 = vmul.u32 %v4492_v20, %v4468_v35 }
 0x265   :  { %v4185_v62 = vmul.f32 6.2831855, %v4183_v50  ;;  %v4497_v9 = vshll.u32 %v4494_v36, 16  ;;  %v4455_v6 = vsel %vm4453_vm6, %v4443_v43, 2102212464  ;;  %v4499_v39 = vshll.u32 %v4495_v19, 16 }
 0x266   :  { %vm4479_vm13 = vc.u32 %v4471_v60, %v4475_v46  ;;  %v4481_v17 = vadd.s32 %v4475_v46, %v4471_v60  ;;  %v4476_v23 = vshrl.u32 %v4472_v25, 16  ;;  %v4478_v50 = vshrl.u32 %v4473_v4, 16 }
 0x267   :  { %v4187_v22 = vsub.f32 %v4179_v42, %v4185_v62  ;;  %v4480_v38 = vsel %vm4479_vm13, 1, %v8650_v59  ;;  %v4370_v42 = vclz %v4369_v11  ;;  %vm4501_vm2 = vc.u32 %v4493_v24, %v4497_v9 }
 0x268   :  { %v4482_v56 = vadd.s32 %v4480_v38, %v4474_v28  ;;  %vm4483_vm1 = vc.u32 %v4481_v17, %v4477_v48  ;;  %v4503_v58 = vadd.s32 %v4497_v9, %v4493_v24  ;;  %v4502_v2 = vsel %vm4501_vm2, 1, %v8650_v59 }
 0x269   :  { %v5678_v15 = vadd.f32 -3.1415927, %v4187_v22  ;;  %v4484_v0 = vsel %vm4483_vm1, 1, %v8650_v59  ;;  %v4498_v62 = vshrl.u32 %v4494_v36, 16  ;;  %v4504_v35 = vadd.s32 %v4502_v2, %v4496_v8 }
 0x26a   :  { %v4486_v54 = vadd.s32 %v4484_v0, %v4482_v56  ;;  %vm4505_vm5 = vc.u32 %v4503_v58, %v4499_v39  ;;  %v4454_v20 = vsel %vm4450_vm7, %v4434_v55, %v8134_v44  ;;  %v4456_v43 = vsel %vm4452_vm12, %v8136_v31, %v4455_v6 }
 0x26b   :  { %4192 = vst [vmem:[#allocation7 + $0x88] sm:$0xff] %v5678_v15  ;;  %v4506_v25 = vsel %vm4505_vm5, 1, %v8650_v59  ;;  %v4582_v60 = vadd.s32 1, %v5685_v26  ;;  %v5680_v4 = vadd.s32 4294967294, %v4370_v42  ;;  %v4500_v22 = vshrl.u32 %v4495_v19, 16 }
 0x26c   :  { %v4487_v18 = vadd.s32 %v4486_v54, %v4476_v23  ;;  %v4508_v28 = vadd.s32 %v4506_v25, %v4504_v35  ;;  %v8193_v46 = vadd.s32 %v4503_v58, %v4499_v39  ;;  %v4572_v36 = vand.u32 2147483647, %v8150_v14 }
 0x26d   :  { %vm4583_vm3 = vcmp.gt.s32.totalorder %v4582_v60, 0  ;;  %v4457_v11 = vsel %vm4451_vm14, %v4454_v20, %v4456_v43  ;;  %vm5681_vm4 = vcmp.lt.s32.totalorder %v5680_v4, 0  ;;  %v4255_v16 = vsel %vm129_vm0, %v4250_v51, %v4249_v57 }
 0x26e   :  { %v8198_v44 = vadd.s32 %v4487_v18, %v4478_v50  ;;  %v4509_v48 = vadd.s32 %v4508_v28, %v4498_v62  ;;  %v4584_v24 = vsel %vm4583_vm3, %v4582_v60, 0  ;;  %v4511_v55 = vmul.u32 %v8146_v1, %v4457_v11  ;;  %v4259_v62 = vld [vmem:[#allocation2 + $0xf8] sm:$0xff] }
 0x26f   :  { %v4586_v31 = vand.u32 31, %v4584_v24  ;;  %v4579_v38 = vand.u32 8388607, %v4572_v36  ;;  %v4373_v17 = vsel %vm5681_vm4, 0, %v5680_v4  ;;  %v8212_v8 = vshrl.u32 %v4584_v24, 5 }
 0x270   :  { %v4510_v15 = vadd.s32 %v4509_v48, %v4500_v22  ;;  %vm4513_vm9 = vc.u32 %v8198_v44, %v8193_v46  ;;  %v4378_v58 = vsub.s32 4294967266, %v4373_v17  ;;  %v4257_v0 = vadd.f32 %v4255_v16, %v7869_v34 }
 0x271   :  { %v8203_v19 = vsub.s32 32, %v4586_v31  ;;  %v4589_v1 = vshll.u32 %v8653_v52, %v4586_v31  ;;  %v4592_v9 = vshll.u32 %v8654_v5, %v4586_v31  ;;  %v4595_v6 = vshll.u32 %v8655_v27, %v4586_v31 }
 0x272   :  { %v4514_v26 = vadd.s32 1, %v4510_v15  ;;  %v4598_v32 = vshll.u32 %v8656_v12, %v4586_v31  ;;  %v4601_v50 = vshll.u32 %v8636_v33, %v4586_v31  ;;  %v4358_v2 = vadd.s32 %v8093_v45, %v8091_v63 }
 0x273   :  { %v4599_v56 = vshrl.u32 %v8636_v33, %v8203_v19  ;;  %v4590_v51 = vshrl.u32 %v8654_v5, %v8203_v19  ;;  %v4593_v39 = vshrl.u32 %v8655_v27, %v8203_v19  ;;  %v4596_v23 = vshrl.u32 %v8656_v12, %v8203_v19 }
 0x274   :  { %v4515_v42 = vsel %vm4513_vm9, %v4514_v26, %v4510_v15  ;;  %v4374_v35 = vsub.s32 32, %v4373_v17  ;;  %v4580_v20 = vor.u32 8388608, %v4579_v38  ;;  %v4602_v25 = vshrl.u32 %v8637_v37, %v8203_v19 }
 0x275   :  { %v4516_v57 = vadd.s32 %v4515_v42, %v4511_v55  ;;  %v4600_v43 = vor.u32 %v4599_v56, %v4598_v32  ;;  %v8232_v60 = vor.u32 %v4590_v51, %v4589_v1  ;;  %v8234_v4 = vor.u32 %v4593_v39, %v4592_v9 }
 0x276   :  { %v4597_v18 = vor.u32 %v4596_v23, %v4595_v6  ;;  %vm4607_vm11 = vcmp.lt.s32.totalorder %v8212_v8, 4  ;;  %v4379_v22 = vadd.s32 127, %v4378_v58  ;;  %v4603_v28 = vor.u32 %v4602_v25, %v4601_v50 }
 0x277   :  { %v4517_v54 = vadd.s32 536870912, %v4516_v57  ;;  %vm4604_vm10 = vcmp.lt.s32.totalorder %v8212_v8, 1  ;;  %v4261_v63 = vsub.f32 %v4257_v0, %v4259_v62  ;;  %vm4606_vm15 = vcmp.lt.s32.totalorder %v8212_v8, 3 }
 0x278   :  { %v4375_v45 = vshll.u32 %v8169_v47, %v4373_v17  ;;  %v4613_v11 = vsel %vm4607_vm11, %v4600_v43, 920167782  ;;  %v4617_v48 = vsel %vm4607_vm11, %v4603_v28, 1326507024  ;;  %v8246_v24 = vshll.u32 %v4580_v20, 8 }
 0x279   :  { %v8237_v34 = vshrl.u32 %v4517_v54, 30  ;;  %v4376_v31 = vshrl.u32 %v4358_v2, %v4374_v35  ;;  %vm4605_vm7 = vcmp.lt.s32.totalorder %v8212_v8, 2  ;;  %v4612_v15 = vsel %vm4604_vm10, %v8232_v60, %v8234_v4 }
 0x27a   :  { %v4616_v47 = vsel %vm4604_vm10, %v8234_v4, %v4597_v18  ;;  %v4380_v55 = vshll.u32 %v4379_v22, 23  ;;  %v4614_v26 = vsel %vm4606_vm15, %v4597_v18, %v4613_v11  ;;  %v4618_v38 = vsel %vm4606_vm15, %v4600_v43, %v4617_v48 }
 0x27b   :  { %v4519_v16 = vshll.u32 %v8237_v34, 30  ;;  %v8262_v17 = vsub.f32 %v4261_v63, %v8076_v29  ;;  %v4615_v1 = vsel %vm4605_vm7, %v4612_v15, %v4614_v26  ;;  %v4619_v9 = vsel %vm4605_vm7, %v4616_v47, %v4618_v38 }
 0x27c   :  { %v4621_v42 = vand.u32 65535, %v8246_v24  ;;  %v4622_v6 = vshrl.u32 %v8246_v24, 16  ;;  %v4623_v32 = vand.u32 65535, %v4619_v9  ;;  %v4377_v56 = vor.u32 %v4376_v31, %v4375_v45 }
 0x27d   :  { %v4381_v51 = vor.u32 4788187, %v4380_v55  ;;  %v8270_v39 = vsub.s32 %v4516_v57, %v4519_v16  ;;  %v4624_v23 = vshrl.u32 %v4619_v9, 16  ;;  %v4646_v50 = vshrl.u32 %v4615_v1, 16 }
 0x27e   :  { %v4627_v58 = vmul.u32 %v4623_v32, %v4622_v6  ;;  %v4645_v0 = vand.u32 65535, %v4615_v1  ;;  %v4729_v2 = vand.u32 2139095040, %v8262_v17  ;;  %v4625_v54 = vmul.u32 %v4623_v32, %v4621_v42 }
 0x27f   :  { %v4626_v29 = vmul.u32 %v4624_v23, %v4621_v42  ;;  %v4382_v62 = vand.u32 2147483647, %v4381_v51  ;;  %v4384_v35 = vcvt.s32.f32 %v4377_v56  ;;  %v4522_v20 = vsub.s32 0, %v8270_v39 }
 0x280   :  { %vm4521_vm6 = vcmp.lt.s32.totalorder %v8270_v39, 0  ;;  %v4628_v25 = vmul.u32 %v4624_v23, %v4622_v6  ;;  %v4631_v22 = vshll.u32 %v4627_v58, 16  ;;  %v4648_v28 = vmul.u32 %v4646_v50, %v4621_v42 }
 0x281   :  { %v4629_v43 = vshll.u32 %v4626_v29, 16  ;;  %v4649_v57 = vmul.u32 %v4645_v0, %v4622_v6  ;;  %v4730_v63 = vshrl.u32 %v4729_v2, 23  ;;  %v4647_v11 = vmul.u32 %v4645_v0, %v4621_v42 }
 0x282   :  { %v4385_v48 = vmul.f32 %v4384_v35, %v4382_v62  ;;  %v4523_v31 = vsel %vm4521_vm6, %v4522_v20, %v8270_v39  ;;  %v4630_v15 = vshrl.u32 %v4626_v29, 16  ;;  %v4650_v16 = vmul.u32 %v4646_v50, %v4622_v6 }
 0x283   :  { %vm4633_vm12 = vc.u32 %v4625_v54, %v4629_v43  ;;  %v4635_v45 = vadd.s32 %v4629_v43, %v4625_v54  ;;  %v4651_v26 = vshll.u32 %v4648_v28, 16  ;;  %v4588_v38 = vshrl.u32 %v8653_v52, %v8203_v19 }
 0x284   :  { %v4634_v47 = vsel %vm4633_vm12, 1, %v8650_v59  ;;  %v4653_v9 = vshll.u32 %v4649_v57, 16  ;;  %v5688_v32 = vadd.s32 4294967169, %v4730_v63  ;;  %v4609_v42 = vsel %vm4607_vm11, %v4597_v18, 2102212464 }
 0x285   :  { %v4636_v55 = vadd.s32 %v4634_v47, %v4628_v25  ;;  %vm4637_vm14 = vc.u32 %v4635_v45, %v4631_v22  ;;  %vm4655_vm8 = vc.u32 %v4647_v11, %v4651_v26  ;;  %v4657_v51 = vadd.s32 %v4651_v26, %v4647_v11 }
 0x286   :  { %v4638_v1 = vsel %vm4637_vm14, 1, %v8650_v59  ;;  %v4386_v23 = vxor.u32 2147483648, %v4385_v48  ;;  %v4524_v29 = vclz %v4523_v31  ;;  %v4632_v0 = vshrl.u32 %v4627_v58, 16 }
 0x287   :  { %v4640_v56 = vadd.s32 %v4638_v1, %v4636_v55  ;;  %v4656_v2 = vsel %vm4655_vm8, 1, %v8650_v59  ;;  %v4652_v50 = vshrl.u32 %v4648_v28, 16  ;;  %vm4659_vm13 = vc.u32 %v4657_v51, %v4653_v9 }
 0x288   :  { %v4658_v54 = vadd.s32 %v4656_v2, %v4650_v16  ;;  %v4608_v19 = vsel %vm4604_vm10, %v4588_v38, %v8232_v60  ;;  %v4610_v18 = vsel %vm4606_vm15, %v8234_v4, %v4609_v42  ;;  %v4660_v62 = vsel %vm4659_vm13, 1, %v8650_v59 }
 0x289   :  { %v4641_v6 = vadd.s32 %v4640_v56, %v4630_v15  ;;  %v4736_v35 = vadd.s32 1, %v5688_v32  ;;  %vm4266_vm1 = vcmp.lt.s32.totalorder %v7780_v10, 0  ;;  %v4654_v58 = vshrl.u32 %v4649_v57, 16 }
 0x28a   :  { %v4662_v20 = vadd.s32 %v4660_v62, %v4658_v54  ;;  %v8293_v25 = vadd.s32 %v4657_v51, %v4653_v9  ;;  %v5683_v22 = vadd.s32 4294967294, %v4524_v29  ;;  %v4611_v60 = vsel %vm4605_vm7, %v4608_v19, %v4610_v18 }
 0x28b   :  { %v8291_v43 = vadd.s32 %v4641_v6, %v4632_v0  ;;  %vm4737_vm2 = vcmp.gt.s32.totalorder %v4736_v35, 0  ;;  %v8719_v4 = vand.u32 2147483647, %v7780_v10  ;;  %v4387_v57 = vsel %vm4266_vm1, %v4386_v23, %v4385_v48 }
 0x28c   :  { %v4663_v28 = vadd.s32 %v4662_v20, %v4652_v50  ;;  %v4738_v63 = vsel %vm4737_vm2, %v4736_v35, 0  ;;  %v4726_v11 = vand.u32 2147483647, %v8262_v17  ;;  %v4665_v47 = vmul.u32 %v8246_v24, %v4611_v60 }
 0x28d   :  { %vm8299_vm5 = vcmp.le.f32.partialorder %v8719_v4, 0.7853982  ;;  %v4740_v31 = vand.u32 31, %v4738_v63  ;;  %vm4667_vm3 = vc.u32 %v8291_v43, %v8293_v25  ;;  %vm5684_vm4 = vcmp.lt.s32.totalorder %v5683_v22, 0 }
 0x28e   :  { %v4664_v15 = vadd.s32 %v4663_v28, %v4654_v58  ;;  %v8314_v55 = vsel %vm8299_vm5, %v7780_v10, %v4387_v57  ;;  %v4733_v48 = vand.u32 8388607, %v4726_v11  ;;  %v8318_v26 = vshrl.u32 %v4738_v63, 5 }
 0x28f   :  { %v8309_v8 = vsub.s32 32, %v4740_v31  ;;  %v4743_v38 = vshll.u32 %v8653_v52, %v4740_v31  ;;  %v4746_v24 = vshll.u32 %v8654_v5, %v4740_v31  ;;  %v4752_v32 = vshll.u32 %v8656_v12, %v4740_v31 }
 0x290   :  { %v4668_v16 = vadd.s32 1, %v4664_v15  ;;  %v4749_v23 = vshll.u32 %v8655_v27, %v4740_v31  ;;  %v4755_v0 = vshll.u32 %v8636_v33, %v4740_v31  ;;  %v8335_v2 = vmul.f32 %v8314_v55, %v8314_v55 }
 0x291   :  { %v4744_v9 = vshrl.u32 %v8654_v5, %v8309_v8  ;;  %v4753_v42 = vshrl.u32 %v8636_v33, %v8309_v8  ;;  %v4747_v51 = vshrl.u32 %v8655_v27, %v8309_v8  ;;  %v4750_v29 = vshrl.u32 %v8656_v12, %v8309_v8 }
 0x292   :  { %v4669_v1 = vsel %vm4667_vm3, %v4668_v16, %v4664_v15  ;;  %v4527_v5 = vsel %vm5684_vm4, 0, %v5683_v22  ;;  %v4734_v50 = vor.u32 8388608, %v4733_v48  ;;  %v4756_v18 = vshrl.u32 %v8637_v37, %v8309_v8 }
 0x293   :  { %v4670_v56 = vadd.s32 %v4669_v1, %v4665_v47  ;;  %v8338_v54 = vor.u32 %v4744_v9, %v4743_v38  ;;  %v4754_v19 = vor.u32 %v4753_v42, %v4752_v32  ;;  %v8344_v62 = vor.u32 %v4747_v51, %v4746_v24 }
 0x294   :  { %v8346_v12 = vor.u32 %v4750_v29, %v4749_v23  ;;  %vm4761_vm9 = vcmp.lt.s32.totalorder %v8318_v26, 4  ;;  %v4757_v33 = vor.u32 %v4756_v18, %v4755_v0  ;;  %vm4758_vm11 = vcmp.lt.s32.totalorder %v8318_v26, 1 }
 0x295   :  { %v4671_v6 = vadd.s32 536870912, %v4670_v56  ;;  %v4400_v35 = vmul.f32 -0.00019511016, %v8335_v2  ;;  %vm4760_vm10 = vcmp.lt.s32.totalorder %v8318_v26, 3  ;;  %v4532_v20 = vsub.s32 4294967266, %v4527_v5 }
 0x296   :  { %v4767_v37 = vsel %vm4761_vm9, %v4754_v19, 920167782  ;;  %v4771_v22 = vsel %vm4761_vm9, %v4757_v33, 1326507024  ;;  %v8357_v60 = vshll.u32 %v4734_v50, 8  ;;  %vm4759_vm15 = vcmp.lt.s32.totalorder %v8318_v26, 2 }
 0x297   :  { %v8342_v27 = vshrl.u32 %v4671_v6, 30  ;;  %v4766_v63 = vsel %vm4758_vm11, %v8338_v54, %v8344_v62  ;;  %v4770_v4 = vsel %vm4758_vm11, %v8344_v62, %v8346_v12  ;;  %v4512_v57 = vadd.s32 %v8193_v46, %v8198_v44 }
 0x298   :  { %v4528_v31 = vsub.s32 32, %v4527_v5  ;;  %v4768_v15 = vsel %vm4760_vm10, %v8346_v12, %v4767_v37  ;;  %v4772_v47 = vsel %vm4760_vm10, %v4754_v19, %v4771_v22  ;;  %v4776_v48 = vshrl.u32 %v8357_v60, 16 }
 0x299   :  { %v4673_v58 = vshll.u32 %v8342_v27, 30  ;;  %v4533_v38 = vadd.s32 127, %v4532_v20  ;;  %v4769_v24 = vsel %vm4759_vm15, %v4766_v63, %v4768_v15  ;;  %v4773_v1 = vsel %vm4759_vm15, %v4770_v4, %v4772_v47 }
 0x29a   :  { %v4775_v46 = vand.u32 65535, %v8357_v60  ;;  %v4393_v44 = vmul.f32 -0.001358992, %v8335_v2  ;;  %v4401_v9 = vadd.f32 0.008332121, %v4400_v35  ;;  %v4777_v42 = vand.u32 65535, %v4773_v1 }
 0x29b   :  { %v4674_v28 = vsub.s32 %v4670_v56, %v4673_v58  ;;  %v4529_v56 = vshll.u32 %v8270_v39, %v4527_v5  ;;  %v4530_v51 = vshrl.u32 %v4512_v57, %v4528_v31  ;;  %v4778_v29 = vshrl.u32 %v4773_v1, 16 }
 0x29c   :  { %v8383_v0 = vmul.u32 %v4777_v42, %v4776_v48  ;;  %v4800_v6 = vshrl.u32 %v4769_v24, 16  ;;  %v4534_v50 = vshll.u32 %v4533_v38, 23  ;;  %v4394_v33 = vadd.f32 0.041655596, %v4393_v44 }
 0x29d   :  { %vm4675_vm7 = vcmp.lt.s32.totalorder %v4674_v28, 0  ;;  %v4676_v16 = vsub.s32 0, %v4674_v28  ;;  %v4780_v18 = vmul.u32 %v4778_v29, %v4775_v46  ;;  %v4402_v58 = vmul.f32 %v4401_v9, %v8335_v2 }
 0x29e   :  { %v4779_v20 = vmul.u32 %v4777_v42, %v4775_v46  ;;  %v4799_v37 = vand.u32 65535, %v4769_v24  ;;  %v4531_v22 = vor.u32 %v4530_v51, %v4529_v56  ;;  %v4666_v35 = vadd.s32 %v8293_v25, %v8291_v43 }
 0x29f   :  { %v4677_v32 = vsel %vm4675_vm7, %v4676_v16, %v4674_v28  ;;  %v4782_v39 = vmul.u32 %v4778_v29, %v4776_v48  ;;  %v4783_v63 = vshll.u32 %v4780_v18, 16  ;;  %v4785_v4 = vshll.u32 %v8383_v0, 16 }
 0x2a0   :  { %v4678_v23 = vclz %v4677_v32  ;;  %v4802_v57 = vmul.u32 %v4800_v6, %v4775_v46  ;;  %v4535_v31 = vor.u32 4788187, %v4534_v50  ;;  %v4784_v38 = vshrl.u32 %v4780_v18, 16 }
 0x2a1   :  { %vm4787_vm12 = vc.u32 %v4779_v20, %v4783_v63  ;;  %v4789_v1 = vadd.s32 %v4783_v63, %v4779_v20  ;;  %v4801_v44 = vmul.u32 %v4799_v37, %v4775_v46  ;;  %v4803_v43 = vmul.u32 %v4799_v37, %v4776_v48 }
 0x2a2   :  { %v5686_v19 = vadd.s32 4294967294, %v4678_v23  ;;  %v4788_v32 = vsel %vm4787_vm12, 1, %v8650_v59  ;;  %v4804_v42 = vmul.u32 %v4800_v6, %v4776_v48  ;;  %v4805_v56 = vshll.u32 %v4802_v57, 16 }
 0x2a3   :  { %v4790_v25 = vadd.s32 %v4788_v32, %v4782_v39  ;;  %vm4791_vm14 = vc.u32 %v4789_v1, %v4785_v4  ;;  %v4742_v29 = vshrl.u32 %v8653_v52, %v8309_v8  ;;  %v4763_v46 = vsel %vm4761_vm9, %v8346_v12, 2102212464 }
 0x2a4   :  { %vm5687_vm6 = vcmp.lt.s32.totalorder %v5686_v19, 0  ;;  %vm4809_vm8 = vc.u32 %v4801_v44, %v4805_v56  ;;  %v4811_v48 = vadd.s32 %v4805_v56, %v4801_v44  ;;  %v4538_v6 = vcvt.s32.f32 %v4531_v22 }
 0x2a5   :  { %v4681_v5 = vsel %vm5687_vm6, 0, %v5686_v19  ;;  %v4807_v19 = vshll.u32 %v4803_v43, 16  ;;  %v4810_v37 = vsel %vm4809_vm8, 1, %v8650_v59  ;;  %v4536_v52 = vand.u32 2147483647, %v4535_v31 }
 0x2a6   :  { %v4682_v15 = vsub.s32 32, %v4681_v5  ;;  %v4683_v47 = vshll.u32 %v4674_v28, %v4681_v5  ;;  %v4686_v16 = vsub.s32 4294967266, %v4681_v5  ;;  %v4792_v28 = vsel %vm4791_vm14, 1, %v8650_v59 }
 0x2a7   :  { %v4794_v50 = vadd.s32 %v4792_v28, %v4790_v25  ;;  %v4812_v5 = vadd.s32 %v4810_v37, %v4804_v42  ;;  %v4806_v63 = vshrl.u32 %v4802_v57, 16  ;;  %vm4813_vm13 = vc.u32 %v4811_v48, %v4807_v19 }
 0x2a8   :  { %v4684_v24 = vshrl.u32 %v4666_v35, %v4682_v15  ;;  %v4687_v9 = vadd.s32 127, %v4686_v16  ;;  %v4786_v35 = vshrl.u32 %v8383_v0, 16  ;;  %vm4574_vm2 = vcmp.lt.s32.totalorder %v8150_v14, 0 }
 0x2a9   :  { %v4795_v39 = vadd.s32 %v4794_v50, %v4784_v38  ;;  %v4762_v12 = vsel %vm4758_vm11, %v4742_v29, %v8338_v54  ;;  %v4764_v4 = vsel %vm4760_vm10, %v8344_v62, %v4763_v46  ;;  %v4814_v22 = vsel %vm4813_vm13, 1, %v8650_v59 }
 0x2aa   :  { %v4685_v51 = vor.u32 %v4684_v24, %v4683_v47  ;;  %v4688_v23 = vshll.u32 %v4687_v9, 23  ;;  %v4395_v0 = vmul.f32 %v4394_v33, %v8335_v2  ;;  %v4808_v47 = vshrl.u32 %v4803_v43, 16 }
 0x2ab   :  { %v4816_v31 = vadd.s32 %v4814_v22, %v4812_v5  ;;  %v4403_v16 = vadd.f32 -0.16666654, %v4402_v58  ;;  %vm8409_vm3 = vcmp.le.f32.partialorder %v4572_v36, 0.7853982  ;;  %v8413_v38 = vadd.s32 %v4795_v39, %v4786_v35 }
 0x2ac   :  { %v4689_v18 = vor.u32 4788187, %v4688_v23  ;;  %v4692_v20 = vcvt.s32.f32 %v4685_v51  ;;  %v8415_v54 = vadd.s32 %v4811_v48, %v4807_v19  ;;  %v4539_v1 = vmul.f32 %v4538_v6, %v4536_v52 }
 0x2ad   :  { %v4765_v59 = vsel %vm4759_vm15, %v4762_v12, %v4764_v4  ;;  %v4817_v33 = vadd.s32 %v4816_v31, %v4806_v63  ;;  %v4388_v44 = vsub.s32 4, %v8132_v21  ;;  %v4396_v24 = vadd.f32 -0.4999988, %v4395_v0 }
 0x2ae   :  { %v4690_v8 = vand.u32 2147483647, %v4689_v18  ;;  %v4404_v9 = vmul.f32 %v4403_v16, %v8335_v2  ;;  %v4819_v43 = vmul.u32 %v8357_v60, %v4765_v59  ;;  %vm4821_vm4 = vc.u32 %v8413_v38, %v8415_v54 }
 0x2af   :  { %v4818_v36 = vadd.s32 %v4817_v33, %v4808_v47  ;;  %v4540_v26 = vxor.u32 2147483648, %v4539_v1  ;;  %vm4420_vm9 = vcmp.lt.s32.totalorder %v7897_v13, 0  ;;  %v4696_v56 = vsub.s32 4, %v8342_v27 }
 0x2b0   :  { %v4693_v15 = vmul.f32 %v4692_v20, %v4690_v8  ;;  %v4389_v28 = vsel %vm4266_vm1, %v4388_v44, %v8132_v21  ;;  %v4397_v46 = vmul.f32 %v4396_v24, %v8335_v2  ;;  %v4405_v60 = vadd.f32 1.0, %v4404_v9 }
 0x2b1   :  { %v4822_v42 = vadd.s32 1, %v4818_v36  ;;  %vm8437_vm11 = vcmp.le.f32.partialorder %v4418_v41, 0.7853982  ;;  %v4541_v18 = vsel %vm4420_vm9, %v4540_v26, %v4539_v1  ;;  %v4391_v6 = vsel %vm8299_vm5, 0, %v4389_v28 }
 0x2b2   :  { %v4694_v62 = vxor.u32 2147483648, %v4693_v15  ;;  %v4697_v21 = vsel %vm4574_vm2, %v4696_v56, %v8342_v27  ;;  %v8448_v39 = vadd.f32 1.0, %v4397_v46  ;;  %v8451_v41 = vmul.f32 %v4405_v60, %v8314_v55 }
 0x2b3   :  { %v4823_v29 = vsel %vm4821_vm4, %v4822_v42, %v4818_v36  ;;  %v8456_v5 = vsel %vm8437_vm11, %v7897_v13, %v4541_v18  ;;  %v4408_v45 = vand.u32 3, %v4391_v6  ;;  %v4699_v27 = vsel %vm8409_vm3, 0, %v4697_v21 }
 0x2b4   :  { %v4695_v58 = vsel %vm4574_vm2, %v4694_v62, %v4693_v15  ;;  %v4824_v50 = vadd.s32 %v4823_v29, %v4819_v43  ;;  %v8465_v4 = vmul.f32 %v8456_v5, %v8456_v5  ;;  %v4716_v0 = vand.u32 3, %v4699_v27 }
 0x2b5   :  { %v4698_v32 = vsel %vm8409_vm3, %v8150_v14, %v4695_v58  ;;  %v4411_v15 = vxor.u32 2147483648, %v8451_v41  ;;  %v4414_v47 = vxor.u32 2147483648, %v8448_v39  ;;  %vm4410_vm1 = vcmp.eq.s32.totalorder %v4408_v45, 0 }
 0x2b6   :  { %v4700_v25 = vmul.f32 %v4698_v32, %v4698_v32  ;;  %v4825_v48 = vadd.s32 536870912, %v4824_v50  ;;  %vm4413_vm5 = vcmp.eq.s32.totalorder %v4408_v45, 2  ;;  %vm4409_vm10 = vcmp.lt.s32.totalorder %v4408_v45, 2 }
 0x2b7   :  { %v4554_v62 = vmul.f32 -0.00019511016, %v8465_v4  ;;  %vm4721_vm7 = vcmp.eq.s32.totalorder %v4716_v0, 2  ;;  %v4412_v44 = vsel %vm4410_vm1, %v8448_v39, %v4411_v15  ;;  %v4415_v24 = vsel %vm4413_vm5, %v4414_v47, %v8451_v41 }
 0x2b8   :  { %v4701_v51 = vmul.f32 -0.001358992, %v4700_v25  ;;  %v4708_v23 = vmul.f32 -0.00019511016, %v4700_v25  ;;  %v8458_v52 = vshrl.u32 %v4825_v48, 30  ;;  %vm4718_vm6 = vcmp.eq.s32.totalorder %v4716_v0, 0 }
 0x2b9   :  { %vm4407_vm12 = vweird.f32 %v7780_v10  ;;  %v4547_v43 = vmul.f32 -0.001358992, %v8465_v4  ;;  %vm4717_vm14 = vcmp.lt.s32.totalorder %v4716_v0, 2  ;;  %vm4715_vm8 = vweird.f32 %v8150_v14 }
 0x2ba   :  { %v4702_v20 = vadd.f32 0.041655596, %v4701_v51  ;;  %v4709_v37 = vadd.f32 0.008332121, %v4708_v23  ;;  %v4827_v12 = vshll.u32 %v8458_v52, 30  ;;  %v5028_v51 = vadd.s32 3, %v4391_v6 }
 0x2bb   :  { %v5338_v23 = vadd.s32 3, %v4699_v27  ;;  %v4820_v28 = vadd.s32 %v8415_v54, %v8413_v38  ;;  %v4548_v60 = vadd.f32 0.041655596, %v4547_v43 }
 0x2bc   :  { %v4703_v2 = vmul.f32 %v4702_v20, %v4700_v25  ;;  %v4710_v35 = vmul.f32 %v4709_v37, %v4700_v25  ;;  %v4828_v31 = vsub.s32 %v4824_v50, %v4827_v12  ;;  %v5029_v18 = vand.u32 3, %v5028_v51 }
 0x2be   :  { %v4704_v8 = vadd.f32 -0.4999988, %v4703_v2  ;;  %v4711_v63 = vadd.f32 -0.16666654, %v4710_v35  ;;  %vm4829_vm15 = vcmp.lt.s32.totalorder %v4828_v31, 0  ;;  %v4830_v1 = vsub.s32 0, %v4828_v31 }
 0x2bf   :  { %vm5031_vm2 = vcmp.eq.s32.totalorder %v5029_v18, 0  ;;  %vm5034_vm3 = vcmp.eq.s32.totalorder %v5029_v18, 2  ;;  %v5339_v2 = vand.u32 3, %v5338_v23  ;;  %vm5030_vm4 = vcmp.lt.s32.totalorder %v5029_v18, 2 }
 0x2c0   :  { %v4705_v55 = vmul.f32 %v4704_v8, %v4700_v25  ;;  %v4712_v22 = vmul.f32 %v4711_v63, %v4700_v25  ;;  %v4831_v58 = vsel %vm4829_vm15, %v4830_v1, %v4828_v31  ;;  %v4416_v25 = vsel %vm4409_vm10, %v4412_v44, %v4415_v24  ;;  %v8489_v8 = vld [vmem:[#allocation2 + $0x1c0] sm:$0xff]  ;;  %v8491_v63 = vld [vmem:[#allocation2 + $0x1c8] sm:$0xff] }
 0x2c1   :  { %v4832_v9 = vclz %v4831_v58  ;;  %v4417_v46 = vsel %vm4407_vm12, nan, %v4416_v25  ;;  %v5033_v54 = vsel %vm5031_vm2, %v8448_v39, %v4411_v15  ;;  %v5036_v45 = vsel %vm5034_vm3, %v4414_v47, %v8451_v41 }
 0x2c2   :  { %v8469_v16 = vadd.f32 1.0, %v4705_v55  ;;  %v4713_v57 = vadd.f32 1.0, %v4712_v22  ;;  %v4542_v55 = vsub.s32 4, %v8237_v34  ;;  %v4549_v22 = vmul.f32 %v4548_v60, %v8465_v4 }
 0x2c3   :  { %v5689_v56 = vadd.s32 4294967294, %v4832_v9  ;;  %vm5340_vm1 = vcmp.lt.s32.totalorder %v5339_v2, 2  ;;  %v4209_v39 = vrot.slane %v8489_v8, 1  ;;  %v4210_v41 = vrot.slane %v8491_v63, 1 }
 0x2c4   :  { %v4714_v59 = vmul.f32 %v4713_v57, %v4698_v32  ;;  %v4722_v33 = vxor.u32 2147483648, %v8469_v16  ;;  %v4555_v32 = vadd.f32 0.008332121, %v4554_v62  ;;  %vm5341_vm5 = vcmp.eq.s32.totalorder %v5339_v2, 0 }
 0x2c5   :  { %vm5690_vm13 = vcmp.lt.s32.totalorder %v5689_v56, 0  ;;  %vm5344_vm10 = vcmp.eq.s32.totalorder %v5339_v2, 2  ;;  %v4543_v58 = vsel %vm4420_vm9, %v4542_v55, %v8237_v34  ;;  %v4550_v9 = vadd.f32 -0.4999988, %v4549_v22  ;;  %v5744_v2 = vld [vmem:[#allocation2 + $0xd0] sm:$0xff] }
 0x2c6   :  { %v4719_v36 = vxor.u32 2147483648, %v4714_v59  ;;  %v4723_v26 = vsel %vm4721_vm7, %v4722_v33, %v4714_v59  ;;  %v4835_v50 = vsel %vm5690_vm13, 0, %v5689_v56  ;;  %v4556_v20 = vmul.f32 %v4555_v32, %v8465_v4  ;;  %v8506_v56 = vld [vmem:[#allocation2 + $0xc0] sm:$0xff] }
 0x2c7   :  { %v4836_v37 = vsub.s32 32, %v4835_v50  ;;  %v4837_v48 = vshll.u32 %v4828_v31, %v4835_v50  ;;  %v4840_v21 = vsub.s32 4294967266, %v4835_v50  ;;  %v5037_v31 = vsel %vm5030_vm4, %v5033_v54, %v5036_v45 }
 0x2c8   :  { %v4720_v42 = vsel %vm4718_vm6, %v8469_v16, %v4719_v36  ;;  %v4557_v57 = vadd.f32 -0.16666654, %v4556_v20  ;;  %v5038_v47 = vsel %vm4407_vm12, nan, %v5037_v31  ;;  %v5343_v44 = vsel %vm5341_vm5, %v8469_v16, %v4719_v36 }
 0x2c9   :  { %v4724_v29 = vsel %vm4717_vm14, %v4720_v42, %v4723_v26  ;;  %v4838_v35 = vshrl.u32 %v4820_v28, %v4836_v37  ;;  %v4841_v38 = vadd.s32 127, %v4840_v21  ;;  %v5346_v24 = vsel %vm5344_vm10, %v4722_v33, %v4714_v59 }
 0x2ca   :  { %v4725_v6 = vsel %vm4715_vm8, nan, %v4724_v29  ;;  %v5347_v26 = vsel %vm5340_vm1, %v5343_v44, %v5346_v24  ;;  %v4558_v25 = vmul.f32 %v4557_v57, %v8465_v4  ;;  %v4211_v10 = vsel %vm129_vm0, %v4209_v39, %v4210_v41 }
 0x2cb   :  { %v4839_v27 = vor.u32 %v4838_v35, %v4837_v48  ;;  %v4842_v12 = vshll.u32 %v4841_v38, 23  ;;  %v4880_v0 = vadd.f32 %v4725_v6, %v4417_v46  ;;  %v5348_v42 = vsel %vm4715_vm8, nan, %v5347_v26 }
 0x2cc   :  { %vm4728_vm15 = vcmp.lt.s32.totalorder %v8262_v17, 0  ;;  %v4850_v34 = vsub.s32 4, %v8458_v52  ;;  %v5504_v16 = vadd.f32 %v5348_v42, %v5038_v47  ;;  %v4545_v59 = vsel %vm8437_vm11, 0, %v4543_v58 }
 0x2cd   :  { %v4843_v1 = vor.u32 4788187, %v4842_v12  ;;  %v4846_v62 = vcvt.s32.f32 %v4839_v27  ;;  %v4882_v43 = vmul.f32 0.5, %v4880_v0  ;;  %vm8519_vm9 = vcmp.le.f32.partialorder %v4726_v11, 0.7853982 }
 0x2ce   :  { %v4551_v36 = vmul.f32 %v4550_v9, %v8465_v4  ;;  %v5506_v51 = vmul.f32 0.5, %v5504_v16  ;;  %v4216_v29 = vadd.f32 %v4211_v10, %v8506_v56  ;;  %v4559_v28 = vadd.f32 1.0, %v4558_v25 }
 0x2cf   :  { %v4844_v15 = vand.u32 2147483647, %v4843_v1  ;;  %v5508_v23 = vmul.f32 %v4882_v43, %v6562_v7  ;;  %v4851_v60 = vsel %vm4728_vm15, %v4850_v34, %v8458_v52  ;;  %v5183_v11 = vadd.s32 3, %v4545_v59 }
 0x2d0   :  { %v5510_v50 = vmul.f32 %v5506_v51, %v8713_v61  ;;  %v4552_v20 = vadd.f32 1.0, %v4551_v36  ;;  %v4560_v4 = vmul.f32 %v4559_v28, %v8456_v5  ;;  %v4853_v48 = vsel %vm8519_vm9, 0, %v4851_v60 }
 0x2d1   :  { %v4847_v32 = vmul.f32 %v4846_v62, %v4844_v15  ;;  %v4220_v35 = vsub.f32 %v4216_v29, %v5744_v2  ;;  %v4562_v52 = vand.u32 3, %v4545_v59  ;;  %v5184_v38 = vand.u32 3, %v5183_v11 }
 0x2d2   :  { %v5512_v37 = vadd.f32 %v5510_v50, %v5508_v23  ;;  %v5516_v12 = vmul.f32 %v4882_v43, %v8714_v49  ;;  %v5518_v55 = vmul.f32 %v5506_v51, %v8715_v40  ;;  %v5493_v22 = vadd.s32 3, %v4853_v48 }
 0x2d3   :  { %v4848_v33 = vxor.u32 2147483648, %v4847_v32  ;;  %v4565_v0 = vxor.u32 2147483648, %v4560_v4  ;;  %v4568_v31 = vxor.u32 2147483648, %v4552_v20  ;;  %v4222_v62 = vsub.f32 %v4220_v35, %v8489_v8 }
 0x2d4   :  { %v8535_v54 = vadd.f32 %v5512_v37, %v8716_v30  ;;  %vm4564_vm11 = vcmp.eq.s32.totalorder %v4562_v52, 0  ;;  %vm4567_vm7 = vcmp.eq.s32.totalorder %v4562_v52, 2  ;;  %vm5186_vm6 = vcmp.eq.s32.totalorder %v5184_v38, 0 }
 0x2d5   :  { %v4849_v46 = vsel %vm4728_vm15, %v4848_v33, %v4847_v32  ;;  %v5520_v44 = vadd.f32 %v5518_v55, %v5516_v12  ;;  %vm4563_vm12 = vcmp.lt.s32.totalorder %v4562_v52, 2  ;;  %v4870_v24 = vand.u32 3, %v4853_v48 }
 0x2d6   :  { %v4852_v19 = vsel %vm8519_vm9, %v8262_v17, %v4849_v46  ;;  %v5524_v5 = vmul.f32 1.442695, %v8535_v54  ;;  %vm5189_vm14 = vcmp.eq.s32.totalorder %v5184_v38, 2  ;;  %v5494_v58 = vand.u32 3, %v5493_v22 }
 0x2d7   :  { %v4854_v18 = vmul.f32 %v4852_v19, %v4852_v19  ;;  %v4566_v9 = vsel %vm4564_vm11, %v4552_v20, %v4565_v0  ;;  %v4569_v43 = vsel %vm4567_vm7, %v4568_v31, %v4560_v4  ;;  %vm5185_vm8 = vcmp.lt.s32.totalorder %v5184_v38, 2 }
 0x2d8   :  { %5730 = vpow2.f32 %v5524_v5  ;;  %v5188_v32 = vsel %vm5186_vm6, %v4552_v20, %v4565_v0  ;;  %v5191_v34 = vsel %vm5189_vm14, %v4568_v31, %v4560_v4  ;;  %v5522_v16 = vadd.f32 %v5520_v44, %v8717_v3 }
 0x2d9   :  { %v4855_v21 = vmul.f32 -0.001358992, %v4854_v18  ;;  %v4862_v6 = vmul.f32 -0.00019511016, %v4854_v18  ;;  %vm4561_vm13 = vweird.f32 %v7897_v13  ;;  %v4570_v14 = vsel %vm4563_vm12, %v4566_v9, %v4569_v43 }
 0x2da   :  { %vm4875_vm2 = vcmp.eq.s32.totalorder %v4870_v24, 2  ;;  %vm5499_vm3 = vcmp.eq.s32.totalorder %v5494_v58, 2  ;;  %vm4871_vm4 = vcmp.lt.s32.totalorder %v4870_v24, 2  ;;  %vm4872_vm1 = vcmp.eq.s32.totalorder %v4870_v24, 0 }
 0x2db   :  { %v4856_v45 = vadd.f32 0.041655596, %v4855_v21  ;;  %v4863_v27 = vadd.f32 0.008332121, %v4862_v6  ;;  %v5192_v23 = vsel %vm5185_vm8, %v5188_v32, %v5191_v34  ;;  %vm5495_vm5 = vcmp.lt.s32.totalorder %v5494_v58, 2 }
 0x2dc   :  { %vm5496_vm10 = vcmp.eq.s32.totalorder %v5494_v58, 0  ;;  %v4571_v11 = vsel %vm4561_vm13, nan, %v4570_v14  ;;  %vm4869_vm15 = vweird.f32 %v8262_v17  ;;  %v4203_v17 = vld [vmem:[#allocation2 + $0xc8] sm:$0xff]  ;;  %v4215_v13 = vsel %vm129_vm0, %v4210_v41, %v4209_v39 }
 0x2dd   :  { %v4857_v57 = vmul.f32 %v4856_v45, %v4854_v18  ;;  %v4864_v1 = vmul.f32 %v4863_v27, %v4854_v18 }
 0x2de   :  { %v5731_v59 = vpop.eup %5730 }
 0x2df   :  { %v4858_v15 = vadd.f32 -0.4999988, %v4857_v57  ;;  %v4865_v47 = vadd.f32 -0.16666654, %v4864_v1  ;;  %v5528_v51 = vmul.f32 %v5731_v59, %v4222_v62 }
 0x2e1   :  { %v4859_v26 = vmul.f32 %v4858_v15, %v4854_v18  ;;  %v4866_v25 = vmul.f32 %v4865_v47, %v4854_v18  ;;  %v5530_v60 = vadd.f32 %v5528_v51, %v5522_v16  ;;  %v5745_v47 = vld [vmem:[#allocation2 + $0xd8] sm:$0xff] }
 0x2e3   :  { %v4860_v42 = vadd.f32 1.0, %v4859_v26  ;;  %v4867_v10 = vadd.f32 1.0, %v4866_v25  ;;  %v5532_v20 = vsub.f32 %v5530_v60, %v4222_v62 }
 0x2e5   :  { %v4868_v33 = vmul.f32 %v4867_v10, %v4852_v19  ;;  %v4876_v36 = vxor.u32 2147483648, %v4860_v42  ;;  %v5193_v19 = vsel %vm4561_vm13, nan, %v5192_v23  ;;  %v5534_v6 = vadd.f32 %v5532_v20, %v8506_v56 }
 0x2e6   :  { %v4217_v56 = vadd.f32 %v4215_v13, %v4203_v17 }
 0x2e7   :  { %v4873_v29 = vxor.u32 2147483648, %v4868_v33  ;;  %v4877_v28 = vsel %vm4875_vm2, %v4876_v36, %v4868_v33  ;;  %v5501_v46 = vsel %vm5499_vm3, %v4876_v36, %v4868_v33  ;;  %v5536_v52 = vadd.f32 3.1415927, %v5534_v6 }
 0x2e8   :  { %v4221_v39 = vsub.f32 %v4217_v56, %v5745_v47 }
 0x2e9   :  { %v4874_v50 = vsel %vm4872_vm1, %v4860_v42, %v4873_v29  ;;  %v5498_v18 = vsel %vm5496_vm10, %v4860_v42, %v4873_v29  ;;  %v5538_v27 = vmul.f32 0.15915494, %v5536_v52 }
 0x2ea   :  { %v4878_v37 = vsel %vm4871_vm4, %v4874_v50, %v4877_v28  ;;  %v5502_v4 = vsel %vm5495_vm5, %v5498_v18, %v5501_v46  ;;  %v4223_v24 = vsub.f32 %v4221_v39, %v8491_v63 }
 0x2eb   :  { %v4879_v48 = vsel %vm4869_vm15, nan, %v4878_v37  ;;  %v5503_v21 = vsel %vm4869_vm15, nan, %v5502_v4  ;;  %v5540_v22 = vfloor.f32 %v5538_v27 }
 0x2ec   :  { %v4881_v2 = vadd.f32 %v4879_v48, %v4571_v11  ;;  %v5505_v35 = vadd.f32 %v5503_v21, %v5193_v19 }
 0x2ed   :  { %v5542_v0 = vmul.f32 6.2831855, %v5540_v22 }
 0x2ee   :  { %v4883_v38 = vmul.f32 0.5, %v4881_v2  ;;  %v5507_v45 = vmul.f32 0.5, %v5505_v35 }
 0x2ef   :  { %v5544_v62 = vsub.f32 %v5536_v52, %v5542_v0 }
 0x2f0   :  { %v5509_v12 = vmul.f32 %v4883_v38, %v6562_v7  ;;  %v5511_v55 = vmul.f32 %v5507_v45, %v8713_v61  ;;  %v5517_v57 = vmul.f32 %v4883_v38, %v8714_v49  ;;  %v5519_v1 = vmul.f32 %v5507_v45, %v8715_v40 }
 0x2f1   :  { %v5703_v41 = vadd.f32 -3.1415927, %v5544_v62 }
 0x2f2   :  { %v5513_v5 = vadd.f32 %v5511_v55, %v5509_v12  ;;  %v5521_v61 = vadd.f32 %v5519_v1, %v5517_v57 }
 0x2f3   :  { %5549 = vst [vmem:[#allocation7 + $0xc0] sm:$0xff] %v5703_v41 }
 0x2f4   :  { %v5515_v31 = vadd.f32 %v5513_v5, %v8716_v30  ;;  %v5523_v30 = vadd.f32 %v5521_v61, %v8717_v3 }
 0x2f6   :  { %v5526_v8 = vmul.f32 1.442695, %v5515_v31  ;;  %v5551_v15 = vadd.f32 %v5515_v31, %v8535_v54 }
 0x2f8   :  { %5732 = vpow2.f32 %v5526_v8  ;;  %v5552_v7 = vrot.slane %v5551_v15, 4 }
 0x2fa   :  { %v5553_v44 = vadd.f32 %v5552_v7, %v5551_v15 }
 0x2fc   :  { %v5554_v58 = vrot.slane %v5553_v44, 2 }
 0x2fe   :  { %v5733_v49 = vpop.eup %5732  ;;  %v5555_v9 = vadd.f32 %v5554_v58, %v5553_v44 }
 0x2ff   :  { %v5529_v40 = vmul.f32 %v5733_v49, %v4223_v24 }
 0x300   :  { %v5556_v43 = vrot.slane %v5555_v9, 1 }
 0x301   :  { %v5531_v26 = vadd.f32 %v5529_v40, %v5523_v30 }
 0x302   :  { %v5557_v54 = vadd.f32 %v5556_v43, %v5555_v9 }
 0x303   :  { %v5533_v25 = vsub.f32 %v5531_v26, %v4223_v24 }
 0x304   :  { %v5558_v32 = vadd.f32 %v5557_v54, %v8142_v53 }
 0x305   :  { %v5535_v63 = vadd.f32 %v5533_v25, %v4203_v17 }
 0x306   :  { %5559 = vst [vmem:[#allocation8] sm:$0x1] %v5558_v32 }
 0x307   :  { %v5537_v3 = vadd.f32 3.1415927, %v5535_v63  ;;  %5583 = dma.vmem_to_hbm [thread:$0]  %s5579_s28, 16, %s5581_s4, [#allocation9]  }
 0x309   :  { %v5539_v42 = vmul.f32 0.15915494, %v5537_v3 }
 0x30b   :  { %v5541_v10 = vfloor.f32 %v5539_v42 }
 0x30d   :  { %v5543_v34 = vmul.f32 6.2831855, %v5541_v10 }
 0x30f   :  { %v5545_v16 = vsub.f32 %v5537_v3, %v5543_v34 }
 0x311   :  { %v5704_v59 = vadd.f32 -3.1415927, %v5545_v16 }
 0x313   :  { %5550 = vst [vmem:[#allocation7 + $0xc8] sm:$0xff] %v5704_v59 }
 0x314   :  { %5572 = dma.vmem_to_hbm [thread:$0]  %s5565_s6, 4096, %s5567_s9, [#allocation4], %s5839_s20, %s5839_s20, %s5840_s21  }
 0x315   :  { %5834 = dma.done.wait [#allocation4], 4096  }
 0x316   :  { %5835 = vsyncadd [#allocation4], 4294963200 }
 0x317   :  { %5836 = dma.done.wait [#allocation9], 16  }
 0x318   :  { %5837 = vsyncadd [#allocation9], 4294967280 }
 0x319   :  { %5592 = vsyncpa [#allocation3], 1 }
 0x31a   :  { %5593 = vsyncpa [#allocation4], 1 }
 0x31b   :  { %5594 = vsyncpa [#allocation9], 1 }
 0x31c   :  { %5595 = vsyncpa [#allocation5], 1 }

</bundles_post_ra>
